<compile_context>
chip_gen: v6e
topology: v6e:2x2x1
jax: 0.10.0
libtpu: 0.0.40
codegen_flags: <defaults>
</compile_context>

<pallas_src>
import functools

import jax
import jax.numpy as jnp
from jax.experimental import pallas as pl
from jax.experimental.pallas import tpu as pltpu

# ----------------------------- configuration --------------------------------
HIDDEN = 32          # hidden_size
ACT_DIM = 7          # act_dim
SEQ_LEN = 2          # sequence_length
CHUNK = 4            # chunk_size
PREV_BUF = 3         # prev_action_buffer_size
LANG_FEAT = 48       # lang_feat_dim
IMG_FEAT = 64        # img_feat_dim
PATCH_FEAT = 48      # patch_feat_dim (= 3 * 4 * 4 for 4x4 patches of a 3-ch image)
N_HEADS = 8          # cross_attention / transformer heads
VOCAB = 50           # stand-in language vocab
N_LANG_TOK = 5
IMG_HW = 16
PATCH = 4

# Fixed order in which weight arrays are passed to the fused kernel.
WEIGHT_NAMES = (
    "cond", "acq",
    "lang_wt", "lang_b", "img_wt", "img_b", "patch_wt", "patch_b",
    "prev_wt", "prev_b", "ln_g", "ln_b",
    "ct_ln1_g", "ct_ln1_b", "ct_wqkv_t", "ct_bqkv", "ct_wo_t", "ct_bo",
    "ct_ln2_g", "ct_ln2_b", "ct_ffn_w1_t", "ct_ffn_b1", "ct_ffn_w2_t", "ct_ffn_b2",
    "ca_wq_t", "ca_bq", "ca_wkv_t", "ca_bkv", "ca_wo_t", "ca_bo",
    "mlp1_wt", "mlp1_b", "mlp2_wt", "mlp2_b", "head_wt", "head_b",
)


# --------------------------- in-kernel helpers --------------------------------
def _layer_norm(x, g, b, eps=1e-5):
    mu = jnp.mean(x, axis=-1, keepdims=True)
    var = jnp.mean(jnp.square(x - mu), axis=-1, keepdims=True)
    return (x - mu) * jax.lax.rsqrt(var + eps) * g + b


def _split_heads(x, n_heads):
    """[T, H] -> [n_heads, T, H // n_heads] via static lane slices (cheap relayout)."""
    d = x.shape[-1] // n_heads
    return jnp.concatenate(
        [x[None, :, h * d:(h + 1) * d] for h in range(n_heads)], axis=0)


def _merge_heads(x):
    """[n_heads, T, d] -> [T, n_heads * d]."""
    return jnp.concatenate([x[h] for h in range(x.shape[0])], axis=-1)


def _mha(q, k, v, add_mask, n_heads):
    """Multi-head attention on 2-D [T, H] operands (eval mode; dropout disabled).

    Heads are processed as a single batched contraction (no per-head matmul loop);
    softmax normalization uses the EUP approximate reciprocal.
    """
    d = q.shape[-1] // n_heads
    scale = 1.0 / float(d) ** 0.5
    qh = _split_heads(q, n_heads)          # [h, Tq, d]
    kh = _split_heads(k, n_heads)          # [h, Tk, d]
    vh = _split_heads(v, n_heads)          # [h, Tk, d]
    s = jnp.einsum("hqd,hkd->hqk", qh, kh,
                   preferred_element_type=jnp.float32) * scale
    if add_mask is not None:
        s = s + add_mask[None]
    s = s - jnp.max(s, axis=-1, keepdims=True)
    p = jnp.exp(s)
    p = p * pl.reciprocal(jnp.sum(p, axis=-1, keepdims=True), approx=True)
    ctx = jnp.einsum("hqk,hkd->hqd", p, vh, preferred_element_type=jnp.float32)
    return _merge_heads(ctx)               # [Tq, H]


# ------------------------------ fused kernel ----------------------------------
def _action_gpt_kernel(lang_ref, obs_ref, patch_ref, prev_ref, rv_ref, *rest,
                       n_heads, n_lang, n_patch, n_prev, n_query, has_prev):
    f32 = jnp.float32
    nw = len(WEIGHT_NAMES)
    w = dict(zip(WEIGHT_NAMES, rest[:nw]))
    out_ref = rest[nw]
    tok_ref = rest[nw + 1]                                   # VMEM scratch [T, H]

    cond = w["cond"][...]                                    # [1, H]
    hidden = cond.shape[-1]

    # ---- embedding projections (+ condition embedding) ----
    lang_emb = (jnp.dot(lang_ref[0], w["lang_wt"][...], preferred_element_type=f32)
                + w["lang_b"][...] + cond)
    patch_emb = (jnp.dot(patch_ref[0], w["patch_wt"][...], preferred_element_type=f32)
                 + w["patch_b"][...] + cond)
    obs_emb = (jnp.dot(obs_ref[0], w["img_wt"][...], preferred_element_type=f32)
               + w["img_b"][...] + cond)
    if has_prev:
        prev_emb = (jnp.dot(prev_ref[0], w["prev_wt"][...], preferred_element_type=f32)
                    + w["prev_b"][...] + cond)
    else:
        prev_emb = jnp.zeros((n_prev, hidden), f32)

    # ---- assemble token sequence via static row-offset stores into VMEM scratch ----
    off = 0
    tok_ref[pl.ds(off, n_lang), :] = lang_emb
    off += n_lang
    tok_ref[pl.ds(off, n_patch), :] = patch_emb
    off += n_patch
    tok_ref[pl.ds(off, 1), :] = obs_emb
    off += 1
    tok_ref[pl.ds(off, n_prev), :] = prev_emb
    off += n_prev
    tok_ref[pl.ds(off, n_query), :] = w["acq"][...]

    stacked = _layer_norm(tok_ref[...], w["ln_g"][...], w["ln_b"][...])   # embed_ln
    t_total = stacked.shape[0]

    # ---- additive attention mask: causal AND language-row validity ----
    rows = jax.lax.broadcasted_iota(jnp.int32, (t_total, t_total), 0)
    cols = jax.lax.broadcasted_iota(jnp.int32, (t_total, t_total), 1)
    causal = (rows >= cols).astype(f32)
    allow = rv_ref[0] * causal                                # rv_ref[0]: [T, 1]
    add_mask = jnp.where(allow > 0.0, 0.0, -1e9).astype(f32)

    # ---- stand-in causal transformer: one pre-LN block (self-attn + FFN) ----
    # TODO(synk): external model_causal_transformer is an injected frozen module;
    #             replaced by this single deterministic pre-LN block.
    h1 = _layer_norm(stacked, w["ct_ln1_g"][...], w["ct_ln1_b"][...])
    qkv = (jnp.dot(h1, w["ct_wqkv_t"][...], preferred_element_type=f32)
           + w["ct_bqkv"][...])                               # fused QKV: [T, 3H]
    q = qkv[:, :hidden]
    k = qkv[:, hidden:2 * hidden]
    v = qkv[:, 2 * hidden:]
    attn = _mha(q, k, v, add_mask, n_heads)
    attn = jnp.dot(attn, w["ct_wo_t"][...], preferred_element_type=f32) + w["ct_bo"][...]
    x = stacked + attn
    h2 = _layer_norm(x, w["ct_ln2_g"][...], w["ct_ln2_b"][...])
    ff = jax.nn.gelu(jnp.dot(h2, w["ct_ffn_w1_t"][...], preferred_element_type=f32)
                     + w["ct_ffn_b1"][...])
    ff = jnp.dot(ff, w["ct_ffn_w2_t"][...], preferred_element_type=f32) + w["ct_ffn_b2"][...]
    hs = x + ff                                               # [T, H]

    # ---- cross attention: action-query hidden vs patch embeddings (eval mode) ----
    aq_start = n_lang + n_patch + 1 + n_prev
    aq = hs[aq_start:aq_start + n_query]                      # [Sq, H]
    cq = jnp.dot(aq, w["ca_wq_t"][...], preferred_element_type=f32) + w["ca_bq"][...]
    ckv = (jnp.dot(patch_emb, w["ca_wkv_t"][...], preferred_element_type=f32)
           + w["ca_bkv"][...])                                # fused KV: [Np, 2H]
    ck, cv = ckv[:, :hidden], ckv[:, hidden:]
    ca = _mha(cq, ck, cv, None, n_heads)
    ca = jnp.dot(ca, w["ca_wo_t"][...], preferred_element_type=f32) + w["ca_bo"][...]
    act_emb = ca + aq                                         # [Sq, H]

    # ---- prediction heads (arm ++ gripper fused into one ACT_DIM-wide matmul) ----
    h = jnp.maximum(jnp.dot(act_emb, w["mlp1_wt"][...], preferred_element_type=f32)
                    + w["mlp1_b"][...], 0.0)
    h = jnp.maximum(jnp.dot(h, w["mlp2_wt"][...], preferred_element_type=f32)
                    + w["mlp2_b"][...], 0.0)
    out = jnp.dot(h, w["head_wt"][...], preferred_element_type=f32) + w["head_b"][...]
    out_ref[0] = out.astype(out_ref.dtype)


def _fused_forward(lang_feats, obs_feats, patch_feats, prev_actions, row_valid,
                   weights, *, has_prev):
    B, n_lang, _ = lang_feats.shape
    n_patch = patch_feats.shape[1]
    n_prev = prev_actions.shape[1]
    n_query = weights["acq"].shape[0]
    hidden = weights["cond"].shape[-1]
    t_total = n_lang + n_patch + 1 + n_prev + n_query

    batch_inputs = [lang_feats, obs_feats, patch_feats, prev_actions, row_valid]
    weight_inputs = [weights[name] for name in WEIGHT_NAMES]

    def batch_spec(arr):
        nd = arr.ndim
        return pl.BlockSpec((1,) + arr.shape[1:],
                            lambda b, _nd=nd: (b,) + (0,) * (_nd - 1))

    def bcast_spec(arr):
        nd = arr.ndim
        return pl.BlockSpec(arr.shape, lambda b, _nd=nd: (0,) * _nd)

    in_specs = ([batch_spec(a) for a in batch_inputs]
                + [bcast_spec(a) for a in weight_inputs])

    kernel = functools.partial(
        _action_gpt_kernel, n_heads=N_HEADS, n_lang=n_lang, n_patch=n_patch,
        n_prev=n_prev, n_query=n_query, has_prev=has_prev)

    return pl.pallas_call(
        kernel,
        out_shape=jax.ShapeDtypeStruct((B, n_query, ACT_DIM), jnp.float32),
        grid=(B,),
        in_specs=in_specs,
        out_specs=pl.BlockSpec((1, n_query, ACT_DIM), lambda b: (b, 0, 0)),
        scratch_shapes=[pltpu.VMEM((t_total, hidden), jnp.float32)],
        compiler_params=pltpu.CompilerParams(dimension_semantics=("parallel",)),
    )(*batch_inputs, *weight_inputs)


# -------------------- host-side weight preparation ----------------------------
def _prep_weights(params):
    H = HIDDEN
    Hh = H // 2
    ct = params["ct"]
    w = {}
    w["cond"] = params["embed_condition"].reshape(1, H)
    w["acq"] = (params["action_queries"]
                + params["action_chunk_queries"]).reshape(SEQ_LEN * CHUNK, H)
    w["lang_wt"] = params["embed_lang_w"].T;   w["lang_b"] = params["embed_lang_b"].reshape(1, H)
    w["img_wt"] = params["embed_img_w"].T;     w["img_b"] = params["embed_img_b"].reshape(1, H)
    w["patch_wt"] = params["embed_patch_w"].T; w["patch_b"] = params["embed_patch_b"].reshape(1, H)
    w["prev_wt"] = params["embed_prev_w"].T;   w["prev_b"] = params["embed_prev_b"].reshape(1, H)
    w["ln_g"] = params["embed_ln_g"].reshape(1, H)
    w["ln_b"] = params["embed_ln_b"].reshape(1, H)
    # stand-in causal transformer block
    w["ct_ln1_g"] = ct["ln1_g"].reshape(1, H)
    w["ct_ln1_b"] = ct["ln1_b"].reshape(1, H)
    w["ct_wqkv_t"] = jnp.concatenate([ct["wq"], ct["wk"], ct["wv"]], axis=0).T   # [H, 3H]
    w["ct_bqkv"] = jnp.concatenate([ct["bq"], ct["bk"], ct["bv"]]).reshape(1, 3 * H)
    w["ct_wo_t"] = ct["wo"].T
    w["ct_bo"] = ct["bo"].reshape(1, H)
    w["ct_ln2_g"] = ct["ln2_g"].reshape(1, H)
    w["ct_ln2_b"] = ct["ln2_b"].reshape(1, H)
    w["ct_ffn_w1_t"] = ct["ffn_w1"].T          # [H, 4H]
    w["ct_ffn_b1"] = ct["ffn_b1"].reshape(1, 4 * H)
    w["ct_ffn_w2_t"] = ct["ffn_w2"].T          # [4H, H]
    w["ct_ffn_b2"] = ct["ffn_b2"].reshape(1, H)
    # cross attention (Q separate; K,V fused since they share the patch input)
    wq, wk, wv = jnp.split(params["ca_in_proj_w"], 3, axis=0)
    bq, bk, bv = jnp.split(params["ca_in_proj_b"], 3)
    w["ca_wq_t"] = wq.T
    w["ca_bq"] = bq.reshape(1, H)
    w["ca_wkv_t"] = jnp.concatenate([wk, wv], axis=0).T       # [H, 2H]
    w["ca_bkv"] = jnp.concatenate([bk, bv]).reshape(1, 2 * H)
    w["ca_wo_t"] = params["ca_out_w"].T
    w["ca_bo"] = params["ca_out_b"].reshape(1, H)
    # prediction heads: arm (6) ++ gripper (1) fused into one ACT_DIM-wide head
    w["mlp1_wt"] = params["mlp1_w"].T;          w["mlp1_b"] = params["mlp1_b"].reshape(1, Hh)
    w["mlp2_wt"] = params["mlp2_w"].T;          w["mlp2_b"] = params["mlp2_b"].reshape(1, Hh)
    w["head_wt"] = jnp.concatenate([params["arm_w"], params["grip_w"]], axis=0).T  # [Hh, ACT_DIM]
    w["head_b"] = jnp.concatenate([params["arm_b"], params["grip_b"]]).reshape(1, ACT_DIM)
    return w


# ------------------------------- forward pass ---------------------------------
def action_gpt_forward(params, rgb, language, prev_actions=None,
                       lang_attention_mask=None):
    # TODO(synk): an externally supplied `attention_mask` override is not supported;
    #             only the default construction path of the reference forward is used.
    B = rgb.shape[0]

    # ---- frozen external submodules (stand-ins, plain jnp) ----
    # TODO(synk): model_lang replaced by an embedding-table lookup.
    lang_feats = params["lang_table"][language]               # [B, L, LANG_FEAT]
    # TODO(synk): model_vision replaced by patchify + mean pooling + linear.
    _, C, Hh, Ww = rgb.shape
    x = rgb.reshape(B, C, Hh // PATCH, PATCH, Ww // PATCH, PATCH)
    patch_feats = jnp.transpose(x, (0, 2, 4, 1, 3, 5)).reshape(
        B, (Hh // PATCH) * (Ww // PATCH), C * PATCH * PATCH)  # [B, Np, PATCH_FEAT]
    pooled = jnp.mean(patch_feats, axis=1)
    obs_feats = (pooled @ params["w_obs"].T + params["b_obs"])[:, None, :]  # [B, 1, IMG_FEAT]

    n_lang = lang_feats.shape[1]
    n_patch = patch_feats.shape[1]
    n_query = SEQ_LEN * CHUNK
    t_total = n_lang + n_patch + 1 + PREV_BUF + n_query

    # Row-validity vector (matches the reference: lang query rows take the lang mask,
    # all other rows are fully valid; causality is applied inside the kernel).
    if lang_attention_mask is not None:
        rv_lang = lang_attention_mask.astype(jnp.float32)
    else:
        rv_lang = jnp.ones((B, n_lang), jnp.float32)
    row_valid = jnp.concatenate(
        [rv_lang, jnp.ones((B, t_total - n_lang), jnp.float32)], axis=1)[:, :, None]

    has_prev = prev_actions is not None
    if not has_prev:
        prev_actions = jnp.zeros((B, PREV_BUF, ACT_DIM), jnp.float32)

    weights = _prep_weights(params)
    out = _fused_forward(lang_feats, obs_feats, patch_feats, prev_actions,
                         row_valid, weights, has_prev=has_prev)      # [B, Sq, ACT_DIM]

    arm = out[..., :ACT_DIM - 1].reshape(B, SEQ_LEN, CHUNK, ACT_DIM - 1)
    grip = out[..., ACT_DIM - 1:].reshape(B, SEQ_LEN, CHUNK, 1)
    return {"arm_action_preds": arm, "gripper_action_preds": grip}


# ------------------------------- parameters ----------------------------------
def init_params(key):
    keys = iter(jax.random.split(key, 64))

    def w(shape, scale=0.02):
        return scale * jax.random.normal(next(keys), shape, jnp.float32)

    H, Hh = HIDDEN, HIDDEN // 2
    p = {}
    # stand-in frozen submodule params
    p["lang_table"] = w((VOCAB, LANG_FEAT), 1.0)
    p["w_obs"] = w((IMG_FEAT, PATCH_FEAT))
    p["b_obs"] = jnp.zeros((IMG_FEAT,), jnp.float32)
    # ActionGPT params
    p["embed_condition"] = w((1, H))
    p["embed_lang_w"] = w((H, LANG_FEAT));   p["embed_lang_b"] = jnp.zeros((H,))
    p["embed_img_w"] = w((H, IMG_FEAT));     p["embed_img_b"] = jnp.zeros((H,))
    p["embed_patch_w"] = w((H, PATCH_FEAT)); p["embed_patch_b"] = jnp.zeros((H,))
    p["embed_prev_w"] = w((H, ACT_DIM));     p["embed_prev_b"] = jnp.zeros((H,))
    p["action_queries"] = w((1, H))
    p["action_chunk_queries"] = jnp.zeros((SEQ_LEN * CHUNK, H), jnp.float32)  # .fill_(0)
    p["embed_ln_g"] = jnp.ones((H,));        p["embed_ln_b"] = jnp.zeros((H,))
    p["ca_in_proj_w"] = w((3 * H, H));       p["ca_in_proj_b"] = jnp.zeros((3 * H,))
    p["ca_out_w"] = w((H, H));               p["ca_out_b"] = jnp.zeros((H,))
    p["mlp1_w"] = w((Hh, H));                p["mlp1_b"] = jnp.zeros((Hh,))
    p["mlp2_w"] = w((Hh, Hh));               p["mlp2_b"] = jnp.zeros((Hh,))
    p["arm_w"] = w((ACT_DIM - 1, Hh));       p["arm_b"] = jnp.zeros((ACT_DIM - 1,))
    p["grip_w"] = w((1, Hh));                p["grip_b"] = jnp.zeros((1,))
    # causal transformer stand-in
    ct = {
        "ln1_g": jnp.ones((H,)), "ln1_b": jnp.zeros((H,)),
        "wq": w((H, H)), "wk": w((H, H)), "wv": w((H, H)), "wo": w((H, H)),
        "bq": jnp.zeros((H,)), "bk": jnp.zeros((H,)),
        "bv": jnp.zeros((H,)), "bo": jnp.zeros((H,)),
        "ln2_g": jnp.ones((H,)), "ln2_b": jnp.zeros((H,)),
        "ffn_w1": w((4 * H, H)), "ffn_b1": jnp.zeros((4 * H,)),
        "ffn_w2": w((H, 4 * H)), "ffn_b2": jnp.zeros((H,)),
    }
    p["ct"] = ct
    return p


# ---------------------------------- main --------------------------------------
if __name__ == "__main__":
    params = init_params(jax.random.PRNGKey(0))

    k_rgb, k_lang, k_prev = jax.random.split(jax.random.PRNGKey(0), 3)
    rgb = jax.random.normal(k_rgb, (2, 3, IMG_HW, IMG_HW), jnp.float32)      # NCHW
    language = jax.random.randint(k_lang, (2, N_LANG_TOK), 0, VOCAB)
    prev_actions = jax.random.normal(k_prev, (2, PREV_BUF, ACT_DIM), jnp.float32)

    forward = jax.jit(action_gpt_forward)
    out = forward(params, rgb, language, prev_actions)
    out = jax.block_until_ready(out)

    assert out["arm_action_preds"].shape == (2, SEQ_LEN, CHUNK, ACT_DIM - 1)
    assert out["gripper_action_preds"].shape == (2, SEQ_LEN, CHUNK, 1)
    assert bool(jnp.all(jnp.isfinite(out["arm_action_preds"])))
    assert bool(jnp.all(jnp.isfinite(out["gripper_action_preds"])))
    print("KERNEL_OK")
</pallas_src>

<mosaic_0001>
module attributes {stable_mosaic.version = 11 : i64} {
  func.func @_action_gpt_kernel(%arg0: i32, %arg1: memref<1x5x48xf32, #tpu.memory_space<vmem>>, %arg2: memref<1x1x64xf32, #tpu.memory_space<vmem>>, %arg3: memref<1x16x48xf32, #tpu.memory_space<vmem>>, %arg4: memref<1x3x7xf32, #tpu.memory_space<vmem>>, %arg5: memref<1x33x1xf32, #tpu.memory_space<vmem>>, %arg6: memref<1x32xf32, #tpu.memory_space<vmem>>, %arg7: memref<8x32xf32, #tpu.memory_space<vmem>>, %arg8: memref<48x32xf32, #tpu.memory_space<vmem>>, %arg9: memref<1x32xf32, #tpu.memory_space<vmem>>, %arg10: memref<64x32xf32, #tpu.memory_space<vmem>>, %arg11: memref<1x32xf32, #tpu.memory_space<vmem>>, %arg12: memref<48x32xf32, #tpu.memory_space<vmem>>, %arg13: memref<1x32xf32, #tpu.memory_space<vmem>>, %arg14: memref<7x32xf32, #tpu.memory_space<vmem>>, %arg15: memref<1x32xf32, #tpu.memory_space<vmem>>, %arg16: memref<1x32xf32, #tpu.memory_space<vmem>>, %arg17: memref<1x32xf32, #tpu.memory_space<vmem>>, %arg18: memref<1x32xf32, #tpu.memory_space<vmem>>, %arg19: memref<1x32xf32, #tpu.memory_space<vmem>>, %arg20: memref<32x96xf32, #tpu.memory_space<vmem>>, %arg21: memref<1x96xf32, #tpu.memory_space<vmem>>, %arg22: memref<32x32xf32, #tpu.memory_space<vmem>>, %arg23: memref<1x32xf32, #tpu.memory_space<vmem>>, %arg24: memref<1x32xf32, #tpu.memory_space<vmem>>, %arg25: memref<1x32xf32, #tpu.memory_space<vmem>>, %arg26: memref<32x128xf32, #tpu.memory_space<vmem>>, %arg27: memref<1x128xf32, #tpu.memory_space<vmem>>, %arg28: memref<128x32xf32, #tpu.memory_space<vmem>>, %arg29: memref<1x32xf32, #tpu.memory_space<vmem>>, %arg30: memref<32x32xf32, #tpu.memory_space<vmem>>, %arg31: memref<1x32xf32, #tpu.memory_space<vmem>>, %arg32: memref<32x64xf32, #tpu.memory_space<vmem>>, %arg33: memref<1x64xf32, #tpu.memory_space<vmem>>, %arg34: memref<32x32xf32, #tpu.memory_space<vmem>>, %arg35: memref<1x32xf32, #tpu.memory_space<vmem>>, %arg36: memref<32x16xf32, #tpu.memory_space<vmem>>, %arg37: memref<1x16xf32, #tpu.memory_space<vmem>>, %arg38: memref<16x16xf32, #tpu.memory_space<vmem>>, %arg39: memref<1x16xf32, #tpu.memory_space<vmem>>, %arg40: memref<16x7xf32, #tpu.memory_space<vmem>>, %arg41: memref<1x7xf32, #tpu.memory_space<vmem>>, %arg42: memref<1x8x7xf32, #tpu.memory_space<vmem>>, %arg43: memref<33x32xf32, #tpu.memory_space<vmem>>) attributes {dimension_semantics = [#tpu.dimension_semantics<parallel>], iteration_bounds = array<i64: 2>, scalar_prefetch = 0 : i64, scratch_operands = 1 : i64, tpu.core_type = #tpu.core_type<tc>, window_params = [{transform_indices = @transform_0, window_bounds = array<i64: 1, 5, 48>}, {transform_indices = @transform_1, window_bounds = array<i64: 1, 1, 64>}, {transform_indices = @transform_2, window_bounds = array<i64: 1, 16, 48>}, {transform_indices = @transform_3, window_bounds = array<i64: 1, 3, 7>}, {transform_indices = @transform_4, window_bounds = array<i64: 1, 33, 1>}, {pipeline_mode = #tpu.pipeline_mode<synchronous>, transform_indices = @transform_5, window_bounds = array<i64: 1, 32>}, {pipeline_mode = #tpu.pipeline_mode<synchronous>, transform_indices = @transform_6, window_bounds = array<i64: 8, 32>}, {pipeline_mode = #tpu.pipeline_mode<synchronous>, transform_indices = @transform_7, window_bounds = array<i64: 48, 32>}, {pipeline_mode = #tpu.pipeline_mode<synchronous>, transform_indices = @transform_8, window_bounds = array<i64: 1, 32>}, {pipeline_mode = #tpu.pipeline_mode<synchronous>, transform_indices = @transform_9, window_bounds = array<i64: 64, 32>}, {pipeline_mode = #tpu.pipeline_mode<synchronous>, transform_indices = @transform_10, window_bounds = array<i64: 1, 32>}, {pipeline_mode = #tpu.pipeline_mode<synchronous>, transform_indices = @transform_11, window_bounds = array<i64: 48, 32>}, {pipeline_mode = #tpu.pipeline_mode<synchronous>, transform_indices = @transform_12, window_bounds = array<i64: 1, 32>}, {pipeline_mode = #tpu.pipeline_mode<synchronous>, transform_indices = @transform_13, window_bounds = array<i64: 7, 32>}, {pipeline_mode = #tpu.pipeline_mode<synchronous>, transform_indices = @transform_14, window_bounds = array<i64: 1, 32>}, {pipeline_mode = #tpu.pipeline_mode<synchronous>, transform_indices = @transform_15, window_bounds = array<i64: 1, 32>}, {pipeline_mode = #tpu.pipeline_mode<synchronous>, transform_indices = @transform_16, window_bounds = array<i64: 1, 32>}, {pipeline_mode = #tpu.pipeline_mode<synchronous>, transform_indices = @transform_17, window_bounds = array<i64: 1, 32>}, {pipeline_mode = #tpu.pipeline_mode<synchronous>, transform_indices = @transform_18, window_bounds = array<i64: 1, 32>}, {pipeline_mode = #tpu.pipeline_mode<synchronous>, transform_indices = @transform_19, window_bounds = array<i64: 32, 96>}, {pipeline_mode = #tpu.pipeline_mode<synchronous>, transform_indices = @transform_20, window_bounds = array<i64: 1, 96>}, {pipeline_mode = #tpu.pipeline_mode<synchronous>, transform_indices = @transform_21, window_bounds = array<i64: 32, 32>}, {pipeline_mode = #tpu.pipeline_mode<synchronous>, transform_indices = @transform_22, window_bounds = array<i64: 1, 32>}, {pipeline_mode = #tpu.pipeline_mode<synchronous>, transform_indices = @transform_23, window_bounds = array<i64: 1, 32>}, {pipeline_mode = #tpu.pipeline_mode<synchronous>, transform_indices = @transform_24, window_bounds = array<i64: 1, 32>}, {pipeline_mode = #tpu.pipeline_mode<synchronous>, transform_indices = @transform_25, window_bounds = array<i64: 32, 128>}, {pipeline_mode = #tpu.pipeline_mode<synchronous>, transform_indices = @transform_26, window_bounds = array<i64: 1, 128>}, {pipeline_mode = #tpu.pipeline_mode<synchronous>, transform_indices = @transform_27, window_bounds = array<i64: 128, 32>}, {pipeline_mode = #tpu.pipeline_mode<synchronous>, transform_indices = @transform_28, window_bounds = array<i64: 1, 32>}, {pipeline_mode = #tpu.pipeline_mode<synchronous>, transform_indices = @transform_29, window_bounds = array<i64: 32, 32>}, {pipeline_mode = #tpu.pipeline_mode<synchronous>, transform_indices = @transform_30, window_bounds = array<i64: 1, 32>}, {pipeline_mode = #tpu.pipeline_mode<synchronous>, transform_indices = @transform_31, window_bounds = array<i64: 32, 64>}, {pipeline_mode = #tpu.pipeline_mode<synchronous>, transform_indices = @transform_32, window_bounds = array<i64: 1, 64>}, {pipeline_mode = #tpu.pipeline_mode<synchronous>, transform_indices = @transform_33, window_bounds = array<i64: 32, 32>}, {pipeline_mode = #tpu.pipeline_mode<synchronous>, transform_indices = @transform_34, window_bounds = array<i64: 1, 32>}, {pipeline_mode = #tpu.pipeline_mode<synchronous>, transform_indices = @transform_35, window_bounds = array<i64: 32, 16>}, {pipeline_mode = #tpu.pipeline_mode<synchronous>, transform_indices = @transform_36, window_bounds = array<i64: 1, 16>}, {pipeline_mode = #tpu.pipeline_mode<synchronous>, transform_indices = @transform_37, window_bounds = array<i64: 16, 16>}, {pipeline_mode = #tpu.pipeline_mode<synchronous>, transform_indices = @transform_38, window_bounds = array<i64: 1, 16>}, {pipeline_mode = #tpu.pipeline_mode<synchronous>, transform_indices = @transform_39, window_bounds = array<i64: 16, 7>}, {pipeline_mode = #tpu.pipeline_mode<synchronous>, transform_indices = @transform_40, window_bounds = array<i64: 1, 7>}, {transform_indices = @transform_41, window_bounds = array<i64: 1, 8, 7>}]} {
    %c0 = arith.constant 0 : index
    %c0_0 = arith.constant 0 : index
    %0 = vector.load %arg6[%c0, %c0_0] : memref<1x32xf32, #tpu.memory_space<vmem>>, vector<1x32xf32>
    %c0_1 = arith.constant 0 : index
    %c0_2 = arith.constant 0 : index
    %c0_3 = arith.constant 0 : index
    %1 = vector.load %arg1[%c0_1, %c0_2, %c0_3] : memref<1x5x48xf32, #tpu.memory_space<vmem>>, vector<1x5x48xf32>
    %2 = vector.shape_cast %1 : vector<1x5x48xf32> to vector<5x48xf32>
    %c0_4 = arith.constant 0 : index
    %c0_5 = arith.constant 0 : index
    %3 = vector.load %arg8[%c0_4, %c0_5] : memref<48x32xf32, #tpu.memory_space<vmem>>, vector<48x32xf32>
    %cst = arith.constant dense<0.000000e+00> : vector<5x32xf32>
    %4 = tpu.matmul %2, %3, %cst {dimension_numbers = #tpu.dot_dimension_numbers<[1], [0], [0], [1], [0, 0, 1, 1], [], []>} : vector<5x48xf32>, vector<48x32xf32>, vector<5x32xf32> -> vector<5x32xf32>
    %c0_6 = arith.constant 0 : index
    %c0_7 = arith.constant 0 : index
    %5 = vector.load %arg9[%c0_6, %c0_7] : memref<1x32xf32, #tpu.memory_space<vmem>>, vector<1x32xf32>
    %6 = vector.broadcast %5 : vector<1x32xf32> to vector<5x32xf32>
    %7 = arith.addf %4, %6 : vector<5x32xf32>
    %8 = vector.broadcast %0 : vector<1x32xf32> to vector<5x32xf32>
    %9 = arith.addf %7, %8 : vector<5x32xf32>
    %c0_8 = arith.constant 0 : index
    %c0_9 = arith.constant 0 : index
    %c0_10 = arith.constant 0 : index
    %10 = vector.load %arg3[%c0_8, %c0_9, %c0_10] : memref<1x16x48xf32, #tpu.memory_space<vmem>>, vector<1x16x48xf32>
    %11 = vector.shape_cast %10 : vector<1x16x48xf32> to vector<16x48xf32>
    %c0_11 = arith.constant 0 : index
    %c0_12 = arith.constant 0 : index
    %12 = vector.load %arg12[%c0_11, %c0_12] : memref<48x32xf32, #tpu.memory_space<vmem>>, vector<48x32xf32>
    %cst_13 = arith.constant dense<0.000000e+00> : vector<16x32xf32>
    %13 = tpu.matmul %11, %12, %cst_13 {dimension_numbers = #tpu.dot_dimension_numbers<[1], [0], [0], [1], [0, 0, 1, 1], [], []>} : vector<16x48xf32>, vector<48x32xf32>, vector<16x32xf32> -> vector<16x32xf32>
    %c0_14 = arith.constant 0 : index
    %c0_15 = arith.constant 0 : index
    %14 = vector.load %arg13[%c0_14, %c0_15] : memref<1x32xf32, #tpu.memory_space<vmem>>, vector<1x32xf32>
    %15 = vector.broadcast %14 : vector<1x32xf32> to vector<16x32xf32>
    %16 = arith.addf %13, %15 : vector<16x32xf32>
    %17 = vector.broadcast %0 : vector<1x32xf32> to vector<16x32xf32>
    %18 = arith.addf %16, %17 : vector<16x32xf32>
    %c0_16 = arith.constant 0 : index
    %c0_17 = arith.constant 0 : index
    %c0_18 = arith.constant 0 : index
    %19 = vector.load %arg2[%c0_16, %c0_17, %c0_18] : memref<1x1x64xf32, #tpu.memory_space<vmem>>, vector<1x1x64xf32>
    %20 = vector.shape_cast %19 : vector<1x1x64xf32> to vector<1x64xf32>
    %c0_19 = arith.constant 0 : index
    %c0_20 = arith.constant 0 : index
    %21 = vector.load %arg10[%c0_19, %c0_20] : memref<64x32xf32, #tpu.memory_space<vmem>>, vector<64x32xf32>
    %cst_21 = arith.constant dense<0.000000e+00> : vector<1x32xf32>
    %22 = tpu.matmul %20, %21, %cst_21 {dimension_numbers = #tpu.dot_dimension_numbers<[1], [0], [0], [1], [0, 0, 1, 1], [], []>} : vector<1x64xf32>, vector<64x32xf32>, vector<1x32xf32> -> vector<1x32xf32>
    %c0_22 = arith.constant 0 : index
    %c0_23 = arith.constant 0 : index
    %23 = vector.load %arg11[%c0_22, %c0_23] : memref<1x32xf32, #tpu.memory_space<vmem>>, vector<1x32xf32>
    %24 = arith.addf %22, %23 : vector<1x32xf32>
    %25 = arith.addf %24, %0 : vector<1x32xf32>
    %c0_24 = arith.constant 0 : index
    %c0_25 = arith.constant 0 : index
    %c0_26 = arith.constant 0 : index
    %26 = vector.load %arg4[%c0_24, %c0_25, %c0_26] : memref<1x3x7xf32, #tpu.memory_space<vmem>>, vector<1x3x7xf32>
    %27 = vector.shape_cast %26 : vector<1x3x7xf32> to vector<3x7xf32>
    %c0_27 = arith.constant 0 : index
    %c0_28 = arith.constant 0 : index
    %28 = vector.load %arg14[%c0_27, %c0_28] : memref<7x32xf32, #tpu.memory_space<vmem>>, vector<7x32xf32>
    %cst_29 = arith.constant dense<0.000000e+00> : vector<3x32xf32>
    %29 = tpu.matmul %27, %28, %cst_29 {dimension_numbers = #tpu.dot_dimension_numbers<[1], [0], [0], [1], [0, 0, 1, 1], [], []>} : vector<3x7xf32>, vector<7x32xf32>, vector<3x32xf32> -> vector<3x32xf32>
    %c0_30 = arith.constant 0 : index
    %c0_31 = arith.constant 0 : index
    %30 = vector.load %arg15[%c0_30, %c0_31] : memref<1x32xf32, #tpu.memory_space<vmem>>, vector<1x32xf32>
    %31 = vector.broadcast %30 : vector<1x32xf32> to vector<3x32xf32>
    %32 = arith.addf %29, %31 : vector<3x32xf32>
    %33 = vector.broadcast %0 : vector<1x32xf32> to vector<3x32xf32>
    %34 = arith.addf %32, %33 : vector<3x32xf32>
    %c0_32 = arith.constant 0 : index
    %c0_33 = arith.constant 0 : index
    %35 = vector.load %arg43[%c0_32, %c0_33] : memref<33x32xf32, #tpu.memory_space<vmem>>, vector<5x32xf32>
    tpu.vector_store %arg43[%c0_32, %c0_33], %9 {strides = array<i32>} : memref<33x32xf32, #tpu.memory_space<vmem>>, vector<5x32xf32>,
    %c5 = arith.constant 5 : index
    %c0_34 = arith.constant 0 : index
    %36 = vector.load %arg43[%c5, %c0_34] : memref<33x32xf32, #tpu.memory_space<vmem>>, vector<16x32xf32>
    tpu.vector_store %arg43[%c5, %c0_34], %18 {strides = array<i32>} : memref<33x32xf32, #tpu.memory_space<vmem>>, vector<16x32xf32>,
    %c21 = arith.constant 21 : index
    %c0_35 = arith.constant 0 : index
    %37 = vector.load %arg43[%c21, %c0_35] : memref<33x32xf32, #tpu.memory_space<vmem>>, vector<1x32xf32>
    tpu.vector_store %arg43[%c21, %c0_35], %25 {strides = array<i32>} : memref<33x32xf32, #tpu.memory_space<vmem>>, vector<1x32xf32>,
    %c22 = arith.constant 22 : index
    %c0_36 = arith.constant 0 : index
    %38 = vector.load %arg43[%c22, %c0_36] : memref<33x32xf32, #tpu.memory_space<vmem>>, vector<3x32xf32>
    tpu.vector_store %arg43[%c22, %c0_36], %34 {strides = array<i32>} : memref<33x32xf32, #tpu.memory_space<vmem>>, vector<3x32xf32>,
    %c0_37 = arith.constant 0 : index
    %c0_38 = arith.constant 0 : index
    %39 = vector.load %arg7[%c0_37, %c0_38] : memref<8x32xf32, #tpu.memory_space<vmem>>, vector<8x32xf32>
    %c25 = arith.constant 25 : index
    %c0_39 = arith.constant 0 : index
    %40 = vector.load %arg43[%c25, %c0_39] : memref<33x32xf32, #tpu.memory_space<vmem>>, vector<8x32xf32>
    tpu.vector_store %arg43[%c25, %c0_39], %39 {strides = array<i32>} : memref<33x32xf32, #tpu.memory_space<vmem>>, vector<8x32xf32>,
    %c0_40 = arith.constant 0 : index
    %c0_41 = arith.constant 0 : index
    %41 = vector.load %arg43[%c0_40, %c0_41] : memref<33x32xf32, #tpu.memory_space<vmem>>, vector<33x32xf32>
    %c0_42 = arith.constant 0 : index
    %c0_43 = arith.constant 0 : index
    %42 = vector.load %arg16[%c0_42, %c0_43] : memref<1x32xf32, #tpu.memory_space<vmem>>, vector<1x32xf32>
    %c0_44 = arith.constant 0 : index
    %c0_45 = arith.constant 0 : index
    %43 = vector.load %arg17[%c0_44, %c0_45] : memref<1x32xf32, #tpu.memory_space<vmem>>, vector<1x32xf32>
    %cst_46 = arith.constant dense<0.000000e+00> : vector<33xf32>
    %44 = vector.multi_reduction <add>, %41, %cst_46 [1] : vector<33x32xf32> to vector<33xf32>
    %45 = vector.shape_cast %44 : vector<33xf32> to vector<33x1xf32>
    %cst_47 = arith.constant 3.200000e+01 : f32
    %46 = vector.broadcast %cst_47 : f32 to vector<33x1xf32>
    %47 = arith.divf %45, %46 : vector<33x1xf32>
    %48 = vector.broadcast %47 : vector<33x1xf32> to vector<33x32xf32>
    %49 = arith.subf %41, %48 : vector<33x32xf32>
    %50 = arith.mulf %49, %49 : vector<33x32xf32>
    %cst_48 = arith.constant dense<0.000000e+00> : vector<33xf32>
    %51 = vector.multi_reduction <add>, %50, %cst_48 [1] : vector<33x32xf32> to vector<33xf32>
    %52 = vector.shape_cast %51 : vector<33xf32> to vector<33x1xf32>
    %cst_49 = arith.constant 3.200000e+01 : f32
    %53 = vector.broadcast %cst_49 : f32 to vector<33x1xf32>
    %54 = arith.divf %52, %53 : vector<33x1xf32>
    %55 = vector.broadcast %47 : vector<33x1xf32> to vector<33x32xf32>
    %56 = arith.subf %41, %55 : vector<33x32xf32>
    %cst_50 = arith.constant 9.99999974E-6 : f32
    %57 = vector.broadcast %cst_50 : f32 to vector<33x1xf32>
    %58 = arith.addf %54, %57 : vector<33x1xf32>
    %59 = math.rsqrt %58 : vector<33x1xf32>
    %60 = vector.broadcast %59 : vector<33x1xf32> to vector<33x32xf32>
    %61 = arith.mulf %56, %60 : vector<33x32xf32>
    %62 = vector.broadcast %42 : vector<1x32xf32> to vector<33x32xf32>
    %63 = arith.mulf %61, %62 : vector<33x32xf32>
    %64 = vector.broadcast %43 : vector<1x32xf32> to vector<33x32xf32>
    %65 = arith.addf %63, %64 : vector<33x32xf32>
    %66 = tpu.iota {dimensions = array<i32: 0>} : vector<33x33xi32>
    %67 = tpu.iota {dimensions = array<i32: 1>} : vector<33x33xi32>
    %68 = arith.cmpi sge, %66, %67 : vector<33x33xi32>
    %69 = arith.extui %68 : vector<33x33xi1> to vector<33x33xi32>
    %70 = arith.sitofp %69 : vector<33x33xi32> to vector<33x33xf32>
    %c0_51 = arith.constant 0 : index
    %c0_52 = arith.constant 0 : index
    %c0_53 = arith.constant 0 : index
    %71 = vector.load %arg5[%c0_51, %c0_52, %c0_53] : memref<1x33x1xf32, #tpu.memory_space<vmem>>, vector<1x33x1xf32>
    %72 = vector.shape_cast %71 : vector<1x33x1xf32> to vector<33x1xf32>
    %73 = vector.broadcast %72 : vector<33x1xf32> to vector<33x33xf32>
    %74 = arith.mulf %73, %70 : vector<33x33xf32>
    %cst_54 = arith.constant 0.000000e+00 : f32
    %75 = vector.broadcast %cst_54 : f32 to vector<33x33xf32>
    %76 = arith.cmpf ogt, %74, %75 : vector<33x33xf32>
    %cst_55 = arith.constant 0.000000e+00 : f32
    %cst_56 = arith.constant -1.000000e+09 : f32
    %77 = vector.broadcast %cst_55 : f32 to vector<33x33xf32>
    %78 = vector.broadcast %cst_56 : f32 to vector<33x33xf32>
    %79 = arith.select %76, %77, %78 : vector<33x33xi1>, vector<33x33xf32>
    %c0_57 = arith.constant 0 : index
    %c0_58 = arith.constant 0 : index
    %80 = vector.load %arg18[%c0_57, %c0_58] : memref<1x32xf32, #tpu.memory_space<vmem>>, vector<1x32xf32>
    %c0_59 = arith.constant 0 : index
    %c0_60 = arith.constant 0 : index
    %81 = vector.load %arg19[%c0_59, %c0_60] : memref<1x32xf32, #tpu.memory_space<vmem>>, vector<1x32xf32>
    %cst_61 = arith.constant dense<0.000000e+00> : vector<33xf32>
    %82 = vector.multi_reduction <add>, %65, %cst_61 [1] : vector<33x32xf32> to vector<33xf32>
    %83 = vector.shape_cast %82 : vector<33xf32> to vector<33x1xf32>
    %cst_62 = arith.constant 3.200000e+01 : f32
    %84 = vector.broadcast %cst_62 : f32 to vector<33x1xf32>
    %85 = arith.divf %83, %84 : vector<33x1xf32>
    %86 = vector.broadcast %85 : vector<33x1xf32> to vector<33x32xf32>
    %87 = arith.subf %65, %86 : vector<33x32xf32>
    %88 = arith.mulf %87, %87 : vector<33x32xf32>
    %cst_63 = arith.constant dense<0.000000e+00> : vector<33xf32>
    %89 = vector.multi_reduction <add>, %88, %cst_63 [1] : vector<33x32xf32> to vector<33xf32>
    %90 = vector.shape_cast %89 : vector<33xf32> to vector<33x1xf32>
    %cst_64 = arith.constant 3.200000e+01 : f32
    %91 = vector.broadcast %cst_64 : f32 to vector<33x1xf32>
    %92 = arith.divf %90, %91 : vector<33x1xf32>
    %93 = vector.broadcast %85 : vector<33x1xf32> to vector<33x32xf32>
    %94 = arith.subf %65, %93 : vector<33x32xf32>
    %cst_65 = arith.constant 9.99999974E-6 : f32
    %95 = vector.broadcast %cst_65 : f32 to vector<33x1xf32>
    %96 = arith.addf %92, %95 : vector<33x1xf32>
    %97 = math.rsqrt %96 : vector<33x1xf32>
    %98 = vector.broadcast %97 : vector<33x1xf32> to vector<33x32xf32>
    %99 = arith.mulf %94, %98 : vector<33x32xf32>
    %100 = vector.broadcast %80 : vector<1x32xf32> to vector<33x32xf32>
    %101 = arith.mulf %99, %100 : vector<33x32xf32>
    %102 = vector.broadcast %81 : vector<1x32xf32> to vector<33x32xf32>
    %103 = arith.addf %101, %102 : vector<33x32xf32>
    %c0_66 = arith.constant 0 : index
    %c0_67 = arith.constant 0 : index
    %104 = vector.load %arg20[%c0_66, %c0_67] : memref<32x96xf32, #tpu.memory_space<vmem>>, vector<32x96xf32>
    %cst_68 = arith.constant dense<0.000000e+00> : vector<33x96xf32>
    %105 = tpu.matmul %103, %104, %cst_68 {dimension_numbers = #tpu.dot_dimension_numbers<[1], [0], [0], [1], [0, 0, 1, 1], [], []>} : vector<33x32xf32>, vector<32x96xf32>, vector<33x96xf32> -> vector<33x96xf32>
    %c0_69 = arith.constant 0 : index
    %c0_70 = arith.constant 0 : index
    %106 = vector.load %arg21[%c0_69, %c0_70] : memref<1x96xf32, #tpu.memory_space<vmem>>, vector<1x96xf32>
    %107 = vector.broadcast %106 : vector<1x96xf32> to vector<33x96xf32>
    %108 = arith.addf %105, %107 : vector<33x96xf32>
    %109 = vector.extract_strided_slice %108 {offsets = [0, 0], sizes = [33, 32], strides = [1, 1]} : vector<33x96xf32> to vector<33x32xf32>
    %110 = vector.extract_strided_slice %108 {offsets = [0, 32], sizes = [33, 32], strides = [1, 1]} : vector<33x96xf32> to vector<33x32xf32>
    %111 = vector.extract_strided_slice %108 {offsets = [0, 64], sizes = [33, 32], strides = [1, 1]} : vector<33x96xf32> to vector<33x32xf32>
    %112 = vector.extract_strided_slice %109 {offsets = [0, 0], sizes = [33, 4], strides = [1, 1]} : vector<33x32xf32> to vector<33x4xf32>
    %113 = vector.shape_cast %112 : vector<33x4xf32> to vector<1x33x4xf32>
    %114 = vector.extract_strided_slice %109 {offsets = [0, 4], sizes = [33, 4], strides = [1, 1]} : vector<33x32xf32> to vector<33x4xf32>
    %115 = vector.shape_cast %114 : vector<33x4xf32> to vector<1x33x4xf32>
    %116 = vector.extract_strided_slice %109 {offsets = [0, 8], sizes = [33, 4], strides = [1, 1]} : vector<33x32xf32> to vector<33x4xf32>
    %117 = vector.shape_cast %116 : vector<33x4xf32> to vector<1x33x4xf32>
    %118 = vector.extract_strided_slice %109 {offsets = [0, 12], sizes = [33, 4], strides = [1, 1]} : vector<33x32xf32> to vector<33x4xf32>
    %119 = vector.shape_cast %118 : vector<33x4xf32> to vector<1x33x4xf32>
    %120 = vector.extract_strided_slice %109 {offsets = [0, 16], sizes = [33, 4], strides = [1, 1]} : vector<33x32xf32> to vector<33x4xf32>
    %121 = vector.shape_cast %120 : vector<33x4xf32> to vector<1x33x4xf32>
    %122 = vector.extract_strided_slice %109 {offsets = [0, 20], sizes = [33, 4], strides = [1, 1]} : vector<33x32xf32> to vector<33x4xf32>
    %123 = vector.shape_cast %122 : vector<33x4xf32> to vector<1x33x4xf32>
    %124 = vector.extract_strided_slice %109 {offsets = [0, 24], sizes = [33, 4], strides = [1, 1]} : vector<33x32xf32> to vector<33x4xf32>
    %125 = vector.shape_cast %124 : vector<33x4xf32> to vector<1x33x4xf32>
    %126 = vector.extract_strided_slice %109 {offsets = [0, 28], sizes = [33, 4], strides = [1, 1]} : vector<33x32xf32> to vector<33x4xf32>
    %127 = vector.shape_cast %126 : vector<33x4xf32> to vector<1x33x4xf32>
    %128 = tpu.concatenate %113, %115, %117, %119, %121, %123, %125, %127 in 0 : vector<1x33x4xf32>, vector<1x33x4xf32>, vector<1x33x4xf32>, vector<1x33x4xf32>, vector<1x33x4xf32>, vector<1x33x4xf32>, vector<1x33x4xf32>, vector<1x33x4xf32> -> vector<8x33x4xf32>
    %129 = vector.extract_strided_slice %110 {offsets = [0, 0], sizes = [33, 4], strides = [1, 1]} : vector<33x32xf32> to vector<33x4xf32>
    %130 = vector.shape_cast %129 : vector<33x4xf32> to vector<1x33x4xf32>
    %131 = vector.extract_strided_slice %110 {offsets = [0, 4], sizes = [33, 4], strides = [1, 1]} : vector<33x32xf32> to vector<33x4xf32>
    %132 = vector.shape_cast %131 : vector<33x4xf32> to vector<1x33x4xf32>
    %133 = vector.extract_strided_slice %110 {offsets = [0, 8], sizes = [33, 4], strides = [1, 1]} : vector<33x32xf32> to vector<33x4xf32>
    %134 = vector.shape_cast %133 : vector<33x4xf32> to vector<1x33x4xf32>
    %135 = vector.extract_strided_slice %110 {offsets = [0, 12], sizes = [33, 4], strides = [1, 1]} : vector<33x32xf32> to vector<33x4xf32>
    %136 = vector.shape_cast %135 : vector<33x4xf32> to vector<1x33x4xf32>
    %137 = vector.extract_strided_slice %110 {offsets = [0, 16], sizes = [33, 4], strides = [1, 1]} : vector<33x32xf32> to vector<33x4xf32>
    %138 = vector.shape_cast %137 : vector<33x4xf32> to vector<1x33x4xf32>
    %139 = vector.extract_strided_slice %110 {offsets = [0, 20], sizes = [33, 4], strides = [1, 1]} : vector<33x32xf32> to vector<33x4xf32>
    %140 = vector.shape_cast %139 : vector<33x4xf32> to vector<1x33x4xf32>
    %141 = vector.extract_strided_slice %110 {offsets = [0, 24], sizes = [33, 4], strides = [1, 1]} : vector<33x32xf32> to vector<33x4xf32>
    %142 = vector.shape_cast %141 : vector<33x4xf32> to vector<1x33x4xf32>
    %143 = vector.extract_strided_slice %110 {offsets = [0, 28], sizes = [33, 4], strides = [1, 1]} : vector<33x32xf32> to vector<33x4xf32>
    %144 = vector.shape_cast %143 : vector<33x4xf32> to vector<1x33x4xf32>
    %145 = tpu.concatenate %130, %132, %134, %136, %138, %140, %142, %144 in 0 : vector<1x33x4xf32>, vector<1x33x4xf32>, vector<1x33x4xf32>, vector<1x33x4xf32>, vector<1x33x4xf32>, vector<1x33x4xf32>, vector<1x33x4xf32>, vector<1x33x4xf32> -> vector<8x33x4xf32>
    %146 = vector.extract_strided_slice %111 {offsets = [0, 0], sizes = [33, 4], strides = [1, 1]} : vector<33x32xf32> to vector<33x4xf32>
    %147 = vector.shape_cast %146 : vector<33x4xf32> to vector<1x33x4xf32>
    %148 = vector.extract_strided_slice %111 {offsets = [0, 4], sizes = [33, 4], strides = [1, 1]} : vector<33x32xf32> to vector<33x4xf32>
    %149 = vector.shape_cast %148 : vector<33x4xf32> to vector<1x33x4xf32>
    %150 = vector.extract_strided_slice %111 {offsets = [0, 8], sizes = [33, 4], strides = [1, 1]} : vector<33x32xf32> to vector<33x4xf32>
    %151 = vector.shape_cast %150 : vector<33x4xf32> to vector<1x33x4xf32>
    %152 = vector.extract_strided_slice %111 {offsets = [0, 12], sizes = [33, 4], strides = [1, 1]} : vector<33x32xf32> to vector<33x4xf32>
    %153 = vector.shape_cast %152 : vector<33x4xf32> to vector<1x33x4xf32>
    %154 = vector.extract_strided_slice %111 {offsets = [0, 16], sizes = [33, 4], strides = [1, 1]} : vector<33x32xf32> to vector<33x4xf32>
    %155 = vector.shape_cast %154 : vector<33x4xf32> to vector<1x33x4xf32>
    %156 = vector.extract_strided_slice %111 {offsets = [0, 20], sizes = [33, 4], strides = [1, 1]} : vector<33x32xf32> to vector<33x4xf32>
    %157 = vector.shape_cast %156 : vector<33x4xf32> to vector<1x33x4xf32>
    %158 = vector.extract_strided_slice %111 {offsets = [0, 24], sizes = [33, 4], strides = [1, 1]} : vector<33x32xf32> to vector<33x4xf32>
    %159 = vector.shape_cast %158 : vector<33x4xf32> to vector<1x33x4xf32>
    %160 = vector.extract_strided_slice %111 {offsets = [0, 28], sizes = [33, 4], strides = [1, 1]} : vector<33x32xf32> to vector<33x4xf32>
    %161 = vector.shape_cast %160 : vector<33x4xf32> to vector<1x33x4xf32>
    %162 = tpu.concatenate %147, %149, %151, %153, %155, %157, %159, %161 in 0 : vector<1x33x4xf32>, vector<1x33x4xf32>, vector<1x33x4xf32>, vector<1x33x4xf32>, vector<1x33x4xf32>, vector<1x33x4xf32>, vector<1x33x4xf32>, vector<1x33x4xf32> -> vector<8x33x4xf32>
    "tpu.trace_start"() <{level = 10 : i32, message = "hqd,hkd->hqk"}> : () -> ()
    %cst_71 = arith.constant dense<0.000000e+00> : vector<8x33x33xf32>
    %163 = tpu.matmul %128, %145, %cst_71 {dimension_numbers = #tpu.dot_dimension_numbers<[2], [2], [1], [1], [0, 0, 0, 1, 1, 1], [0], [0]>} : vector<8x33x4xf32>, vector<8x33x4xf32>, vector<8x33x33xf32> -> vector<8x33x33xf32>
    "tpu.trace_stop"() : () -> ()
    %cst_72 = arith.constant 5.000000e-01 : f32
    %164 = vector.broadcast %cst_72 : f32 to vector<8x33x33xf32>
    %165 = arith.mulf %163, %164 : vector<8x33x33xf32>
    %166 = vector.shape_cast %79 : vector<33x33xf32> to vector<1x33x33xf32>
    %167 = vector.broadcast %166 : vector<1x33x33xf32> to vector<8x33x33xf32>
    %168 = arith.addf %165, %167 : vector<8x33x33xf32>
    %cst_73 = arith.constant dense<0xFF800000> : vector<8x33xf32>
    %169 = vector.multi_reduction <maximumf>, %168, %cst_73 [2] : vector<8x33x33xf32> to vector<8x33xf32>
    %170 = vector.shape_cast %169 : vector<8x33xf32> to vector<8x33x1xf32>
    %171 = vector.broadcast %170 : vector<8x33x1xf32> to vector<8x33x33xf32>
    %172 = arith.subf %168, %171 : vector<8x33x33xf32>
    %173 = math.exp %172 : vector<8x33x33xf32>
    %cst_74 = arith.constant dense<0.000000e+00> : vector<8x33xf32>
    %174 = vector.multi_reduction <add>, %173, %cst_74 [2] : vector<8x33x33xf32> to vector<8x33xf32>
    %175 = vector.shape_cast %174 : vector<8x33xf32> to vector<8x33x1xf32>
    %176 = tpu.reciprocal %175 {approx = true} : vector<8x33x1xf32> -> vector<8x33x1xf32>
    %177 = vector.broadcast %176 : vector<8x33x1xf32> to vector<8x33x33xf32>
    %178 = arith.mulf %173, %177 : vector<8x33x33xf32>
    "tpu.trace_start"() <{level = 10 : i32, message = "hqk,hkd->hqd"}> : () -> ()
    %cst_75 = arith.constant dense<0.000000e+00> : vector<8x33x4xf32>
    %179 = tpu.matmul %178, %162, %cst_75 {dimension_numbers = #tpu.dot_dimension_numbers<[2], [1], [1], [2], [0, 0, 0, 1, 1, 2], [0], [0]>} : vector<8x33x33xf32>, vector<8x33x4xf32>, vector<8x33x4xf32> -> vector<8x33x4xf32>
    "tpu.trace_stop"() : () -> ()
    %180 = vector.extract_strided_slice %179 {offsets = [0, 0, 0], sizes = [1, 33, 4], strides = [1, 1, 1]} : vector<8x33x4xf32> to vector<1x33x4xf32>
    %181 = vector.shape_cast %180 : vector<1x33x4xf32> to vector<33x4xf32>
    %182 = vector.extract_strided_slice %179 {offsets = [1, 0, 0], sizes = [1, 33, 4], strides = [1, 1, 1]} : vector<8x33x4xf32> to vector<1x33x4xf32>
    %183 = vector.shape_cast %182 : vector<1x33x4xf32> to vector<33x4xf32>
    %184 = vector.extract_strided_slice %179 {offsets = [2, 0, 0], sizes = [1, 33, 4], strides = [1, 1, 1]} : vector<8x33x4xf32> to vector<1x33x4xf32>
    %185 = vector.shape_cast %184 : vector<1x33x4xf32> to vector<33x4xf32>
    %186 = vector.extract_strided_slice %179 {offsets = [3, 0, 0], sizes = [1, 33, 4], strides = [1, 1, 1]} : vector<8x33x4xf32> to vector<1x33x4xf32>
    %187 = vector.shape_cast %186 : vector<1x33x4xf32> to vector<33x4xf32>
    %188 = vector.extract_strided_slice %179 {offsets = [4, 0, 0], sizes = [1, 33, 4], strides = [1, 1, 1]} : vector<8x33x4xf32> to vector<1x33x4xf32>
    %189 = vector.shape_cast %188 : vector<1x33x4xf32> to vector<33x4xf32>
    %190 = vector.extract_strided_slice %179 {offsets = [5, 0, 0], sizes = [1, 33, 4], strides = [1, 1, 1]} : vector<8x33x4xf32> to vector<1x33x4xf32>
    %191 = vector.shape_cast %190 : vector<1x33x4xf32> to vector<33x4xf32>
    %192 = vector.extract_strided_slice %179 {offsets = [6, 0, 0], sizes = [1, 33, 4], strides = [1, 1, 1]} : vector<8x33x4xf32> to vector<1x33x4xf32>
    %193 = vector.shape_cast %192 : vector<1x33x4xf32> to vector<33x4xf32>
    %194 = vector.extract_strided_slice %179 {offsets = [7, 0, 0], sizes = [1, 33, 4], strides = [1, 1, 1]} : vector<8x33x4xf32> to vector<1x33x4xf32>
    %195 = vector.shape_cast %194 : vector<1x33x4xf32> to vector<33x4xf32>
    %196 = tpu.concatenate %181, %183, %185, %187, %189, %191, %193, %195 in 1 : vector<33x4xf32>, vector<33x4xf32>, vector<33x4xf32>, vector<33x4xf32>, vector<33x4xf32>, vector<33x4xf32>, vector<33x4xf32>, vector<33x4xf32> -> vector<33x32xf32>
    %c0_76 = arith.constant 0 : index
    %c0_77 = arith.constant 0 : index
    %197 = vector.load %arg22[%c0_76, %c0_77] : memref<32x32xf32, #tpu.memory_space<vmem>>, vector<32x32xf32>
    %cst_78 = arith.constant dense<0.000000e+00> : vector<33x32xf32>
    %198 = tpu.matmul %196, %197, %cst_78 {dimension_numbers = #tpu.dot_dimension_numbers<[1], [0], [0], [1], [0, 0, 1, 1], [], []>} : vector<33x32xf32>, vector<32x32xf32>, vector<33x32xf32> -> vector<33x32xf32>
    %c0_79 = arith.constant 0 : index
    %c0_80 = arith.constant 0 : index
    %199 = vector.load %arg23[%c0_79, %c0_80] : memref<1x32xf32, #tpu.memory_space<vmem>>, vector<1x32xf32>
    %200 = vector.broadcast %199 : vector<1x32xf32> to vector<33x32xf32>
    %201 = arith.addf %198, %200 : vector<33x32xf32>
    %202 = arith.addf %65, %201 : vector<33x32xf32>
    %c0_81 = arith.constant 0 : index
    %c0_82 = arith.constant 0 : index
    %203 = vector.load %arg24[%c0_81, %c0_82] : memref<1x32xf32, #tpu.memory_space<vmem>>, vector<1x32xf32>
    %c0_83 = arith.constant 0 : index
    %c0_84 = arith.constant 0 : index
    %204 = vector.load %arg25[%c0_83, %c0_84] : memref<1x32xf32, #tpu.memory_space<vmem>>, vector<1x32xf32>
    %cst_85 = arith.constant dense<0.000000e+00> : vector<33xf32>
    %205 = vector.multi_reduction <add>, %202, %cst_85 [1] : vector<33x32xf32> to vector<33xf32>
    %206 = vector.shape_cast %205 : vector<33xf32> to vector<33x1xf32>
    %cst_86 = arith.constant 3.200000e+01 : f32
    %207 = vector.broadcast %cst_86 : f32 to vector<33x1xf32>
    %208 = arith.divf %206, %207 : vector<33x1xf32>
    %209 = vector.broadcast %208 : vector<33x1xf32> to vector<33x32xf32>
    %210 = arith.subf %202, %209 : vector<33x32xf32>
    %211 = arith.mulf %210, %210 : vector<33x32xf32>
    %cst_87 = arith.constant dense<0.000000e+00> : vector<33xf32>
    %212 = vector.multi_reduction <add>, %211, %cst_87 [1] : vector<33x32xf32> to vector<33xf32>
    %213 = vector.shape_cast %212 : vector<33xf32> to vector<33x1xf32>
    %cst_88 = arith.constant 3.200000e+01 : f32
    %214 = vector.broadcast %cst_88 : f32 to vector<33x1xf32>
    %215 = arith.divf %213, %214 : vector<33x1xf32>
    %216 = vector.broadcast %208 : vector<33x1xf32> to vector<33x32xf32>
    %217 = arith.subf %202, %216 : vector<33x32xf32>
    %cst_89 = arith.constant 9.99999974E-6 : f32
    %218 = vector.broadcast %cst_89 : f32 to vector<33x1xf32>
    %219 = arith.addf %215, %218 : vector<33x1xf32>
    %220 = math.rsqrt %219 : vector<33x1xf32>
    %221 = vector.broadcast %220 : vector<33x1xf32> to vector<33x32xf32>
    %222 = arith.mulf %217, %221 : vector<33x32xf32>
    %223 = vector.broadcast %203 : vector<1x32xf32> to vector<33x32xf32>
    %224 = arith.mulf %222, %223 : vector<33x32xf32>
    %225 = vector.broadcast %204 : vector<1x32xf32> to vector<33x32xf32>
    %226 = arith.addf %224, %225 : vector<33x32xf32>
    %c0_90 = arith.constant 0 : index
    %c0_91 = arith.constant 0 : index
    %227 = vector.load %arg26[%c0_90, %c0_91] : memref<32x128xf32, #tpu.memory_space<vmem>>, vector<32x128xf32>
    %cst_92 = arith.constant dense<0.000000e+00> : vector<33x128xf32>
    %228 = tpu.matmul %226, %227, %cst_92 {dimension_numbers = #tpu.dot_dimension_numbers<[1], [0], [0], [1], [0, 0, 1, 1], [], []>} : vector<33x32xf32>, vector<32x128xf32>, vector<33x128xf32> -> vector<33x128xf32>
    %c0_93 = arith.constant 0 : index
    %c0_94 = arith.constant 0 : index
    %229 = vector.load %arg27[%c0_93, %c0_94] : memref<1x128xf32, #tpu.memory_space<vmem>>, vector<1x128xf32>
    %230 = vector.broadcast %229 : vector<1x128xf32> to vector<33x128xf32>
    %231 = arith.addf %228, %230 : vector<33x128xf32>
    %232 = arith.mulf %231, %231 : vector<33x128xf32>
    %233 = arith.mulf %231, %232 : vector<33x128xf32>
    %cst_95 = arith.constant 4.471500e-02 : f32
    %234 = vector.broadcast %cst_95 : f32 to vector<33x128xf32>
    %235 = arith.mulf %234, %233 : vector<33x128xf32>
    %236 = arith.addf %231, %235 : vector<33x128xf32>
    %cst_96 = arith.constant 0.797884583 : f32
    %237 = vector.broadcast %cst_96 : f32 to vector<33x128xf32>
    %238 = arith.mulf %237, %236 : vector<33x128xf32>
    %239 = math.tanh %238 : vector<33x128xf32>
    %cst_97 = arith.constant 1.000000e+00 : f32
    %240 = vector.broadcast %cst_97 : f32 to vector<33x128xf32>
    %241 = arith.addf %240, %239 : vector<33x128xf32>
    %cst_98 = arith.constant 5.000000e-01 : f32
    %242 = vector.broadcast %cst_98 : f32 to vector<33x128xf32>
    %243 = arith.mulf %242, %241 : vector<33x128xf32>
    %244 = arith.mulf %231, %243 : vector<33x128xf32>
    %c0_99 = arith.constant 0 : index
    %c0_100 = arith.constant 0 : index
    %245 = vector.load %arg28[%c0_99, %c0_100] : memref<128x32xf32, #tpu.memory_space<vmem>>, vector<128x32xf32>
    %cst_101 = arith.constant dense<0.000000e+00> : vector<33x32xf32>
    %246 = tpu.matmul %244, %245, %cst_101 {dimension_numbers = #tpu.dot_dimension_numbers<[1], [0], [0], [1], [0, 0, 1, 1], [], []>} : vector<33x128xf32>, vector<128x32xf32>, vector<33x32xf32> -> vector<33x32xf32>
    %c0_102 = arith.constant 0 : index
    %c0_103 = arith.constant 0 : index
    %247 = vector.load %arg29[%c0_102, %c0_103] : memref<1x32xf32, #tpu.memory_space<vmem>>, vector<1x32xf32>
    %248 = vector.broadcast %247 : vector<1x32xf32> to vector<33x32xf32>
    %249 = arith.addf %246, %248 : vector<33x32xf32>
    %250 = arith.addf %202, %249 : vector<33x32xf32>
    %251 = vector.extract_strided_slice %250 {offsets = [25, 0], sizes = [8, 32], strides = [1, 1]} : vector<33x32xf32> to vector<8x32xf32>
    %c0_104 = arith.constant 0 : index
    %c0_105 = arith.constant 0 : index
    %252 = vector.load %arg30[%c0_104, %c0_105] : memref<32x32xf32, #tpu.memory_space<vmem>>, vector<32x32xf32>
    %cst_106 = arith.constant dense<0.000000e+00> : vector<8x32xf32>
    %253 = tpu.matmul %251, %252, %cst_106 {dimension_numbers = #tpu.dot_dimension_numbers<[1], [0], [0], [1], [0, 0, 1, 1], [], []>} : vector<8x32xf32>, vector<32x32xf32>, vector<8x32xf32> -> vector<8x32xf32>
    %c0_107 = arith.constant 0 : index
    %c0_108 = arith.constant 0 : index
    %254 = vector.load %arg31[%c0_107, %c0_108] : memref<1x32xf32, #tpu.memory_space<vmem>>, vector<1x32xf32>
    %255 = vector.broadcast %254 : vector<1x32xf32> to vector<8x32xf32>
    %256 = arith.addf %253, %255 : vector<8x32xf32>
    %c0_109 = arith.constant 0 : index
    %c0_110 = arith.constant 0 : index
    %257 = vector.load %arg32[%c0_109, %c0_110] : memref<32x64xf32, #tpu.memory_space<vmem>>, vector<32x64xf32>
    %cst_111 = arith.constant dense<0.000000e+00> : vector<16x64xf32>
    %258 = tpu.matmul %18, %257, %cst_111 {dimension_numbers = #tpu.dot_dimension_numbers<[1], [0], [0], [1], [0, 0, 1, 1], [], []>} : vector<16x32xf32>, vector<32x64xf32>, vector<16x64xf32> -> vector<16x64xf32>
    %c0_112 = arith.constant 0 : index
    %c0_113 = arith.constant 0 : index
    %259 = vector.load %arg33[%c0_112, %c0_113] : memref<1x64xf32, #tpu.memory_space<vmem>>, vector<1x64xf32>
    %260 = vector.broadcast %259 : vector<1x64xf32> to vector<16x64xf32>
    %261 = arith.addf %258, %260 : vector<16x64xf32>
    %262 = vector.extract_strided_slice %261 {offsets = [0, 0], sizes = [16, 32], strides = [1, 1]} : vector<16x64xf32> to vector<16x32xf32>
    %263 = vector.extract_strided_slice %261 {offsets = [0, 32], sizes = [16, 32], strides = [1, 1]} : vector<16x64xf32> to vector<16x32xf32>
    %264 = vector.extract_strided_slice %256 {offsets = [0, 0], sizes = [8, 4], strides = [1, 1]} : vector<8x32xf32> to vector<8x4xf32>
    %265 = vector.shape_cast %264 : vector<8x4xf32> to vector<1x8x4xf32>
    %266 = vector.extract_strided_slice %256 {offsets = [0, 4], sizes = [8, 4], strides = [1, 1]} : vector<8x32xf32> to vector<8x4xf32>
    %267 = vector.shape_cast %266 : vector<8x4xf32> to vector<1x8x4xf32>
    %268 = vector.extract_strided_slice %256 {offsets = [0, 8], sizes = [8, 4], strides = [1, 1]} : vector<8x32xf32> to vector<8x4xf32>
    %269 = vector.shape_cast %268 : vector<8x4xf32> to vector<1x8x4xf32>
    %270 = vector.extract_strided_slice %256 {offsets = [0, 12], sizes = [8, 4], strides = [1, 1]} : vector<8x32xf32> to vector<8x4xf32>
    %271 = vector.shape_cast %270 : vector<8x4xf32> to vector<1x8x4xf32>
    %272 = vector.extract_strided_slice %256 {offsets = [0, 16], sizes = [8, 4], strides = [1, 1]} : vector<8x32xf32> to vector<8x4xf32>
    %273 = vector.shape_cast %272 : vector<8x4xf32> to vector<1x8x4xf32>
    %274 = vector.extract_strided_slice %256 {offsets = [0, 20], sizes = [8, 4], strides = [1, 1]} : vector<8x32xf32> to vector<8x4xf32>
    %275 = vector.shape_cast %274 : vector<8x4xf32> to vector<1x8x4xf32>
    %276 = vector.extract_strided_slice %256 {offsets = [0, 24], sizes = [8, 4], strides = [1, 1]} : vector<8x32xf32> to vector<8x4xf32>
    %277 = vector.shape_cast %276 : vector<8x4xf32> to vector<1x8x4xf32>
    %278 = vector.extract_strided_slice %256 {offsets = [0, 28], sizes = [8, 4], strides = [1, 1]} : vector<8x32xf32> to vector<8x4xf32>
    %279 = vector.shape_cast %278 : vector<8x4xf32> to vector<1x8x4xf32>
    %280 = tpu.concatenate %265, %267, %269, %271, %273, %275, %277, %279 in 0 : vector<1x8x4xf32>, vector<1x8x4xf32>, vector<1x8x4xf32>, vector<1x8x4xf32>, vector<1x8x4xf32>, vector<1x8x4xf32>, vector<1x8x4xf32>, vector<1x8x4xf32> -> vector<8x8x4xf32>
    %281 = vector.extract_strided_slice %262 {offsets = [0, 0], sizes = [16, 4], strides = [1, 1]} : vector<16x32xf32> to vector<16x4xf32>
    %282 = vector.shape_cast %281 : vector<16x4xf32> to vector<1x16x4xf32>
    %283 = vector.extract_strided_slice %262 {offsets = [0, 4], sizes = [16, 4], strides = [1, 1]} : vector<16x32xf32> to vector<16x4xf32>
    %284 = vector.shape_cast %283 : vector<16x4xf32> to vector<1x16x4xf32>
    %285 = vector.extract_strided_slice %262 {offsets = [0, 8], sizes = [16, 4], strides = [1, 1]} : vector<16x32xf32> to vector<16x4xf32>
    %286 = vector.shape_cast %285 : vector<16x4xf32> to vector<1x16x4xf32>
    %287 = vector.extract_strided_slice %262 {offsets = [0, 12], sizes = [16, 4], strides = [1, 1]} : vector<16x32xf32> to vector<16x4xf32>
    %288 = vector.shape_cast %287 : vector<16x4xf32> to vector<1x16x4xf32>
    %289 = vector.extract_strided_slice %262 {offsets = [0, 16], sizes = [16, 4], strides = [1, 1]} : vector<16x32xf32> to vector<16x4xf32>
    %290 = vector.shape_cast %289 : vector<16x4xf32> to vector<1x16x4xf32>
    %291 = vector.extract_strided_slice %262 {offsets = [0, 20], sizes = [16, 4], strides = [1, 1]} : vector<16x32xf32> to vector<16x4xf32>
    %292 = vector.shape_cast %291 : vector<16x4xf32> to vector<1x16x4xf32>
    %293 = vector.extract_strided_slice %262 {offsets = [0, 24], sizes = [16, 4], strides = [1, 1]} : vector<16x32xf32> to vector<16x4xf32>
    %294 = vector.shape_cast %293 : vector<16x4xf32> to vector<1x16x4xf32>
    %295 = vector.extract_strided_slice %262 {offsets = [0, 28], sizes = [16, 4], strides = [1, 1]} : vector<16x32xf32> to vector<16x4xf32>
    %296 = vector.shape_cast %295 : vector<16x4xf32> to vector<1x16x4xf32>
    %297 = tpu.concatenate %282, %284, %286, %288, %290, %292, %294, %296 in 0 : vector<1x16x4xf32>, vector<1x16x4xf32>, vector<1x16x4xf32>, vector<1x16x4xf32>, vector<1x16x4xf32>, vector<1x16x4xf32>, vector<1x16x4xf32>, vector<1x16x4xf32> -> vector<8x16x4xf32>
    %298 = vector.extract_strided_slice %263 {offsets = [0, 0], sizes = [16, 4], strides = [1, 1]} : vector<16x32xf32> to vector<16x4xf32>
    %299 = vector.shape_cast %298 : vector<16x4xf32> to vector<1x16x4xf32>
    %300 = vector.extract_strided_slice %263 {offsets = [0, 4], sizes = [16, 4], strides = [1, 1]} : vector<16x32xf32> to vector<16x4xf32>
    %301 = vector.shape_cast %300 : vector<16x4xf32> to vector<1x16x4xf32>
    %302 = vector.extract_strided_slice %263 {offsets = [0, 8], sizes = [16, 4], strides = [1, 1]} : vector<16x32xf32> to vector<16x4xf32>
    %303 = vector.shape_cast %302 : vector<16x4xf32> to vector<1x16x4xf32>
    %304 = vector.extract_strided_slice %263 {offsets = [0, 12], sizes = [16, 4], strides = [1, 1]} : vector<16x32xf32> to vector<16x4xf32>
    %305 = vector.shape_cast %304 : vector<16x4xf32> to vector<1x16x4xf32>
    %306 = vector.extract_strided_slice %263 {offsets = [0, 16], sizes = [16, 4], strides = [1, 1]} : vector<16x32xf32> to vector<16x4xf32>
    %307 = vector.shape_cast %306 : vector<16x4xf32> to vector<1x16x4xf32>
    %308 = vector.extract_strided_slice %263 {offsets = [0, 20], sizes = [16, 4], strides = [1, 1]} : vector<16x32xf32> to vector<16x4xf32>
    %309 = vector.shape_cast %308 : vector<16x4xf32> to vector<1x16x4xf32>
    %310 = vector.extract_strided_slice %263 {offsets = [0, 24], sizes = [16, 4], strides = [1, 1]} : vector<16x32xf32> to vector<16x4xf32>
    %311 = vector.shape_cast %310 : vector<16x4xf32> to vector<1x16x4xf32>
    %312 = vector.extract_strided_slice %263 {offsets = [0, 28], sizes = [16, 4], strides = [1, 1]} : vector<16x32xf32> to vector<16x4xf32>
    %313 = vector.shape_cast %312 : vector<16x4xf32> to vector<1x16x4xf32>
    %314 = tpu.concatenate %299, %301, %303, %305, %307, %309, %311, %313 in 0 : vector<1x16x4xf32>, vector<1x16x4xf32>, vector<1x16x4xf32>, vector<1x16x4xf32>, vector<1x16x4xf32>, vector<1x16x4xf32>, vector<1x16x4xf32>, vector<1x16x4xf32> -> vector<8x16x4xf32>
    "tpu.trace_start"() <{level = 10 : i32, message = "hqd,hkd->hqk"}> : () -> ()
    %cst_114 = arith.constant dense<0.000000e+00> : vector<8x8x16xf32>
    %315 = tpu.matmul %280, %297, %cst_114 {dimension_numbers = #tpu.dot_dimension_numbers<[2], [2], [1], [1], [0, 0, 0, 1, 1, 1], [0], [0]>} : vector<8x8x4xf32>, vector<8x16x4xf32>, vector<8x8x16xf32> -> vector<8x8x16xf32>
    "tpu.trace_stop"() : () -> ()
    %cst_115 = arith.constant 5.000000e-01 : f32
    %316 = vector.broadcast %cst_115 : f32 to vector<8x8x16xf32>
    %317 = arith.mulf %315, %316 : vector<8x8x16xf32>
    %cst_116 = arith.constant dense<0xFF800000> : vector<8x8xf32>
    %318 = vector.multi_reduction <maximumf>, %317, %cst_116 [2] : vector<8x8x16xf32> to vector<8x8xf32>
    %319 = vector.shape_cast %318 : vector<8x8xf32> to vector<8x8x1xf32>
    %320 = vector.broadcast %319 : vector<8x8x1xf32> to vector<8x8x16xf32>
    %321 = arith.subf %317, %320 : vector<8x8x16xf32>
    %322 = math.exp %321 : vector<8x8x16xf32>
    %cst_117 = arith.constant dense<0.000000e+00> : vector<8x8xf32>
    %323 = vector.multi_reduction <add>, %322, %cst_117 [2] : vector<8x8x16xf32> to vector<8x8xf32>
    %324 = vector.shape_cast %323 : vector<8x8xf32> to vector<8x8x1xf32>
    %325 = tpu.reciprocal %324 {approx = true} : vector<8x8x1xf32> -> vector<8x8x1xf32>
    %326 = vector.broadcast %325 : vector<8x8x1xf32> to vector<8x8x16xf32>
    %327 = arith.mulf %322, %326 : vector<8x8x16xf32>
    "tpu.trace_start"() <{level = 10 : i32, message = "hqk,hkd->hqd"}> : () -> ()
    %cst_118 = arith.constant dense<0.000000e+00> : vector<8x8x4xf32>
    %328 = tpu.matmul %327, %314, %cst_118 {dimension_numbers = #tpu.dot_dimension_numbers<[2], [1], [1], [2], [0, 0, 0, 1, 1, 2], [0], [0]>} : vector<8x8x16xf32>, vector<8x16x4xf32>, vector<8x8x4xf32> -> vector<8x8x4xf32>
    "tpu.trace_stop"() : () -> ()
    %329 = vector.extract_strided_slice %328 {offsets = [0, 0, 0], sizes = [1, 8, 4], strides = [1, 1, 1]} : vector<8x8x4xf32> to vector<1x8x4xf32>
    %330 = vector.shape_cast %329 : vector<1x8x4xf32> to vector<8x4xf32>
    %331 = vector.extract_strided_slice %328 {offsets = [1, 0, 0], sizes = [1, 8, 4], strides = [1, 1, 1]} : vector<8x8x4xf32> to vector<1x8x4xf32>
    %332 = vector.shape_cast %331 : vector<1x8x4xf32> to vector<8x4xf32>
    %333 = vector.extract_strided_slice %328 {offsets = [2, 0, 0], sizes = [1, 8, 4], strides = [1, 1, 1]} : vector<8x8x4xf32> to vector<1x8x4xf32>
    %334 = vector.shape_cast %333 : vector<1x8x4xf32> to vector<8x4xf32>
    %335 = vector.extract_strided_slice %328 {offsets = [3, 0, 0], sizes = [1, 8, 4], strides = [1, 1, 1]} : vector<8x8x4xf32> to vector<1x8x4xf32>
    %336 = vector.shape_cast %335 : vector<1x8x4xf32> to vector<8x4xf32>
    %337 = vector.extract_strided_slice %328 {offsets = [4, 0, 0], sizes = [1, 8, 4], strides = [1, 1, 1]} : vector<8x8x4xf32> to vector<1x8x4xf32>
    %338 = vector.shape_cast %337 : vector<1x8x4xf32> to vector<8x4xf32>
    %339 = vector.extract_strided_slice %328 {offsets = [5, 0, 0], sizes = [1, 8, 4], strides = [1, 1, 1]} : vector<8x8x4xf32> to vector<1x8x4xf32>
    %340 = vector.shape_cast %339 : vector<1x8x4xf32> to vector<8x4xf32>
    %341 = vector.extract_strided_slice %328 {offsets = [6, 0, 0], sizes = [1, 8, 4], strides = [1, 1, 1]} : vector<8x8x4xf32> to vector<1x8x4xf32>
    %342 = vector.shape_cast %341 : vector<1x8x4xf32> to vector<8x4xf32>
    %343 = vector.extract_strided_slice %328 {offsets = [7, 0, 0], sizes = [1, 8, 4], strides = [1, 1, 1]} : vector<8x8x4xf32> to vector<1x8x4xf32>
    %344 = vector.shape_cast %343 : vector<1x8x4xf32> to vector<8x4xf32>
    %345 = tpu.concatenate %330, %332, %334, %336, %338, %340, %342, %344 in 1 : vector<8x4xf32>, vector<8x4xf32>, vector<8x4xf32>, vector<8x4xf32>, vector<8x4xf32>, vector<8x4xf32>, vector<8x4xf32>, vector<8x4xf32> -> vector<8x32xf32>
    %c0_119 = arith.constant 0 : index
    %c0_120 = arith.constant 0 : index
    %346 = vector.load %arg34[%c0_119, %c0_120] : memref<32x32xf32, #tpu.memory_space<vmem>>, vector<32x32xf32>
    %cst_121 = arith.constant dense<0.000000e+00> : vector<8x32xf32>
    %347 = tpu.matmul %345, %346, %cst_121 {dimension_numbers = #tpu.dot_dimension_numbers<[1], [0], [0], [1], [0, 0, 1, 1], [], []>} : vector<8x32xf32>, vector<32x32xf32>, vector<8x32xf32> -> vector<8x32xf32>
    %c0_122 = arith.constant 0 : index
    %c0_123 = arith.constant 0 : index
    %348 = vector.load %arg35[%c0_122, %c0_123] : memref<1x32xf32, #tpu.memory_space<vmem>>, vector<1x32xf32>
    %349 = vector.broadcast %348 : vector<1x32xf32> to vector<8x32xf32>
    %350 = arith.addf %347, %349 : vector<8x32xf32>
    %351 = arith.addf %350, %251 : vector<8x32xf32>
    %c0_124 = arith.constant 0 : index
    %c0_125 = arith.constant 0 : index
    %352 = vector.load %arg36[%c0_124, %c0_125] : memref<32x16xf32, #tpu.memory_space<vmem>>, vector<32x16xf32>
    %cst_126 = arith.constant dense<0.000000e+00> : vector<8x16xf32>
    %353 = tpu.matmul %351, %352, %cst_126 {dimension_numbers = #tpu.dot_dimension_numbers<[1], [0], [0], [1], [0, 0, 1, 1], [], []>} : vector<8x32xf32>, vector<32x16xf32>, vector<8x16xf32> -> vector<8x16xf32>
    %c0_127 = arith.constant 0 : index
    %c0_128 = arith.constant 0 : index
    %354 = vector.load %arg37[%c0_127, %c0_128] : memref<1x16xf32, #tpu.memory_space<vmem>>, vector<1x16xf32>
    %355 = vector.broadcast %354 : vector<1x16xf32> to vector<8x16xf32>
    %356 = arith.addf %353, %355 : vector<8x16xf32>
    %cst_129 = arith.constant 0.000000e+00 : f32
    %357 = vector.broadcast %cst_129 : f32 to vector<8x16xf32>
    %358 = arith.maximumf %356, %357 : vector<8x16xf32>
    %c0_130 = arith.constant 0 : index
    %c0_131 = arith.constant 0 : index
    %359 = vector.load %arg38[%c0_130, %c0_131] : memref<16x16xf32, #tpu.memory_space<vmem>>, vector<16x16xf32>
    %cst_132 = arith.constant dense<0.000000e+00> : vector<8x16xf32>
    %360 = tpu.matmul %358, %359, %cst_132 {dimension_numbers = #tpu.dot_dimension_numbers<[1], [0], [0], [1], [0, 0, 1, 1], [], []>} : vector<8x16xf32>, vector<16x16xf32>, vector<8x16xf32> -> vector<8x16xf32>
    %c0_133 = arith.constant 0 : index
    %c0_134 = arith.constant 0 : index
    %361 = vector.load %arg39[%c0_133, %c0_134] : memref<1x16xf32, #tpu.memory_space<vmem>>, vector<1x16xf32>
    %362 = vector.broadcast %361 : vector<1x16xf32> to vector<8x16xf32>
    %363 = arith.addf %360, %362 : vector<8x16xf32>
    %cst_135 = arith.constant 0.000000e+00 : f32
    %364 = vector.broadcast %cst_135 : f32 to vector<8x16xf32>
    %365 = arith.maximumf %363, %364 : vector<8x16xf32>
    %c0_136 = arith.constant 0 : index
    %c0_137 = arith.constant 0 : index
    %366 = vector.load %arg40[%c0_136, %c0_137] : memref<16x7xf32, #tpu.memory_space<vmem>>, vector<16x7xf32>
    %cst_138 = arith.constant dense<0.000000e+00> : vector<8x7xf32>
    %367 = tpu.matmul %365, %366, %cst_138 {dimension_numbers = #tpu.dot_dimension_numbers<[1], [0], [0], [1], [0, 0, 1, 1], [], []>} : vector<8x16xf32>, vector<16x7xf32>, vector<8x7xf32> -> vector<8x7xf32>
    %c0_139 = arith.constant 0 : index
    %c0_140 = arith.constant 0 : index
    %368 = vector.load %arg41[%c0_139, %c0_140] : memref<1x7xf32, #tpu.memory_space<vmem>>, vector<1x7xf32>
    %369 = vector.broadcast %368 : vector<1x7xf32> to vector<8x7xf32>
    %370 = arith.addf %367, %369 : vector<8x7xf32>
    %c0_141 = arith.constant 0 : index
    %c0_142 = arith.constant 0 : index
    %c0_143 = arith.constant 0 : index
    %371 = vector.load %arg42[%c0_141, %c0_142, %c0_143] : memref<1x8x7xf32, #tpu.memory_space<vmem>>, vector<1x8x7xf32>
    %372 = vector.shape_cast %371 : vector<1x8x7xf32> to vector<8x7xf32>
    %373 = vector.shape_cast %370 : vector<8x7xf32> to vector<1x8x7xf32>
    tpu.vector_store %arg42[%c0_141, %c0_142, %c0_143], %373 {strides = array<i32>} : memref<1x8x7xf32, #tpu.memory_space<vmem>>, vector<1x8x7xf32>,
    return
  }
  func.func @transform_0(%arg0: i32) -> (i32, i32, i32) {
    %c0_i32 = arith.constant 0 : i32
    %c0_i32_0 = arith.constant 0 : i32
    %c0_i32_1 = arith.constant 0 : i32
    return %arg0, %c0_i32, %c0_i32_0 : i32, i32, i32
  }
  func.func @transform_1(%arg0: i32) -> (i32, i32, i32) {
    %c0_i32 = arith.constant 0 : i32
    %c0_i32_0 = arith.constant 0 : i32
    %c0_i32_1 = arith.constant 0 : i32
    return %arg0, %c0_i32, %c0_i32_0 : i32, i32, i32
  }
  func.func @transform_2(%arg0: i32) -> (i32, i32, i32) {
    %c0_i32 = arith.constant 0 : i32
    %c0_i32_0 = arith.constant 0 : i32
    %c0_i32_1 = arith.constant 0 : i32
    return %arg0, %c0_i32, %c0_i32_0 : i32, i32, i32
  }
  func.func @transform_3(%arg0: i32) -> (i32, i32, i32) {
    %c0_i32 = arith.constant 0 : i32
    %c0_i32_0 = arith.constant 0 : i32
    %c0_i32_1 = arith.constant 0 : i32
    return %arg0, %c0_i32, %c0_i32_0 : i32, i32, i32
  }
  func.func @transform_4(%arg0: i32) -> (i32, i32, i32) {
    %c0_i32 = arith.constant 0 : i32
    %c0_i32_0 = arith.constant 0 : i32
    %c0_i32_1 = arith.constant 0 : i32
    return %arg0, %c0_i32, %c0_i32_0 : i32, i32, i32
  }
  func.func @transform_5(%arg0: i32) -> (i32, i32) {
    %c0_i32 = arith.constant 0 : i32
    %c0_i32_0 = arith.constant 0 : i32
    %c0_i32_1 = arith.constant 0 : i32
    return %c0_i32, %c0_i32_0 : i32, i32
  }
  func.func @transform_6(%arg0: i32) -> (i32, i32) {
    %c0_i32 = arith.constant 0 : i32
    %c0_i32_0 = arith.constant 0 : i32
    %c0_i32_1 = arith.constant 0 : i32
    return %c0_i32, %c0_i32_0 : i32, i32
  }
  func.func @transform_7(%arg0: i32) -> (i32, i32) {
    %c0_i32 = arith.constant 0 : i32
    %c0_i32_0 = arith.constant 0 : i32
    %c0_i32_1 = arith.constant 0 : i32
    return %c0_i32, %c0_i32_0 : i32, i32
  }
  func.func @transform_8(%arg0: i32) -> (i32, i32) {
    %c0_i32 = arith.constant 0 : i32
    %c0_i32_0 = arith.constant 0 : i32
    %c0_i32_1 = arith.constant 0 : i32
    return %c0_i32, %c0_i32_0 : i32, i32
  }
  func.func @transform_9(%arg0: i32) -> (i32, i32) {
    %c0_i32 = arith.constant 0 : i32
    %c0_i32_0 = arith.constant 0 : i32
    %c0_i32_1 = arith.constant 0 : i32
    return %c0_i32, %c0_i32_0 : i32, i32
  }
  func.func @transform_10(%arg0: i32) -> (i32, i32) {
    %c0_i32 = arith.constant 0 : i32
    %c0_i32_0 = arith.constant 0 : i32
    %c0_i32_1 = arith.constant 0 : i32
    return %c0_i32, %c0_i32_0 : i32, i32
  }
  func.func @transform_11(%arg0: i32) -> (i32, i32) {
    %c0_i32 = arith.constant 0 : i32
    %c0_i32_0 = arith.constant 0 : i32
    %c0_i32_1 = arith.constant 0 : i32
    return %c0_i32, %c0_i32_0 : i32, i32
  }
  func.func @transform_12(%arg0: i32) -> (i32, i32) {
    %c0_i32 = arith.constant 0 : i32
    %c0_i32_0 = arith.constant 0 : i32
    %c0_i32_1 = arith.constant 0 : i32
    return %c0_i32, %c0_i32_0 : i32, i32
  }
  func.func @transform_13(%arg0: i32) -> (i32, i32) {
    %c0_i32 = arith.constant 0 : i32
    %c0_i32_0 = arith.constant 0 : i32
    %c0_i32_1 = arith.constant 0 : i32
    return %c0_i32, %c0_i32_0 : i32, i32
  }
  func.func @transform_14(%arg0: i32) -> (i32, i32) {
    %c0_i32 = arith.constant 0 : i32
    %c0_i32_0 = arith.constant 0 : i32
    %c0_i32_1 = arith.constant 0 : i32
    return %c0_i32, %c0_i32_0 : i32, i32
  }
  func.func @transform_15(%arg0: i32) -> (i32, i32) {
    %c0_i32 = arith.constant 0 : i32
    %c0_i32_0 = arith.constant 0 : i32
    %c0_i32_1 = arith.constant 0 : i32
    return %c0_i32, %c0_i32_0 : i32, i32
  }
  func.func @transform_16(%arg0: i32) -> (i32, i32) {
    %c0_i32 = arith.constant 0 : i32
    %c0_i32_0 = arith.constant 0 : i32
    %c0_i32_1 = arith.constant 0 : i32
    return %c0_i32, %c0_i32_0 : i32, i32
  }
  func.func @transform_17(%arg0: i32) -> (i32, i32) {
    %c0_i32 = arith.constant 0 : i32
    %c0_i32_0 = arith.constant 0 : i32
    %c0_i32_1 = arith.constant 0 : i32
    return %c0_i32, %c0_i32_0 : i32, i32
  }
  func.func @transform_18(%arg0: i32) -> (i32, i32) {
    %c0_i32 = arith.constant 0 : i32
    %c0_i32_0 = arith.constant 0 : i32
    %c0_i32_1 = arith.constant 0 : i32
    return %c0_i32, %c0_i32_0 : i32, i32
  }
  func.func @transform_19(%arg0: i32) -> (i32, i32) {
    %c0_i32 = arith.constant 0 : i32
    %c0_i32_0 = arith.constant 0 : i32
    %c0_i32_1 = arith.constant 0 : i32
    return %c0_i32, %c0_i32_0 : i32, i32
  }
  func.func @transform_20(%arg0: i32) -> (i32, i32) {
    %c0_i32 = arith.constant 0 : i32
    %c0_i32_0 = arith.constant 0 : i32
    %c0_i32_1 = arith.constant 0 : i32
    return %c0_i32, %c0_i32_0 : i32, i32
  }
  func.func @transform_21(%arg0: i32) -> (i32, i32) {
    %c0_i32 = arith.constant 0 : i32
    %c0_i32_0 = arith.constant 0 : i32
    %c0_i32_1 = arith.constant 0 : i32
    return %c0_i32, %c0_i32_0 : i32, i32
  }
  func.func @transform_22(%arg0: i32) -> (i32, i32) {
    %c0_i32 = arith.constant 0 : i32
    %c0_i32_0 = arith.constant 0 : i32
    %c0_i32_1 = arith.constant 0 : i32
    return %c0_i32, %c0_i32_0 : i32, i32
  }
  func.func @transform_23(%arg0: i32) -> (i32, i32) {
    %c0_i32 = arith.constant 0 : i32
    %c0_i32_0 = arith.constant 0 : i32
    %c0_i32_1 = arith.constant 0 : i32
    return %c0_i32, %c0_i32_0 : i32, i32
  }
  func.func @transform_24(%arg0: i32) -> (i32, i32) {
    %c0_i32 = arith.constant 0 : i32
    %c0_i32_0 = arith.constant 0 : i32
    %c0_i32_1 = arith.constant 0 : i32
    return %c0_i32, %c0_i32_0 : i32, i32
  }
  func.func @transform_25(%arg0: i32) -> (i32, i32) {
    %c0_i32 = arith.constant 0 : i32
    %c0_i32_0 = arith.constant 0 : i32
    %c0_i32_1 = arith.constant 0 : i32
    return %c0_i32, %c0_i32_0 : i32, i32
  }
  func.func @transform_26(%arg0: i32) -> (i32, i32) {
    %c0_i32 = arith.constant 0 : i32
    %c0_i32_0 = arith.constant 0 : i32
    %c0_i32_1 = arith.constant 0 : i32
    return %c0_i32, %c0_i32_0 : i32, i32
  }
  func.func @transform_27(%arg0: i32) -> (i32, i32) {
    %c0_i32 = arith.constant 0 : i32
    %c0_i32_0 = arith.constant 0 : i32
    %c0_i32_1 = arith.constant 0 : i32
    return %c0_i32, %c0_i32_0 : i32, i32
  }
  func.func @transform_28(%arg0: i32) -> (i32, i32) {
    %c0_i32 = arith.constant 0 : i32
    %c0_i32_0 = arith.constant 0 : i32
    %c0_i32_1 = arith.constant 0 : i32
    return %c0_i32, %c0_i32_0 : i32, i32
  }
  func.func @transform_29(%arg0: i32) -> (i32, i32) {
    %c0_i32 = arith.constant 0 : i32
    %c0_i32_0 = arith.constant 0 : i32
    %c0_i32_1 = arith.constant 0 : i32
    return %c0_i32, %c0_i32_0 : i32, i32
  }
  func.func @transform_30(%arg0: i32) -> (i32, i32) {
    %c0_i32 = arith.constant 0 : i32
    %c0_i32_0 = arith.constant 0 : i32
    %c0_i32_1 = arith.constant 0 : i32
    return %c0_i32, %c0_i32_0 : i32, i32
  }
  func.func @transform_31(%arg0: i32) -> (i32, i32) {
    %c0_i32 = arith.constant 0 : i32
    %c0_i32_0 = arith.constant 0 : i32
    %c0_i32_1 = arith.constant 0 : i32
    return %c0_i32, %c0_i32_0 : i32, i32
  }
  func.func @transform_32(%arg0: i32) -> (i32, i32) {
    %c0_i32 = arith.constant 0 : i32
    %c0_i32_0 = arith.constant 0 : i32
    %c0_i32_1 = arith.constant 0 : i32
    return %c0_i32, %c0_i32_0 : i32, i32
  }
  func.func @transform_33(%arg0: i32) -> (i32, i32) {
    %c0_i32 = arith.constant 0 : i32
    %c0_i32_0 = arith.constant 0 : i32
    %c0_i32_1 = arith.constant 0 : i32
    return %c0_i32, %c0_i32_0 : i32, i32
  }
  func.func @transform_34(%arg0: i32) -> (i32, i32) {
    %c0_i32 = arith.constant 0 : i32
    %c0_i32_0 = arith.constant 0 : i32
    %c0_i32_1 = arith.constant 0 : i32
    return %c0_i32, %c0_i32_0 : i32, i32
  }
  func.func @transform_35(%arg0: i32) -> (i32, i32) {
    %c0_i32 = arith.constant 0 : i32
    %c0_i32_0 = arith.constant 0 : i32
    %c0_i32_1 = arith.constant 0 : i32
    return %c0_i32, %c0_i32_0 : i32, i32
  }
  func.func @transform_36(%arg0: i32) -> (i32, i32) {
    %c0_i32 = arith.constant 0 : i32
    %c0_i32_0 = arith.constant 0 : i32
    %c0_i32_1 = arith.constant 0 : i32
    return %c0_i32, %c0_i32_0 : i32, i32
  }
  func.func @transform_37(%arg0: i32) -> (i32, i32) {
    %c0_i32 = arith.constant 0 : i32
    %c0_i32_0 = arith.constant 0 : i32
    %c0_i32_1 = arith.constant 0 : i32
    return %c0_i32, %c0_i32_0 : i32, i32
  }
  func.func @transform_38(%arg0: i32) -> (i32, i32) {
    %c0_i32 = arith.constant 0 : i32
    %c0_i32_0 = arith.constant 0 : i32
    %c0_i32_1 = arith.constant 0 : i32
    return %c0_i32, %c0_i32_0 : i32, i32
  }
  func.func @transform_39(%arg0: i32) -> (i32, i32) {
    %c0_i32 = arith.constant 0 : i32
    %c0_i32_0 = arith.constant 0 : i32
    %c0_i32_1 = arith.constant 0 : i32
    return %c0_i32, %c0_i32_0 : i32, i32
  }
  func.func @transform_40(%arg0: i32) -> (i32, i32) {
    %c0_i32 = arith.constant 0 : i32
    %c0_i32_0 = arith.constant 0 : i32
    %c0_i32_1 = arith.constant 0 : i32
    return %c0_i32, %c0_i32_0 : i32, i32
  }
  func.func @transform_41(%arg0: i32) -> (i32, i32, i32) {
    %c0_i32 = arith.constant 0 : i32
    %c0_i32_0 = arith.constant 0 : i32
    %c0_i32_1 = arith.constant 0 : i32
    return %arg0, %c0_i32, %c0_i32_0 : i32, i32, i32
  }
}

</mosaic_0001>

<bundles_post_ra>
// kernel: action_gpt_forward.1
= control target key start
LH: loop header
LB: loop body
LE: loop exit
PB: predicated region body
PF: predicated region fallthrough
CT: control target
= control target key end

     0   :  { %s8901_s6 = smov 1   ;;  %s8902_s10 = smov 2   ;;  %s11188_s0 = inlined_call_operand.smem [shape: u32[42], index: -1, kind: input, shape index: {}] }
   0x1   :  { %s8970_s5 = sld [smem:[%s11188_s0]]   ;;  %s8903_s14 = smov 3  }
   0x2   :  { %s8975_s9 = sld [smem:[%s11188_s0 + %s8901_s6]]   ;;  %s8904_s18 = smov 4  }
   0x3   :  { %s8980_s13 = sld [smem:[%s11188_s0 + %s8902_s10]]   ;;  %s8905_s22 = smov 5  }
   0x4   :  { %s8985_s17 = sld [smem:[%s11188_s0 + %s8903_s14]]   ;;  %s8906_s26 = smov 6  }
   0x5   :  { %s8990_s21 = sld [smem:[%s11188_s0 + %s8904_s18]]   ;;  %s8907_s30 = smov 7  }
   0x6   :  { %s8995_s25 = sld [smem:[%s11188_s0 + %s8905_s22]]   ;;  %s8908_s4 = smov 8  }
   0x7   :  { %s9000_s29 = sld [smem:[%s11188_s0 + %s8906_s26]]   ;;  %s8909_s10 = smov 9  }
   0x8   :  { %s9005_s3 = sld [smem:[%s11188_s0 + %s8907_s30]]   ;;  %s8910_s15 = smov 10  }
   0x9   :  { %s9010_s8 = sld [smem:[%s11188_s0 + %s8908_s4]]   ;;  %s8911_s20 = smov 11  }
   0xa   :  { %s9015_s14 = sld [smem:[%s11188_s0 + %s8909_s10]]   ;;  %s8912_s26 = smov 12  }
   0xb   :  { %11227 = sst [smem:[#allocation3_spill]] %s8990_s21  ;;  %s8913_s1 = smov 13  }
   0xc   :  { %s9020_s19 = sld [smem:[%s11188_s0 + %s8910_s15]]   ;;  %s8914_s7 = smov 14  }
   0xd   :  { %s9025_s24 = sld [smem:[%s11188_s0 + %s8911_s20]]   ;;  %s8915_s15 = smov 15  }
   0xe   :  { %s9030_s30 = sld [smem:[%s11188_s0 + %s8912_s26]]   ;;  %s8916_s22 = smov 16  }
   0xf   :  { %s9035_s6 = sld [smem:[%s11188_s0 + %s8913_s1]]   ;;  %s8917_s28 = smov 17  }
  0x10   :  { %s9040_s12 = sld [smem:[%s11188_s0 + %s8914_s7]]   ;;  %s8918_s7 = smov 18  }
  0x11   :  { %s9045_s20 = sld [smem:[%s11188_s0 + %s8915_s15]]   ;;  %s8919_s15 = smov 19  }
  0x12   :  { %s9050_s27 = sld [smem:[%s11188_s0 + %s8916_s22]]   ;;  %s8920_s22 = smov 20  }
  0x13   :  { %s9055_s4 = sld [smem:[%s11188_s0 + %s8917_s28]]   ;;  %s8921_s28 = smov 21  }
  0x14   :  { %s9060_s21 = sld [smem:[%s11188_s0 + %s8918_s7]]   ;;  %s8922_s7 = smov 22  }
  0x17   :  { %11228 = sst [smem:[#allocation4_spill]] %s9045_s20 }
  0x18   :  { %11229 = sst [smem:[#allocation5_spill]] %s9050_s27 }
  0x19   :  { %11230 = sst [smem:[#allocation6_spill]] %s9055_s4 }
  0x1a   :  { %11231 = sst [smem:[#allocation7_spill]] %s9060_s21 }
  0x1b   :  { %s9065_s20 = sld [smem:[%s11188_s0 + %s8919_s15]]   ;;  %s8923_s15 = smov 23  }
  0x1c   :  { %s9070_s27 = sld [smem:[%s11188_s0 + %s8920_s22]]   ;;  %s8924_s22 = smov 24  }
  0x1d   :  { %s9075_s4 = sld [smem:[%s11188_s0 + %s8921_s28]]   ;;  %s8925_s28 = smov 25  }
  0x1e   :  { %s9080_s21 = sld [smem:[%s11188_s0 + %s8922_s7]]   ;;  %s8926_s7 = smov 26  }
  0x21   :  { %11232 = sst [smem:[#allocation8_spill]] %s9065_s20 }
  0x22   :  { %11233 = sst [smem:[#allocation9_spill]] %s9070_s27 }
  0x23   :  { %11234 = sst [smem:[#allocation10_spill]] %s9075_s4 }
  0x24   :  { %11235 = sst [smem:[#allocation11_spill]] %s9080_s21 }
  0x25   :  { %s9085_s20 = sld [smem:[%s11188_s0 + %s8923_s15]]   ;;  %s8927_s15 = smov 27  }
  0x26   :  { %s9090_s27 = sld [smem:[%s11188_s0 + %s8924_s22]]   ;;  %s8928_s22 = smov 28  }
  0x27   :  { %s9095_s4 = sld [smem:[%s11188_s0 + %s8925_s28]]   ;;  %s8929_s28 = smov 29  }
  0x28   :  { %s9100_s21 = sld [smem:[%s11188_s0 + %s8926_s7]]   ;;  %s8930_s7 = smov 30  }
  0x2b   :  { %11236 = sst [smem:[#allocation12_spill]] %s9085_s20 }
  0x2c   :  { %11237 = sst [smem:[#allocation13_spill]] %s9090_s27 }
  0x2d   :  { %11238 = sst [smem:[#allocation14_spill]] %s9095_s4 }
  0x2e   :  { %11239 = sst [smem:[#allocation15_spill]] %s9100_s21 }
  0x2f   :  { %s9105_s20 = sld [smem:[%s11188_s0 + %s8927_s15]]   ;;  %s8931_s15 = smov 31  }
  0x30   :  { %s9110_s27 = sld [smem:[%s11188_s0 + %s8928_s22]]   ;;  %s8932_s22 = smov 32  }
  0x31   :  { %s9115_s4 = sld [smem:[%s11188_s0 + %s8929_s28]]   ;;  %s8933_s28 = smov 33  }
  0x32   :  { %s9120_s21 = sld [smem:[%s11188_s0 + %s8930_s7]]   ;;  %s8934_s7 = smov 34  }
  0x35   :  { %11240 = sst [smem:[#allocation16_spill]] %s9105_s20 }
  0x36   :  { %11241 = sst [smem:[#allocation17_spill]] %s9110_s27 }
  0x37   :  { %11242 = sst [smem:[#allocation18_spill]] %s9115_s4 }
  0x38   :  { %11243 = sst [smem:[#allocation19_spill]] %s9120_s21 }
  0x39   :  { %s9125_s20 = sld [smem:[%s11188_s0 + %s8931_s15]]   ;;  %s8935_s15 = smov 35  }
  0x3a   :  { %s9130_s27 = sld [smem:[%s11188_s0 + %s8932_s22]]   ;;  %s8936_s22 = smov 36  }
  0x3b   :  { %s9135_s4 = sld [smem:[%s11188_s0 + %s8933_s28]]   ;;  %s8937_s28 = smov 37  }
  0x3c   :  { %s9140_s21 = sld [smem:[%s11188_s0 + %s8934_s7]]   ;;  %s8938_s7 = smov 38  }
  0x3f   :  { %11244 = sst [smem:[#allocation20_spill]] %s9125_s20 }
  0x40   :  { %11245 = sst [smem:[#allocation21_spill]] %s9130_s27 }
  0x41   :  { %11246 = sst [smem:[#allocation22_spill]] %s9135_s4 }
  0x42   :  { %11247 = sst [smem:[#allocation23_spill]] %s9140_s21 }
  0x43   :  { %s9145_s20 = sld [smem:[%s11188_s0 + %s8935_s15]]   ;;  %s8939_s15 = smov 39  }
  0x44   :  { %s9150_s27 = sld [smem:[%s11188_s0 + %s8936_s22]]   ;;  %s8940_s22 = smov 40  }
  0x45   :  { %s9155_s4 = sld [smem:[%s11188_s0 + %s8937_s28]]   ;;  %s8941_s28 = smov 41  }
  0x46   :  { %s9160_s21 = sld [smem:[%s11188_s0 + %s8938_s7]]   ;;  %s9177_s7 = smov 0  }
  0x49   :  { %11248 = sst [smem:[#allocation24_spill]] %s9145_s20 }
  0x4a   :  { %11249 = sst [smem:[#allocation25_spill]] %s9150_s27 }
  0x4b   :  { %11250 = sst [smem:[#allocation26_spill]] %s9155_s4 }
  0x4c   :  { %s9165_s20 = sld [smem:[%s11188_s0 + %s8939_s15]]  }
  0x4d   :  { %s9170_s27 = sld [smem:[%s11188_s0 + %s8940_s22]]  }
  0x4e   :  { %s9175_s4 = sld [smem:[%s11188_s0 + %s8941_s28]]  }
  0x4f LB: > { %s7314_s10 = sadd.s32 4294967295, %s8899_s7   ;;  %p7318_p0 = scmp.ge.s32.totalorder %s8899_s7, 1  ;;  %s8899_s7 = sphi %s9177_s7, %s93_s7  }
  0x50   : > { %p1165_p1 = scmp.lt.s32.totalorder %s8899_s7, 3 }
  0x52   : > { %p1166_p2 = pnand %p7318_p0, %p1165_p1 }
  0x54   : > { %1169 = sbr.rel (%p1166_p2) target bundleno = 5293 (0x14ad), region = 184 }
  0x59   : > { %v1408_v0 = vld [vmem:[%s9025_s24 + $0x28] sm:$0xff]  ;;  %v1407_v2 = vld [vmem:[%s9025_s24 + $0x20] sm:$0xff]  ;;  %p1280_p3 = scmp.lt.s32.totalorder %s7314_s10, 1  ;;  %v11201_v3 = vmov 0.0   ;;  %v1406_v5 = vld [vmem:[%s9025_s24 + $0x18] sm:$0xff]  ;;  %vm1320_vm0 = vcmask 392192   ;;  %v1395_v28 = vlaneseq }
  0x5a   : > { %v1312_v1 = vld [vmem:[%s9005_s3 + $0x28] sm:$0xff]  ;;  %7849 = vmatprep.subr.mxu0 %v11201_v3  ;;  %7864 = vmatprep.subr.mxu1 %v1408_v0  ;;  %v1311_v4 = vld [vmem:[%s9005_s3 + $0x20] sm:$0xff]  ;;  %v1310_v6 = vld [vmem:[%s9005_s3 + $0x18] sm:$0xff]  ;;  %vm8943_vm1 = vmmov 0   ;;  %vm1597_vm2 = vcmask 1046528   ;;  %vm1593_vm3 = vcmask 56320  }
  0x5b   : > { %7850 = vmatpush3.msra.mxu0 %v1312_v1  ;;  %7865 = vmatpush3.msra.mxu1 %v1408_v0  ;;  %s11344_s10 = smov (!%p1280_p3, %s7314_s10), 1  ;;  %v1405_v7 = vld [vmem:[%s9025_s24 + $0x10] sm:$0xff]  ;;  %v1404_v9 = vld [vmem:[%s9025_s24 + $0x8] sm:$0xff]  ;;  %v1403_v11 = vld [vmem:[%s9025_s24] sm:$0xff]  ;;  %vm1509_vm4 = vcmask 523264   ;;  %vm1674_vm5 = vcmask 261120  }
  0x5c   : > { %7851 = vmatprep.subr.mxu0 %v11201_v3  ;;  %7866 = vmatprep.subr.mxu1 %v1407_v2  ;;  %s7539_s0 = sshll.u32 %s11344_s10, 4  ;;  %v1309_v8 = vld [vmem:[%s9005_s3 + $0x10] sm:$0xff]  ;;  %s11198_s11 = sshll.u32 %s11344_s10, 3  ;;  %v1308_v10 = vld [vmem:[%s9005_s3 + $0x8] sm:$0xff]  ;;  %v1307_v12 = vld [vmem:[%s9005_s3] sm:$0xff]  ;;  %v9253_v29 = vshrl.u32 %v1395_v28, 7 }
  0x5d   : > { %7852 = vmatpush3.msra.mxu0 %v1311_v4  ;;  %7867 = vmatpush3.msra.mxu1 %v1407_v2  ;;  %s1291_s15 = scalar_lea.vmem %s8980_s13, %s7539_s0  ;;  %s1283_s16 = scalar_lea.vmem %s8970_s5, %s11198_s11  ;;  %v1507_v16 = vld [vmem:[%s9015_s14 + $0x38] sm:$0xff]  ;;  %v1585_v17 = vld [vmem:[%s9035_s6] sm:$0x7f]  ;;  %v1506_v18 = vld [vmem:[%s9015_s14 + $0x30] sm:$0xff]  ;;  %vm1672_vm6 = vcmask 258048   ;;  %vm1679_vm7 = vcmask 256000  }
  0x5e   : > { %7853 = vmatprep.subr.mxu0 %v11201_v3  ;;  %7868 = vmatprep.subr.mxu1 %v1406_v5  ;;  %s7322_s18 = sshll.u32 %s11344_s10, 2  ;;  %v1401_v13 = vld [vmem:[%s1291_s15] sm:$0xff]  ;;  %v1402_v14 = vld [vmem:[%s1291_s15 + $0x8] sm:$0xff]  ;;  %v1503_v22 = vld [vmem:[%s9015_s14 + $0x18] sm:$0xff]  ;;  %s1286_s23 = scalar_lea.vmem %s8975_s9, %s11344_s10  ;;  %v1397_v30 = vsub.s32 0, %v9253_v29  ;;  %vm1677_vm8 = vcmask 253952  }
  0x5f   : > { %7854 = vmatpush3.msra.mxu0 %v1310_v6  ;;  %7869 = vmatpush3.msra.mxu1 %v1406_v5  ;;  %v1306_v15 = vld [vmem:[%s1283_s16] sm:$0x1f]  ;;  %s1295_s22 = scalar_lea.vmem %s8985_s17, %s7322_s18  ;;  %v1505_v20 = vld [vmem:[%s9015_s14 + $0x28] sm:$0xff]  ;;  %v1502_v23 = vld [vmem:[%s9015_s14 + $0x10] sm:$0xff]  ;;  %s11253_s26 = sld [smem:[#allocation4_spill]]  ;;  %vm2136_vm9 = vcmask 31744  }
  0x60   : > { %7855 = vmatprep.subr.mxu0 %v11201_v3  ;;  %7870 = vmatprep.subr.mxu1 %v1405_v7  ;;  %v1584_v19 = vld [vmem:[%s1295_s22] sm:$0x7]  ;;  %v1501_v24 = vld [vmem:[%s9015_s14 + $0x8] sm:$0xff]  ;;  %s11254_s28 = sld [smem:[#allocation5_spill]]  ;;  %s8944_s16 = smov 124   ;;  %vm3638_vm10 = vcmask 1040384  }
  0x61   : > { %7856 = vmatpush3.msra.mxu0 %v1309_v8  ;;  %7871 = vmatpush3.msra.mxu1 %v1405_v7  ;;  %v1504_v21 = vld [vmem:[%s9015_s14 + $0x20] sm:$0xff]  ;;  %s11260_s1 = sld [smem:[#allocation8_spill]]  ;;  %s8945_s18 = smov 120  }
  0x62   : > { %7857 = vmatprep.subr.mxu0 %v11201_v3  ;;  %7872 = vmatprep.subr.mxu1 %v1404_v9  ;;  %v1500_v25 = vld [vmem:[%s9015_s14] sm:$0xff]  ;;  %s11261_s2 = sld [smem:[#allocation6_spill]]  ;;  %s8946_s22 = smov 116  }
  0x63   : > { %7858 = vmatpush3.msra.mxu0 %v1308_v10  ;;  %7873 = vmatpush3.msra.mxu1 %v1404_v9  ;;  %v1499_v26 = vld [vmem:[%s1286_s23] sm:$0x1]  ;;  %s11262_s0 = sld [smem:[#allocation7_spill]]  ;;  %s11223_s23 = smov 112  }
  0x64   : > { %7859 = vmatprep.subr.mxu0 %v11201_v3  ;;  %7874 = vmatprep.subr.mxu1 %v1403_v11  ;;  %v1681_v27 = vld [vmem:[%s9000_s29] sm:$0xff]  ;;  %s11263_s15 = sld [smem:[#allocation9_spill]]  ;;  %s8589_s11 = smul.u32 40, %s11344_s10 }
  0x65   : > { %7860 = vmatpush3.msra.mxu0 %v1307_v12  ;;  %7861 = vmatprep.mubr.msk.f32.mxu0 %vm8943_vm1, %v11201_v3  ;;  %1682 = vst.msk [vmem:[#allocation2 + $0x19] sm:$0xff] %vm1674_vm5, %v1681_v27  ;;  %v1305_v31 = vld [vmem:[%s8995_s25] sm:$0x1] }
  0x66   : > { %7875 = vmatpush3.msra.mxu1 %v1403_v11  ;;  %7876 = vmatprep.mubr.msk.f32.mxu1 %vm1320_vm0, %v1401_v13  ;;  %v7325_v32 = vld [vmem:[%s9010_s8] ss:$0 sm:$0xff]  ;;  %v1398_v33 = vrot.slane %v1305_v31, %v1397_v30 }
  0x67   : > { %7862 = vmatmul.mubr.msk.f32.vlgmr.msra.gmra.mxu0 %vm1320_vm0, %v1306_v15  ;;  %7877 = vmatmul.mubr.msk.f32.vlgmr.msra.gmra.mxu1 %vm1320_vm0, %v1402_v14  ;;  %v7327_v36 = vld [vmem:[%s9030_s30] ss:$0 sm:$0xff] }
  0x68   : > { %7879 = vmatprep.subr.mxu0 %v11201_v3  ;;  %7898 = vmatprep.subr.mxu1 %v11201_v3  ;;  %v7331_v41 = vld [vmem:[%s9040_s12] ss:$0 sm:$0xff] }
  0x69   : > { %7880 = vmatpush3.msra.mxu0 %v1507_v16  ;;  %7899 = vmatpush3.msk.msra.mxu1 %vm1597_vm2, %v1585_v17  ;;  %v1508_v53 = vld [vmem:[%s9020_s19] sm:$0x1] }
  0x6a   : > { %7881 = vmatprep.subr.mxu0 %v11201_v3  ;;  %7900 = vmatprep.mubr.msk.f32.mxu1 %vm8943_vm1, %v11201_v3 }
  0x6b   : > { %7882 = vmatpush3.msra.mxu0 %v1506_v18  ;;  %7901 = vmatmul.mubr.msk.f32.vlgmr.msra.gmra.mxu1 %vm1593_vm3, %v1584_v19 }
  0x6c   : > { %7883 = vmatprep.subr.mxu0 %v11201_v3  ;;  %7895 = vmatprep.mubr.msk.f32.mxu0 %vm8943_vm1, %v11201_v3  ;;  %v1687_v57 = vld [vmem:[#allocation2 + $0x20] sm:$0x1] }
  0x6d   : > { %7884 = vmatpush3.msra.mxu0 %v1505_v20  ;;  %7903 = vmatprep.subr.mxu1 %v11201_v3  ;;  %v1702_v60 = vsel %vm1677_vm8, %v1687_v57, 0.0 }
  0x6e   : > { %7885 = vmatprep.subr.mxu0 %v11201_v3  ;;  %7911 = vmatprep.mubr.msk.f32.mxu1 %vm8943_vm1, %v11201_v3 }
  0x6f   : > { %7886 = vmatpush3.msra.mxu0 %v1504_v21 }
  0x70   : > { %7887 = vmatprep.subr.mxu0 %v11201_v3 }
  0x71   : > { %7888 = vmatpush3.msra.mxu0 %v1503_v22 }
  0x72   : > { %7889 = vmatprep.subr.mxu0 %v11201_v3 }
  0x73   : > { %7890 = vmatpush3.msra.mxu0 %v1502_v23 }
  0x74   : > { %7891 = vmatprep.subr.mxu0 %v11201_v3 }
  0x75   : > { %7892 = vmatpush3.msra.mxu0 %v1501_v24 }
  0x76   : > { %7893 = vmatprep.subr.mxu0 %v11201_v3 }
  0x77   : > { %7894 = vmatpush3.msra.mxu0 %v1500_v25 }
  0x78   : > { %7896 = vmatmul.mubr.msk.f32.vlgmr.msra.gmra.mxu0 %vm1509_vm4, %v1499_v26  ;;  %7951 = vmatprep.subr.mxu0 %v11201_v3  ;;  %vm3167_vm4 = vcmask 269312  }
  0x79   : > { %7961 = vmatprep.mubr.msk.f32.mxu0 %vm8943_vm1, %v11201_v3 }
 0x127   : > { %v1390_v34 = vpop.f32.mrf.mxu0  ;;  %v7878_v35 = vpop.f32.mrf.mxu1 }
 0x128   : > { %v1391_v37 = vadd.f32 %v7325_v32, %v1390_v34  ;;  %v1494_v38 = vadd.f32 %v7878_v35, %v7327_v36 }
 0x129   : > { %v7863_v39 = vpop.f32.mrf.mxu0  ;;  %v1488_v40 = vpop.f32.mrf.mxu1 }
 0x12a   : > { %v1400_v42 = vadd.f32 %v1398_v33, %v1391_v37  ;;  %v9260_v43 = vadd.f32 %v1494_v38, %v1398_v33  ;;  %v1489_v44 = vadd.f32 %v7327_v36, %v1488_v40  ;;  %v7334_v39 = vld [vmem:[%s11253_s26] ss:$0 sm:$0xff]  ;;  %s11216_s26 = smov 108  }
 0x12b   : > { %v1667_v45 = vpop.f32.mrf.mxu1 }
 0x12c   : > { %11251 = vst [vmem:[#allocation27_spill] sm:$0xff] %v9260_v43  ;;  %1673 = vst.msk [vmem:[#allocation2] sm:$0x1f] %vm1672_vm6, %v1400_v42  ;;  %v9264_v46 = vadd.f32 %v1489_v44, %v1398_v33  ;;  %v1668_v47 = vadd.f32 %v7331_v41, %v1667_v45 }
 0x12d   : > { %1676 = vst.msk [vmem:[#allocation2 + $0xd] sm:$0xff] %vm1674_vm5, %v9260_v43  ;;  %v7902_v48 = vpop.f32.mrf.mxu1 }
 0x12e   : > { %11252 = vst [vmem:[#allocation28_spill] sm:$0xff] %v9264_v46  ;;  %1675 = vst.msk [vmem:[#allocation2 + $0x5] sm:$0xff] %vm1674_vm5, %v9264_v46  ;;  %v1671_v49 = vadd.f32 %v1668_v47, %v1398_v33  ;;  %v7335_v47 = vld [vmem:[%s11254_s28] ss:$0 sm:$0xff]  ;;  %s11210_s28 = smov 96  }
 0x130   : > { %1680 = vst.msk [vmem:[#allocation2 + $0x16] sm:$0x7] %vm1679_vm7, %v1671_v49 }
 0x135   : > { %v1683_v50 = vld [vmem:[#allocation2] sm:$0xff]  ;;  %v1684_v51 = vld [vmem:[#allocation2 + $0x8] sm:$0xff] }
 0x136   : > { %v1690_v52 = vsel %vm1674_vm5, %v1683_v50, 0.0  ;;  %v1693_v55 = vsel %vm1674_vm5, %v1684_v51, 0.0 }
 0x137   : > { %1691 = vadd.xlane.f32.xlu0 %v1690_v52  ;;  %v1686_v63 = vld [vmem:[#allocation2 + $0x18] sm:$0xff] }
 0x138   : > { %v1579_v54 = vpop.f32.mrf.mxu0  ;;  %v1699_v0 = vsel %vm1674_vm5, %v1686_v63, 0.0 }
 0x139   : > { %v1580_v56 = vadd.f32 %v1579_v54, %v1508_v53 }
 0x13a   : > { %v7897_v58 = vpop.f32.mrf.mxu0 }
 0x13b   : > { %v1583_v59 = vadd.f32 %v1580_v56, %v1305_v31  ;;  %1694 = vadd.xlane.f32.xlu0 %v1693_v55 }
 0x13d   : > { %1678 = vst.msk [vmem:[#allocation2 + $0x15] sm:$0x1] %vm1677_vm8, %v1583_v59 }
 0x13f   : > { %1703 = vadd.xlane.f32.xlu0 %v1702_v60 }
 0x144   : > { %v1685_v61 = vld [vmem:[#allocation2 + $0x10] sm:$0xff] }
 0x145   : > { %v1696_v62 = vsel %vm1674_vm5, %v1685_v61, 0.0 }
 0x146   : > { %1697 = vadd.xlane.f32.xlu1 %v1696_v62 }
 0x14a   : > { %1700 = vadd.xlane.f32.xlu1 %v1699_v0 }
 0x1c0   : > { %v1692_v1 = vpop.xlane.xlu0 %1691 }
 0x1c1   : > { %v1706_v2 = vmul.f32 0.03125, %v1692_v1 }
 0x1c3   : > { %v1711_v4 = vsub.f32 %v1683_v50, %v1706_v2 }
 0x1c4   : > { %v1695_v5 = vpop.xlane.xlu0 %1694 }
 0x1c5   : > { %v1707_v6 = vmul.f32 0.03125, %v1695_v5  ;;  %v1716_v7 = vmul.f32 %v1711_v4, %v1711_v4 }
 0x1c7   : > { %v1712_v8 = vsub.f32 %v1684_v51, %v1707_v6  ;;  %v1721_v9 = vsel %vm1674_vm5, %v1716_v7, 0.0 }
 0x1c8   : > { %1722 = vadd.xlane.f32.xlu1 %v1721_v9  ;;  %v1704_v11 = vpop.xlane.xlu0 %1703 }
 0x1c9   : > { %v1717_v10 = vmul.f32 %v1712_v8, %v1712_v8  ;;  %v1710_v13 = vmul.f32 0.03125, %v1704_v11 }
 0x1cb   : > { %v1724_v12 = vsel %vm1674_vm5, %v1717_v10, 0.0  ;;  %v1715_v16 = vsub.f32 %v1687_v57, %v1710_v13 }
 0x1cc   : > { %1725 = vadd.xlane.f32.xlu0 %v1724_v12 }
 0x1cd   : > { %v1720_v21 = vmul.f32 %v1715_v16, %v1715_v16 }
 0x1cf   : > { %v1698_v14 = vpop.xlane.xlu1 %1697  ;;  %v1733_v24 = vsel %vm1677_vm8, %v1720_v21, 0.0 }
 0x1d0   : > { %v1708_v15 = vmul.f32 0.03125, %v1698_v14 }
 0x1d2   : > { %v1713_v17 = vsub.f32 %v1685_v61, %v1708_v15 }
 0x1d3   : > { %v1701_v18 = vpop.xlane.xlu1 %1700 }
 0x1d4   : > { %v1709_v19 = vmul.f32 0.03125, %v1701_v18  ;;  %v1718_v20 = vmul.f32 %v1713_v17, %v1713_v17 }
 0x1d6   : > { %v1714_v22 = vsub.f32 %v1686_v63, %v1709_v19  ;;  %v1727_v23 = vsel %vm1674_vm5, %v1718_v20, 0.0 }
 0x1d7   : > { %1728 = vadd.xlane.f32.xlu1 %v1727_v23 }
 0x1d8   : > { %v1719_v25 = vmul.f32 %v1714_v22, %v1714_v22 }
 0x1da   : > { %v1730_v26 = vsel %vm1674_vm5, %v1719_v25, 0.0 }
 0x1db   : > { %1734 = vadd.xlane.f32.xlu1 %v1733_v24  ;;  %1731 = vadd.xlane.f32.xlu0 %v1730_v26 }
 0x251   : > { %v1723_v27 = vpop.xlane.xlu1 %1722 }
 0x252   : > { %v1736_v30 = vmul.f32 0.03125, %v1723_v27 }
 0x254   : > { %v1741_v31 = vadd.f32 1e-05, %v1736_v30 }
 0x255   : > { %v1726_v32 = vpop.xlane.xlu0 %1725 }
 0x256   : > { %8661 = vrsqrt.f32 %v1741_v31  ;;  %v1737_v33 = vmul.f32 0.03125, %v1726_v32 }
 0x258   : > { %v1742_v34 = vadd.f32 1e-05, %v1737_v33 }
 0x25a   : > { %8663 = vrsqrt.f32 %v1742_v34 }
 0x260   : > { %v1729_v35 = vpop.xlane.xlu1 %1728 }
 0x261   : > { %v1738_v36 = vmul.f32 0.03125, %v1729_v35 }
 0x263   : > { %v8662_v37 = vpop.eup %8661  ;;  %v1743_v38 = vadd.f32 1e-05, %v1738_v36 }
 0x264   : > { %v1732_v40 = vpop.xlane.xlu0 %1731  ;;  %v1735_v41 = vpop.xlane.xlu1 %1734  ;;  %v1751_v42 = vmul.f32 %v8662_v37, %v1711_v4  ;;  %v1938_v37 = vld [vmem:[%s11260_s1 + $0x18] sm:$0xff] }
 0x265   : > { %8665 = vrsqrt.f32 %v1743_v38  ;;  %v1739_v44 = vmul.f32 0.03125, %v1732_v40  ;;  %v1740_v45 = vmul.f32 0.03125, %v1735_v41  ;;  %7904 = vmatpush3.msra.mxu1 %v1938_v37  ;;  %v1937_v38 = vld [vmem:[%s11260_s1 + $0x10] sm:$0xff]  ;;  %v1935_v40 = vld [vmem:[%s11260_s1] sm:$0xff] }
 0x266   : > { %v1762_v48 = vmul.f32 %v7334_v39, %v1751_v42  ;;  %7905 = vmatprep.subr.mxu1 %v11201_v3 }
 0x267   : > { %v8664_v49 = vpop.eup %8663  ;;  %v1744_v50 = vadd.f32 1e-05, %v1739_v44  ;;  %v1745_v51 = vadd.f32 1e-05, %v1740_v45  ;;  %7906 = vmatpush3.msra.mxu1 %v1937_v38 }
 0x268   : > { %v9282_v52 = vadd.f32 %v7335_v47, %v1762_v48  ;;  %v1752_v53 = vmul.f32 %v8664_v49, %v1712_v8  ;;  %7907 = vmatprep.subr.mxu1 %v11201_v3 }
 0x269   : > { %8667 = vrsqrt.f32 %v1744_v50 }
 0x26a   : > { %11255 = vst [vmem:[#allocation29_spill] sm:$0xff] %v9282_v52  ;;  %8669 = vrsqrt.f32 %v1745_v51  ;;  %v1848_v54 = vsel %vm1674_vm5, %v9282_v52, 0.0  ;;  %v1763_v55 = vmul.f32 %v7334_v39, %v1752_v53 }
 0x26b   : > { %1849 = vadd.xlane.f32.xlu0 %v1848_v54  ;;  %v7341_v54 = vld [vmem:[%s11261_s2] ss:$0 sm:$0xff]  ;;  %s11199_s2 = smov 100  }
 0x26c   : > { %v9286_v56 = vadd.f32 %v7335_v47, %v1763_v55 }
 0x26e   : > { %11256 = vst [vmem:[#allocation30_spill] sm:$0xff] %v9286_v56  ;;  %v1851_v57 = vsel %vm1674_vm5, %v9286_v56, 0.0 }
 0x26f   : > { %1852 = vadd.xlane.f32.xlu1 %v1851_v57 }
 0x272   : > { %v8666_v58 = vpop.eup %8665 }
 0x273   : > { %v1753_v59 = vmul.f32 %v8666_v58, %v1713_v17 }
 0x275   : > { %v1764_v60 = vmul.f32 %v7334_v39, %v1753_v59 }
 0x276   : > { %v8668_v61 = vpop.eup %8667 }
 0x277   : > { %v8670_v62 = vpop.eup %8669  ;;  %v9290_v63 = vadd.f32 %v7335_v47, %v1764_v60  ;;  %v1754_v0 = vmul.f32 %v8668_v61, %v1714_v22  ;;  %v7342_v60 = vld [vmem:[%s11262_s0] ss:$0 sm:$0xff]  ;;  %s11212_s0 = smov 104  }
 0x278   : > { %v1755_v1 = vmul.f32 %v8670_v62, %v1715_v16 }
 0x279   : > { %11257 = vst [vmem:[#allocation31_spill] sm:$0xff] %v9290_v63  ;;  %v1854_v2 = vsel %vm1674_vm5, %v9290_v63, 0.0  ;;  %v1765_v4 = vmul.f32 %v7334_v39, %v1754_v0 }
 0x27a   : > { %1855 = vadd.xlane.f32.xlu0 %v1854_v2  ;;  %v1766_v5 = vmul.f32 %v7334_v39, %v1755_v1  ;;  %v1936_v39 = vld [vmem:[%s11260_s1 + $0x8] sm:$0xff]  ;;  %s11336_s1 = smov 20  }
 0x27b   : > { %v9294_v6 = vadd.f32 %v7335_v47, %v1765_v4  ;;  %7908 = vmatpush3.msra.mxu1 %v1936_v39 }
 0x27c   : > { %v9296_v7 = vadd.f32 %v7335_v47, %v1766_v5  ;;  %7909 = vmatprep.subr.mxu1 %v11201_v3 }
 0x27d   : > { %11258 = vst [vmem:[#allocation32_spill] sm:$0xff] %v9294_v6  ;;  %v1857_v8 = vsel %vm1674_vm5, %v9294_v6, 0.0  ;;  %7910 = vmatpush3.msra.mxu1 %v1935_v40  ;;  %v8952_v40 = vmov 0  }
 0x27e   : > { %11259 = vst [vmem:[#allocation33_spill] sm:$0xff] %v9296_v7  ;;  %1858 = vadd.xlane.f32.xlu1 %v1857_v8  ;;  %v1860_v9 = vsel %vm1677_vm8, %v9296_v7, 0.0  ;;  %7926 = vmatprep.subr.mxu1 %v11201_v3 }
 0x27f   : > { %1861 = vadd.xlane.f32.xlu0 %v1860_v9  ;;  %8659 = vset.pattern.permute.xlu1 %v8952_v40 }
 0x280   : > { %8660 = vset.pattern.permute.xlu0 %v8952_v40 }
 0x2f4   : > { %v1850_v10 = vpop.xlane.xlu0 %1849 }
 0x2f5   : > { %v1863_v11 = vmul.f32 0.03125, %v1850_v10 }
 0x2f7   : > { %v1868_v12 = vsub.f32 %v9282_v52, %v1863_v11 }
 0x2f8   : > { %v1853_v13 = vpop.xlane.xlu1 %1852 }
 0x2f9   : > { %v1864_v14 = vmul.f32 0.03125, %v1853_v13  ;;  %v1873_v15 = vmul.f32 %v1868_v12, %v1868_v12 }
 0x2fb   : > { %v1869_v16 = vsub.f32 %v9286_v56, %v1864_v14  ;;  %v1878_v17 = vsel %vm1674_vm5, %v1873_v15, 0.0 }
 0x2fc   : > { %1879 = vadd.xlane.f32.xlu1 %v1878_v17 }
 0x2fd   : > { %v1874_v18 = vmul.f32 %v1869_v16, %v1869_v16 }
 0x2ff   : > { %v1881_v19 = vsel %vm1674_vm5, %v1874_v18, 0.0 }
 0x300   : > { %1882 = vadd.xlane.f32.xlu0 %v1881_v19 }
 0x303   : > { %v1856_v20 = vpop.xlane.xlu0 %1855 }
 0x304   : > { %v1865_v21 = vmul.f32 0.03125, %v1856_v20 }
 0x306   : > { %v9307_v22 = vsub.f32 %v9290_v63, %v1865_v21 }
 0x307   : > { %v1859_v23 = vpop.xlane.xlu1 %1858 }
 0x308   : > { %v1862_v24 = vpop.xlane.xlu0 %1861  ;;  %v1866_v25 = vmul.f32 0.03125, %v1859_v23  ;;  %v1875_v26 = vmul.f32 %v9307_v22, %v9307_v22 }
 0x309   : > { %v1867_v27 = vmul.f32 0.03125, %v1862_v24 }
 0x30a   : > { %v1871_v30 = vsub.f32 %v9294_v6, %v1866_v25  ;;  %v1884_v31 = vsel %vm1674_vm5, %v1875_v26, 0.0 }
 0x30b   : > { %v1872_v32 = vsub.f32 %v9296_v7, %v1867_v27  ;;  %1885 = vadd.xlane.f32.xlu1 %v1884_v31 }
 0x30c   : > { %v1876_v33 = vmul.f32 %v1871_v30, %v1871_v30 }
 0x30d   : > { %v1877_v34 = vmul.f32 %v1872_v32, %v1872_v32 }
 0x30e   : > { %v1887_v35 = vsel %vm1674_vm5, %v1876_v33, 0.0 }
 0x30f   : > { %v1890_v36 = vsel %vm1677_vm8, %v1877_v34, 0.0  ;;  %1888 = vadd.xlane.f32.xlu0 %v1887_v35 }
 0x310   : > { %1891 = vadd.xlane.f32.xlu1 %v1890_v36 }
 0x385   : > { %v1880_v41 = vpop.xlane.xlu1 %1879 }
 0x386   : > { %v1893_v42 = vmul.f32 0.03125, %v1880_v41 }
 0x388   : > { %v1898_v44 = vadd.f32 1e-05, %v1893_v42 }
 0x389   : > { %v1883_v45 = vpop.xlane.xlu0 %1882 }
 0x38a   : > { %8671 = vrsqrt.f32 %v1898_v44  ;;  %v1894_v47 = vmul.f32 0.03125, %v1883_v45 }
 0x38c   : > { %v1899_v48 = vadd.f32 1e-05, %v1894_v47 }
 0x38e   : > { %8673 = vrsqrt.f32 %v1899_v48 }
 0x394   : > { %v1886_v49 = vpop.xlane.xlu1 %1885 }
 0x395   : > { %v1895_v50 = vmul.f32 0.03125, %v1886_v49 }
 0x397   : > { %v8672_v51 = vpop.eup %8671  ;;  %v1900_v53 = vadd.f32 1e-05, %v1895_v50 }
 0x398   : > { %v1889_v55 = vpop.xlane.xlu0 %1888  ;;  %v1908_v57 = vmul.f32 %v8672_v51, %v1868_v12 }
 0x399   : > { %8675 = vrsqrt.f32 %v1900_v53  ;;  %v1896_v58 = vmul.f32 0.03125, %v1889_v55  ;;  %v1892_v59 = vpop.xlane.xlu1 %1891 }
 0x39a   : > { %v1897_v61 = vmul.f32 0.03125, %v1892_v59  ;;  %v1919_v62 = vmul.f32 %v7341_v54, %v1908_v57 }
 0x39b   : > { %v8674_v0 = vpop.eup %8673  ;;  %v1901_v1 = vadd.f32 1e-05, %v1896_v58 }
 0x39c   : > { %v1902_v2 = vadd.f32 1e-05, %v1897_v61  ;;  %v1930_v4 = vadd.f32 %v7342_v60, %v1919_v62  ;;  %v1909_v5 = vmul.f32 %v8674_v0, %v1869_v16 }
 0x39d   : > { %8677 = vrsqrt.f32 %v1901_v1 }
 0x39e   : > { %8679 = vrsqrt.f32 %v1902_v2  ;;  %7912 = vmatmul.mubr.msk.f32.vlgmr.msra.gmra.mxu1 %vm1674_vm5, %v1930_v4  ;;  %v1920_v8 = vmul.f32 %v7341_v54, %v1909_v5 }
 0x39f   : > { %7914 = vmatprep.mubr.msk.f32.mxu1 %vm8943_vm1, %v11201_v3 }
 0x3a0   : > { %v1931_v9 = vadd.f32 %v7342_v60, %v1920_v8 }
 0x3a2   : > { %7915 = vmatmul.mubr.msk.f32.gmra.mxu1 %vm1674_vm5, %v1931_v9 }
 0x3a3   : > { %7917 = vmatprep.mubr.msk.f32.mxu1 %vm8943_vm1, %v11201_v3 }
 0x3a6   : > { %v8676_v10 = vpop.eup %8675 }
 0x3a7   : > { %v1910_v11 = vmul.f32 %v8676_v10, %v9307_v22  ;;  %v7343_v22 = vld [vmem:[%s11263_s15] ss:$0 sm:$0xff]  ;;  %s11264_s15 = sld [smem:[#allocation3_spill]] }
 0x3a9   : > { %v1921_v12 = vmul.f32 %v7341_v54, %v1910_v11 }
 0x3aa   : > { %v8678_v13 = vpop.eup %8677 }
 0x3ab   : > { %v8680_v14 = vpop.eup %8679  ;;  %v1932_v15 = vadd.f32 %v7342_v60, %v1921_v12  ;;  %v1911_v16 = vmul.f32 %v8678_v13, %v1871_v30 }
 0x3ac   : > { %v1912_v17 = vmul.f32 %v8680_v14, %v1872_v32 }
 0x3ad   : > { %7918 = vmatmul.mubr.msk.f32.gmra.mxu1 %vm1674_vm5, %v1932_v15  ;;  %v1922_v18 = vmul.f32 %v7341_v54, %v1911_v16 }
 0x3ae   : > { %7920 = vmatprep.mubr.msk.f32.mxu1 %vm8943_vm1, %v11201_v3  ;;  %v1923_v20 = vmul.f32 %v7341_v54, %v1912_v17 }
 0x3af   : > { %v1933_v19 = vadd.f32 %v7342_v60, %v1922_v18 }
 0x3b0   : > { %v1934_v21 = vadd.f32 %v7342_v60, %v1923_v20 }
 0x3b1   : > { %7921 = vmatmul.mubr.msk.f32.gmra.mxu1 %vm1674_vm5, %v1933_v19 }
 0x3b2   : > { %7923 = vmatprep.mubr.msk.f32.mxu1 %vm8943_vm1, %v11201_v3 }
 0x3b5   : > { %7924 = vmatmul.mubr.msk.f32.gmra.mxu1 %vm1674_vm5, %v1934_v21 }
 0x3b6   : > { %7936 = vmatprep.mubr.msk.f32.mxu1 %vm8943_vm1, %v11201_v3 }
 0x45e   : > { %v2027_v23 = vpop.f32.mrf.mxu1 }
 0x45f   : > { %v9343_v24 = vadd.f32 %v7343_v22, %v2027_v23 }
 0x460   : > { %v7913_v25 = vpop.f32.mrf.mxu1 }
 0x461   : > { %2056 = vrot.lane.b32.xlu0 %v9343_v24, %s8944_s16 }
 0x462   : > { %v2032_v26 = vpop.f32.mrf.mxu1 }
 0x463   : > { %v9347_v27 = vadd.f32 %v7343_v22, %v2032_v26 }
 0x464   : > { %v7916_v30 = vpop.f32.mrf.mxu1 }
 0x465   : > { %2058 = vrot.lane.b32.xlu1 %v9347_v27, %s8944_s16 }
 0x46d   : > { %v2037_v31 = vpop.f32.mrf.mxu1 }
 0x46e   : > { %v9351_v32 = vadd.f32 %v7343_v22, %v2037_v31 }
 0x46f   : > { %v7919_v33 = vpop.f32.mrf.mxu1 }
 0x470   : > { %2060 = vrot.lane.b32.xlu1 %v9351_v32, %s8944_s16 }
 0x471   : > { %v2042_v34 = vpop.f32.mrf.mxu1 }
 0x472   : > { %v9355_v35 = vadd.f32 %v7343_v22, %v2042_v34 }
 0x473   : > { %v7922_v36 = vpop.f32.mrf.mxu1 }
 0x474   : > { %2070 = vrot.lane.b32.xlu1 %v9351_v32, %s8945_s18  ;;  %2082 = vrot.lane.b32.xlu0 %v9355_v35, %s8946_s22 }
 0x475   : > { %v2047_v37 = vpop.f32.mrf.mxu1 }
 0x476   : > { %v9361_v38 = vadd.f32 %v7343_v22, %v2047_v37 }
 0x477   : > { %v7925_v39 = vpop.f32.mrf.mxu1 }
 0x478   : > { %2062 = vrot.lane.b32.xlu1 %v9355_v35, %s8944_s16  ;;  %2064 = vrot.lane.b32.xlu0 %v9361_v38, %s8944_s16 }
 0x47c   : > { %2072 = vrot.lane.b32.xlu1 %v9355_v35, %s8945_s18  ;;  %2080 = vrot.lane.b32.xlu0 %v9351_v32, %s8946_s22 }
 0x480   : > { %2068 = vrot.lane.b32.xlu1 %v9347_v27, %s8945_s18  ;;  %2078 = vrot.lane.b32.xlu0 %v9347_v27, %s8946_s22 }
 0x484   : > { %2066 = vrot.lane.b32.xlu1 %v9343_v24, %s8945_s18  ;;  %2076 = vrot.lane.b32.xlu0 %v9343_v24, %s8946_s22 }
 0x488   : > { %2092 = vrot.lane.b32.xlu1 %v9355_v35, %s11223_s23  ;;  %2102 = vrot.lane.b32.xlu0 %v9355_v35, %s11216_s26 }
 0x48c   : > { %2074 = vrot.lane.b32.xlu1 %v9361_v38, %s8945_s18  ;;  %2084 = vrot.lane.b32.xlu0 %v9361_v38, %s8946_s22 }
 0x490   : > { %2090 = vrot.lane.b32.xlu1 %v9351_v32, %s11223_s23  ;;  %2100 = vrot.lane.b32.xlu0 %v9351_v32, %s11216_s26 }
 0x494   : > { %2088 = vrot.lane.b32.xlu1 %v9347_v27, %s11223_s23  ;;  %2098 = vrot.lane.b32.xlu0 %v9347_v27, %s11216_s26 }
 0x498   : > { %2086 = vrot.lane.b32.xlu1 %v9343_v24, %s11223_s23  ;;  %2096 = vrot.lane.b32.xlu0 %v9343_v24, %s11216_s26 }
 0x49c   : > { %2132 = vrot.lane.b32.xlu1 %v9355_v35, %s11210_s28  ;;  %2122 = vrot.lane.b32.xlu0 %v9355_v35, %s11199_s2 }
 0x4a0   : > { %2094 = vrot.lane.b32.xlu1 %v9361_v38, %s11223_s23  ;;  %2104 = vrot.lane.b32.xlu0 %v9361_v38, %s11216_s26  ;;  %s11218_s26 = smov 28   ;;  %s11321_s23 = sld [smem:[#allocation19_spill]] }
 0x4a4   : > { %2112 = vrot.lane.b32.xlu1 %v9355_v35, %s11212_s0  ;;  %2120 = vrot.lane.b32.xlu0 %v9351_v32, %s11199_s2 }
 0x4a8   : > { %2130 = vrot.lane.b32.xlu1 %v9351_v32, %s11210_s28  ;;  %2124 = vrot.lane.b32.xlu0 %v9361_v38, %s11199_s2 }
 0x4ac   : > { %2110 = vrot.lane.b32.xlu1 %v9351_v32, %s11212_s0 }
 0x4b0   : > { %2134 = vrot.lane.b32.xlu1 %v9361_v38, %s11210_s28 }
 0x4b4   : > { %2114 = vrot.lane.b32.xlu1 %v9361_v38, %s11212_s0 }
 0x4b8   : > { %2128 = vrot.lane.b32.xlu1 %v9347_v27, %s11210_s28 }
 0x4bc   : > { %2108 = vrot.lane.b32.xlu1 %v9347_v27, %s11212_s0 }
 0x4c0   : > { %2126 = vrot.lane.b32.xlu1 %v9343_v24, %s11210_s28 }
 0x4c4   : > { %2106 = vrot.lane.b32.xlu1 %v9343_v24, %s11212_s0  ;;  %s11221_s0 = smov 16  }
 0x4d3   : > { %v9431_v42 = vpop.permute.xlu0 %2056 }
 0x4d7   : > { %v9429_v41 = vpop.permute.xlu1 %2058 }
 0x4e2   : > { %v9433_v44 = vpop.permute.xlu1 %2060 }
 0x4e3   : > { %2251 = vrot.lane.b32.xlu0 %v9433_v44, %s11210_s28 }
 0x4e6   : > { %v9437_v45 = vpop.permute.xlu0 %2082  ;;  %v9439_v47 = vpop.permute.xlu1 %2070 }
 0x4ea   : > { %v9441_v48 = vpop.permute.xlu0 %2064  ;;  %v9443_v49 = vpop.permute.xlu1 %2062 }
 0x4eb   : > { %2253 = vrot.lane.b32.xlu0 %v9443_v49, %s11210_s28 }
 0x4ee   : > { %v9447_v50 = vpop.permute.xlu0 %2080  ;;  %v9449_v51 = vpop.permute.xlu1 %2072 }
 0x4ef   : > { %2255 = vrot.lane.b32.xlu0 %v9441_v48, %s11210_s28 }
 0x4f2   : > { %v9453_v53 = vpop.permute.xlu0 %2078  ;;  %v9455_v54 = vpop.permute.xlu1 %2068 }
 0x4f3   : > { %2249 = vrot.lane.b32.xlu0 %v9429_v41, %s11210_s28 }
 0x4f6   : > { %v9459_v55 = vpop.permute.xlu0 %2076  ;;  %v9461_v57 = vpop.permute.xlu1 %2066 }
 0x4f7   : > { %2118 = vrot.lane.b32.xlu0 %v9347_v27, %s11199_s2 }
 0x4fa   : > { %v9465_v58 = vpop.permute.xlu0 %2102  ;;  %v9467_v59 = vpop.permute.xlu1 %2092 }
 0x4fb   : > { %2247 = vrot.lane.b32.xlu0 %v9431_v42, %s11210_s28 }
 0x4fe   : > { %v9471_v60 = vpop.permute.xlu0 %2084  ;;  %v9473_v61 = vpop.permute.xlu1 %2074 }
 0x4ff   : > { %2116 = vrot.lane.b32.xlu0 %v9343_v24, %s11199_s2  ;;  %2375 = vrot.lane.b32.xlu1 %v9473_v61, %s11210_s28  ;;  %s9572_s2 = scalar_lea.vmem %s11264_s15, %s8589_s11  ;;  %s8953_s11 = smov 64  }
 0x500   : > { %v1801_v23 = vld [vmem:[%s9572_s2] sm:$0xff]  ;;  %v1803_v25 = vld [vmem:[%s9572_s2 + $0x10] sm:$0xff]  ;;  %v1804_v26 = vld [vmem:[%s9572_s2 + $0x18] sm:$0xff]  ;;  %s11214_s15 = smov 8  }
 0x501   : > { %v1802_v40 = vld [vmem:[%s9572_s2 + $0x8] sm:$0xff] }
 0x502   : > { %v9479_v62 = vpop.permute.xlu0 %2100  ;;  %v9481_v0 = vpop.permute.xlu1 %2090 }
 0x503   : > { %2495 = vrot.lane.b32.xlu0 %v9471_v60, %s11210_s28  ;;  %2373 = vrot.lane.b32.xlu1 %v9449_v51, %s11210_s28 }
 0x506   : > { %v9487_v1 = vpop.permute.xlu0 %2098  ;;  %v9489_v2 = vpop.permute.xlu1 %2088 }
 0x507   : > { %2493 = vrot.lane.b32.xlu0 %v9437_v45, %s11210_s28  ;;  %2371 = vrot.lane.b32.xlu1 %v9439_v47, %s11210_s28 }
 0x50a   : > { %v9495_v4 = vpop.permute.xlu0 %2096  ;;  %v9497_v5 = vpop.permute.xlu1 %2086 }
 0x50b   : > { %2491 = vrot.lane.b32.xlu0 %v9447_v50, %s11210_s28  ;;  %2369 = vrot.lane.b32.xlu1 %v9455_v54, %s11210_s28 }
 0x50e   : > { %v2133_v8 = vpop.permute.xlu1 %2132  ;;  %v9507_v9 = vpop.permute.xlu0 %2122 }
 0x50f   : > { %2489 = vrot.lane.b32.xlu0 %v9453_v53, %s11210_s28  ;;  %2367 = vrot.lane.b32.xlu1 %v9461_v57, %s11210_s28 }
 0x512   : > { %v9509_v10 = vpop.permute.xlu1 %2094  ;;  %v9515_v11 = vpop.permute.xlu0 %2104 }
 0x513   : > { %2487 = vrot.lane.b32.xlu0 %v9459_v55, %s11210_s28  ;;  %2615 = vrot.lane.b32.xlu1 %v9509_v10, %s11210_s28 }
 0x516   : > { %v9517_v12 = vpop.permute.xlu1 %2112  ;;  %v9537_v16 = vpop.permute.xlu0 %2120 }
 0x517   : > { %2735 = vrot.lane.b32.xlu0 %v9515_v11, %s11210_s28  ;;  %2613 = vrot.lane.b32.xlu1 %v9467_v59, %s11210_s28 }
 0x51a   : > { %v2131_v13 = vpop.permute.xlu1 %2130  ;;  %v9549_v18 = vpop.permute.xlu0 %2124 }
 0x51b   : > { %2733 = vrot.lane.b32.xlu0 %v9465_v58, %s11210_s28  ;;  %2611 = vrot.lane.b32.xlu1 %v9481_v0, %s11210_s28 }
 0x51e   : > { %v9527_v14 = vpop.permute.xlu1 %2110 }
 0x51f   : > { %2731 = vrot.lane.b32.xlu0 %v9479_v62, %s11210_s28  ;;  %2609 = vrot.lane.b32.xlu1 %v9489_v2, %s11210_s28 }
 0x522   : > { %v2135_v15 = vpop.permute.xlu1 %2134 }
 0x523   : > { %2729 = vrot.lane.b32.xlu0 %v9487_v1, %s11210_s28  ;;  %2607 = vrot.lane.b32.xlu1 %v9497_v5, %s11210_s28 }
 0x524   : > { %7927 = vmatpush3.xpose.msk.msra.mxu1 %vm2136_vm9, %v2135_v15  ;;  %v1805_v15 = vld [vmem:[%s9572_s2 + $0x20] sm:$0x1]  ;;  %s11215_s2 = smov 4  }
 0x525   : > { %7928 = vmatprep.subr.mxu1 %v11201_v3 }
 0x526   : > { %v9541_v17 = vpop.permute.xlu1 %2114 }
 0x527   : > { %2727 = vrot.lane.b32.xlu0 %v9495_v4, %s11210_s28  ;;  %2855 = vrot.lane.b32.xlu1 %v9541_v17, %s11210_s28 }
 0x528   : > { %7929 = vmatpush3.xpose.msk.msra.mxu1 %vm2136_vm9, %v2133_v8 }
 0x529   : > { %7930 = vmatprep.subr.mxu1 %v11201_v3 }
 0x52a   : > { %v2129_v19 = vpop.permute.xlu1 %2128 }
 0x52b   : > { %2975 = vrot.lane.b32.xlu0 %v9549_v18, %s11210_s28  ;;  %2853 = vrot.lane.b32.xlu1 %v9517_v12, %s11210_s28 }
 0x52c   : > { %7931 = vmatpush3.xpose.msk.msra.mxu1 %vm2136_vm9, %v2131_v13 }
 0x52d   : > { %7932 = vmatprep.subr.mxu1 %v11201_v3 }
 0x52e   : > { %v9557_v20 = vpop.permute.xlu1 %2108 }
 0x52f   : > { %2973 = vrot.lane.b32.xlu0 %v9507_v9, %s11210_s28  ;;  %2851 = vrot.lane.b32.xlu1 %v9527_v14, %s11210_s28 }
 0x530   : > { %7933 = vmatpush3.xpose.msk.msra.mxu1 %vm2136_vm9, %v2129_v19 }
 0x531   : > { %7934 = vmatprep.subr.mxu1 %v11201_v3 }
 0x532   : > { %v2127_v21 = vpop.permute.xlu1 %2126 }
 0x533   : > { %2971 = vrot.lane.b32.xlu0 %v9537_v16, %s11210_s28  ;;  %2849 = vrot.lane.b32.xlu1 %v9557_v20, %s11210_s28 }
 0x534   : > { %7935 = vmatpush3.xpose.msk.msra.mxu1 %vm2136_vm9, %v2127_v21 }
 0x535   : > { %7976 = vmatprep.subr.mxu1 %v11201_v3 }
 0x536   : > { %v9575_v22 = vpop.permute.xlu1 %2106 }
 0x537   : > { %7937 = vmatmul.mubr.msk.f32.vlgmr.msra.gmra.mxu1 %vm2136_vm9, %v9343_v24  ;;  %2847 = vrot.lane.b32.xlu1 %v9575_v22, %s11210_s28 }
 0x538   : > { %7939 = vmatprep.mubr.msk.f32.mxu1 %vm8943_vm1, %v11201_v3 }
 0x53b   : > { %7940 = vmatmul.mubr.msk.f32.gmra.mxu1 %vm2136_vm9, %v9347_v27  ;;  %1808 = vperm.xlu1 %8659, %v1801_v23  }
 0x53c   : > { %7942 = vmatprep.mubr.msk.f32.mxu1 %vm8943_vm1, %v11201_v3 }
 0x53f   : > { %7943 = vmatmul.mubr.msk.f32.gmra.mxu1 %vm2136_vm9, %v9351_v32  ;;  %1818 = vperm.xlu1 %8659, %v1803_v25  }
 0x540   : > { %7945 = vmatprep.mubr.msk.f32.mxu1 %vm8943_vm1, %v11201_v3 }
 0x543   : > { %7946 = vmatmul.mubr.msk.f32.gmra.mxu1 %vm2136_vm9, %v9355_v35  ;;  %1823 = vperm.xlu1 %8659, %v1804_v26  }
 0x544   : > { %7948 = vmatprep.mubr.msk.f32.mxu1 %vm8943_vm1, %v11201_v3 }
 0x547   : > { %7949 = vmatmul.mubr.msk.f32.gmra.mxu1 %vm2136_vm9, %v9361_v38  ;;  %3617 = vrot.lane.b32.xlu1 %v9361_v38, %s8953_s11 }
 0x548   : > { %7986 = vmatprep.mubr.msk.f32.mxu1 %vm8943_vm1, %v11201_v3 }
 0x54b   : > { %3735 = vrot.lane.b32.xlu1 %v9433_v44, %s8953_s11 }
 0x54f   : > { %3731 = vrot.lane.b32.xlu1 %v9431_v42, %s8953_s11 }
 0x553   : > { %3858 = vrot.lane.b32.xlu1 %v9449_v51, %s8953_s11 }
 0x555   : > { %v2252_v30 = vpop.permute.xlu0 %2251 }
 0x557   : > { %3979 = vrot.lane.b32.xlu1 %v9437_v45, %s8953_s11 }
 0x55b   : > { %3856 = vrot.lane.b32.xlu1 %v9439_v47, %s8953_s11 }
 0x55d   : > { %v2254_v31 = vpop.permute.xlu0 %2253 }
 0x55f   : > { %3854 = vrot.lane.b32.xlu1 %v9455_v54, %s8953_s11 }
 0x561   : > { %v2256_v33 = vpop.permute.xlu0 %2255 }
 0x562   : > { %7952 = vmatpush3.xpose.msk.msra.mxu0 %vm2136_vm9, %v2256_v33 }
 0x563   : > { %3975 = vrot.lane.b32.xlu1 %v9453_v53, %s8953_s11  ;;  %7953 = vmatprep.subr.mxu0 %v11201_v3 }
 0x565   : > { %v2250_v34 = vpop.permute.xlu0 %2249 }
 0x566   : > { %7954 = vmatpush3.xpose.msk.msra.mxu0 %vm2136_vm9, %v2254_v31 }
 0x567   : > { %3852 = vrot.lane.b32.xlu1 %v9461_v57, %s8953_s11  ;;  %7955 = vmatprep.subr.mxu0 %v11201_v3 }
 0x569   : > { %v9624_v36 = vpop.permute.xlu0 %2118 }
 0x56a   : > { %7956 = vmatpush3.xpose.msk.msra.mxu0 %vm2136_vm9, %v2252_v30  ;;  %2969 = vrot.lane.b32.xlu0 %v9624_v36, %s11210_s28 }
 0x56b   : > { %4219 = vrot.lane.b32.xlu1 %v9479_v62, %s8953_s11  ;;  %7957 = vmatprep.subr.mxu0 %v11201_v3 }
 0x56d   : > { %v2248_v37 = vpop.permute.xlu0 %2247 }
 0x56e   : > { %7958 = vmatpush3.xpose.msk.msra.mxu0 %vm2136_vm9, %v2250_v34  ;;  %v8954_v34 = vmov -1e+09  }
 0x56f   : > { %4215 = vrot.lane.b32.xlu1 %v9495_v4, %s8953_s11  ;;  %7959 = vmatprep.subr.mxu0 %v11201_v3 }
 0x571   : > { %v9636_v38 = vpop.permute.xlu0 %2116  ;;  %v2376_v39 = vpop.permute.xlu1 %2375 }
 0x572   : > { %7960 = vmatpush3.xpose.msk.msra.mxu0 %vm2136_vm9, %v2248_v37  ;;  %2967 = vrot.lane.b32.xlu0 %v9636_v38, %s11210_s28  ;;  %s11306_s28 = sld [smem:[#allocation10_spill]] }
 0x573   : > { %7977 = vmatpush3.xpose.msk.msra.mxu1 %vm2136_vm9, %v2376_v39  ;;  %4340 = vrot.lane.b32.xlu1 %v9527_v14, %s8953_s11 }
 0x574   : > { %8001 = vmatprep.subr.mxu0 %v11201_v3  ;;  %7978 = vmatprep.subr.mxu1 %v11201_v3 }
 0x575   : > { %7962 = vmatmul.mubr.msk.f32.vlgmr.msra.gmra.mxu0 %vm2136_vm9, %v9431_v42  ;;  %v2496_v8 = vpop.permute.xlu0 %2495  ;;  %v2374_v13 = vpop.permute.xlu1 %2373 }
 0x576   : > { %1813 = vperm.xlu0 %8660, %v1802_v40   ;;  %8002 = vmatpush3.xpose.msk.msra.mxu0 %vm2136_vm9, %v2496_v8  ;;  %v1783_v40 = vadd.s32 32, %v9253_v29 }
 0x577   : > { %7979 = vmatpush3.xpose.msk.msra.mxu1 %vm2136_vm9, %v2374_v13  ;;  %3981 = vrot.lane.b32.xlu1 %v9471_v60, %s8953_s11 }
 0x578   : > { %7964 = vmatprep.mubr.msk.f32.mxu0 %vm8943_vm1, %v11201_v3  ;;  %8003 = vmatprep.subr.mxu0 %v11201_v3 }
 0x579   : > { %7965 = vmatmul.mubr.msk.f32.gmra.mxu0 %vm2136_vm9, %v9429_v41  ;;  %v2494_v42 = vpop.permute.xlu0 %2493  ;;  %7980 = vmatprep.subr.mxu1 %v11201_v3  ;;  %v2372_v19 = vpop.permute.xlu1 %2371 }
 0x57a   : > { %1828 = vperm.xlu0 %8660, %v1805_v15   ;;  %8004 = vmatpush3.xpose.msk.msra.mxu0 %vm2136_vm9, %v2494_v42 }
 0x57b   : > { %7981 = vmatpush3.xpose.msk.msra.mxu1 %vm2136_vm9, %v2372_v19  ;;  %4102 = vrot.lane.b32.xlu1 %v9509_v10, %s8953_s11 }
 0x57c   : > { %7967 = vmatprep.mubr.msk.f32.mxu0 %vm8943_vm1, %v11201_v3  ;;  %8005 = vmatprep.subr.mxu0 %v11201_v3 }
 0x57d   : > { %7968 = vmatmul.mubr.msk.f32.gmra.mxu0 %vm2136_vm9, %v9433_v44  ;;  %v2492_v21 = vpop.permute.xlu0 %2491  ;;  %7982 = vmatprep.subr.mxu1 %v11201_v3  ;;  %v2370_v23 = vpop.permute.xlu1 %2369 }
 0x57e   : > { %3615 = vrot.lane.b32.xlu0 %v9355_v35, %s8953_s11  ;;  %8006 = vmatpush3.xpose.msk.msra.mxu0 %vm2136_vm9, %v2492_v21 }
 0x57f   : > { %7983 = vmatpush3.xpose.msk.msra.mxu1 %vm2136_vm9, %v2370_v23  ;;  %4465 = vrot.lane.b32.xlu1 %v9549_v18, %s8953_s11 }
 0x580   : > { %7970 = vmatprep.mubr.msk.f32.mxu0 %vm8943_vm1, %v11201_v3  ;;  %8007 = vmatprep.subr.mxu0 %v11201_v3 }
 0x581   : > { %7971 = vmatmul.mubr.msk.f32.gmra.mxu0 %vm2136_vm9, %v9443_v49  ;;  %v2490_v44 = vpop.permute.xlu0 %2489  ;;  %7984 = vmatprep.subr.mxu1 %v11201_v3  ;;  %v2368_v25 = vpop.permute.xlu1 %2367 }
 0x582   : > { %3737 = vrot.lane.b32.xlu0 %v9443_v49, %s8953_s11  ;;  %8008 = vmatpush3.xpose.msk.msra.mxu0 %vm2136_vm9, %v2490_v44 }
 0x583   : > { %7985 = vmatpush3.xpose.msk.msra.mxu1 %vm2136_vm9, %v2368_v25  ;;  %7973 = vmatprep.mubr.msk.f32.mxu0 %vm8943_vm1, %v11201_v3 }
 0x584   : > { %8009 = vmatprep.subr.mxu0 %v11201_v3  ;;  %8026 = vmatprep.subr.mxu1 %v11201_v3 }
 0x585   : > { %7974 = vmatmul.mubr.msk.f32.gmra.mxu0 %vm2136_vm9, %v9441_v48  ;;  %v2488_v35 = vpop.permute.xlu0 %2487  ;;  %v2616_v26 = vpop.permute.xlu1 %2615 }
 0x586   : > { %7987 = vmatmul.mubr.msk.f32.vlgmr.msra.gmra.mxu1 %vm2136_vm9, %v9461_v57  ;;  %3613 = vrot.lane.b32.xlu0 %v9351_v32, %s8953_s11 }
 0x587   : > { %8010 = vmatpush3.xpose.msk.msra.mxu0 %vm2136_vm9, %v2488_v35  ;;  %8027 = vmatpush3.xpose.msk.msra.mxu1 %vm2136_vm9, %v2616_v26 }
 0x588   : > { %7989 = vmatprep.mubr.msk.f32.mxu1 %vm8943_vm1, %v11201_v3  ;;  %8011 = vmatprep.mubr.msk.f32.mxu0 %vm8943_vm1, %v11201_v3 }
 0x589   : > { %8051 = vmatprep.subr.mxu0 %v11201_v3  ;;  %v2736_v49 = vpop.permute.xlu0 %2735  ;;  %8028 = vmatprep.subr.mxu1 %v11201_v3  ;;  %v2614_v30 = vpop.permute.xlu1 %2613 }
 0x58a   : > { %8012 = vmatmul.mubr.msk.f32.vlgmr.msra.gmra.mxu0 %vm2136_vm9, %v9459_v55  ;;  %7990 = vmatmul.mubr.msk.f32.gmra.mxu1 %vm2136_vm9, %v9455_v54 }
 0x58b   : > { %3611 = vrot.lane.b32.xlu0 %v9347_v27, %s8953_s11  ;;  %8029 = vmatpush3.xpose.msk.msra.mxu1 %vm2136_vm9, %v2614_v30 }
 0x58c   : > { %8052 = vmatpush3.xpose.msk.msra.mxu0 %vm2136_vm9, %v2736_v49  ;;  %7992 = vmatprep.mubr.msk.f32.mxu1 %vm8943_vm1, %v11201_v3 }
 0x58d   : > { %8014 = vmatprep.mubr.msk.f32.mxu0 %vm8943_vm1, %v11201_v3  ;;  %8053 = vmatprep.subr.mxu0 %v11201_v3  ;;  %v2734_v32 = vpop.permute.xlu0 %2733  ;;  %v2612_v57 = vpop.permute.xlu1 %2611 }
 0x58e   : > { %8015 = vmatmul.mubr.msk.f32.gmra.mxu0 %vm2136_vm9, %v9453_v53  ;;  %7993 = vmatmul.mubr.msk.f32.gmra.mxu1 %vm2136_vm9, %v9439_v47 }
 0x58f   : > { %8030 = vmatprep.subr.mxu1 %v11201_v3  ;;  %3733 = vrot.lane.b32.xlu0 %v9429_v41, %s8953_s11 }
 0x590   : > { %8031 = vmatpush3.xpose.msk.msra.mxu1 %vm2136_vm9, %v2612_v57  ;;  %8054 = vmatpush3.xpose.msk.msra.mxu0 %vm2136_vm9, %v2734_v32 }
 0x591   : > { %7995 = vmatprep.mubr.msk.f32.mxu1 %vm8943_vm1, %v11201_v3  ;;  %8017 = vmatprep.mubr.msk.f32.mxu0 %vm8943_vm1, %v11201_v3  ;;  %v2732_v27 = vpop.permute.xlu0 %2731  ;;  %v2610_v53 = vpop.permute.xlu1 %2609 }
 0x592   : > { %8018 = vmatmul.mubr.msk.f32.gmra.mxu0 %vm2136_vm9, %v9447_v50  ;;  %8055 = vmatprep.subr.mxu0 %v11201_v3 }
 0x593   : > { %7996 = vmatmul.mubr.msk.f32.gmra.mxu1 %vm2136_vm9, %v9449_v51  ;;  %8032 = vmatprep.subr.mxu1 %v11201_v3 }
 0x594   : > { %3609 = vrot.lane.b32.xlu0 %v9343_v24, %s8953_s11  ;;  %8033 = vmatpush3.xpose.msk.msra.mxu1 %vm2136_vm9, %v2610_v53 }
 0x595   : > { %8056 = vmatpush3.xpose.msk.msra.mxu0 %vm2136_vm9, %v2732_v27  ;;  %7998 = vmatprep.mubr.msk.f32.mxu1 %vm8943_vm1, %v11201_v3  ;;  %v2730_v41 = vpop.permute.xlu0 %2729  ;;  %v2608_v47 = vpop.permute.xlu1 %2607 }
 0x596   : > { %8020 = vmatprep.mubr.msk.f32.mxu0 %vm8943_vm1, %v11201_v3  ;;  %8057 = vmatprep.subr.mxu0 %v11201_v3 }
 0x597   : > { %8021 = vmatmul.mubr.msk.f32.gmra.mxu0 %vm2136_vm9, %v9437_v45  ;;  %7999 = vmatmul.mubr.msk.f32.gmra.mxu1 %vm2136_vm9, %v9473_v61 }
 0x598   : > { %8034 = vmatprep.subr.mxu1 %v11201_v3  ;;  %3977 = vrot.lane.b32.xlu0 %v9447_v50, %s8953_s11 }
 0x599   : > { %8035 = vmatpush3.xpose.msk.msra.mxu1 %vm2136_vm9, %v2608_v47  ;;  %8058 = vmatpush3.xpose.msk.msra.mxu0 %vm2136_vm9, %v2730_v41  ;;  %v2728_v24 = vpop.permute.xlu0 %2727  ;;  %v2856_v51 = vpop.permute.xlu1 %2855 }
 0x59a   : > { %8023 = vmatprep.mubr.msk.f32.mxu0 %vm8943_vm1, %v11201_v3  ;;  %8036 = vmatprep.mubr.msk.f32.mxu1 %vm8943_vm1, %v11201_v3 }
 0x59b   : > { %8024 = vmatmul.mubr.msk.f32.gmra.mxu0 %vm2136_vm9, %v9471_v60  ;;  %8059 = vmatprep.subr.mxu0 %v11201_v3 }
 0x59c   : > { %8037 = vmatmul.mubr.msk.f32.vlgmr.msra.gmra.mxu1 %vm2136_vm9, %v9497_v5  ;;  %8076 = vmatprep.subr.mxu1 %v11201_v3 }
 0x59d   : > { %3973 = vrot.lane.b32.xlu0 %v9459_v55, %s8953_s11  ;;  %8060 = vmatpush3.xpose.msk.msra.mxu0 %vm2136_vm9, %v2728_v24  ;;  %v2976_v45 = vpop.permute.xlu0 %2975  ;;  %v2854_v50 = vpop.permute.xlu1 %2853 }
 0x59e   : > { %8077 = vmatpush3.xpose.msk.msra.mxu1 %vm2136_vm9, %v2856_v51  ;;  %8039 = vmatprep.mubr.msk.f32.mxu1 %vm8943_vm1, %v11201_v3 }
 0x59f   : > { %8061 = vmatprep.mubr.msk.f32.mxu0 %vm8943_vm1, %v11201_v3  ;;  %8101 = vmatprep.subr.mxu0 %v11201_v3 }
 0x5a0   : > { %8062 = vmatmul.mubr.msk.f32.vlgmr.msra.gmra.mxu0 %vm2136_vm9, %v9495_v4  ;;  %8040 = vmatmul.mubr.msk.f32.gmra.mxu1 %vm2136_vm9, %v9489_v2 }
 0x5a1   : > { %8078 = vmatprep.subr.mxu1 %v11201_v3  ;;  %8102 = vmatpush3.xpose.msk.msra.mxu0 %vm2136_vm9, %v2976_v45  ;;  %v2974_v54 = vpop.permute.xlu0 %2973  ;;  %v2852_v55 = vpop.permute.xlu1 %2851 }
 0x5a2   : > { %4100 = vrot.lane.b32.xlu0 %v9467_v59, %s8953_s11  ;;  %8079 = vmatpush3.xpose.msk.msra.mxu1 %vm2136_vm9, %v2854_v50 }
 0x5a3   : > { %8042 = vmatprep.mubr.msk.f32.mxu1 %vm8943_vm1, %v11201_v3  ;;  %8064 = vmatprep.mubr.msk.f32.mxu0 %vm8943_vm1, %v11201_v3 }
 0x5a4   : > { %8065 = vmatmul.mubr.msk.f32.gmra.mxu0 %vm2136_vm9, %v9487_v1  ;;  %8103 = vmatprep.subr.mxu0 %v11201_v3 }
 0x5a5   : > { %8043 = vmatmul.mubr.msk.f32.gmra.mxu1 %vm2136_vm9, %v9481_v0  ;;  %8080 = vmatprep.subr.mxu1 %v11201_v3  ;;  %v2850_v60 = vpop.permute.xlu1 %2849  ;;  %v2972_v4 = vpop.permute.xlu0 %2971 }
 0x5a6   : > { %8104 = vmatpush3.xpose.msk.msra.mxu0 %vm2136_vm9, %v2974_v54  ;;  %4221 = vrot.lane.b32.xlu0 %v9465_v58, %s8953_s11 }
 0x5a7   : > { %8081 = vmatpush3.xpose.msk.msra.mxu1 %vm2136_vm9, %v2852_v55  ;;  %8045 = vmatprep.mubr.msk.f32.mxu1 %vm8943_vm1, %v11201_v3 }
 0x5a8   : > { %8067 = vmatprep.mubr.msk.f32.mxu0 %vm8943_vm1, %v11201_v3  ;;  %8105 = vmatprep.subr.mxu0 %v11201_v3 }
 0x5a9   : > { %8068 = vmatmul.mubr.msk.f32.gmra.mxu0 %vm2136_vm9, %v9479_v62  ;;  %8046 = vmatmul.mubr.msk.f32.gmra.mxu1 %vm2136_vm9, %v9467_v59  ;;  %v2848_v31 = vpop.permute.xlu1 %2847 }
 0x5aa   : > { %8082 = vmatprep.subr.mxu1 %v11201_v3  ;;  %8106 = vmatpush3.xpose.msk.msra.mxu0 %vm2136_vm9, %v2972_v4 }
 0x5ab   : > { %4098 = vrot.lane.b32.xlu0 %v9481_v0, %s8953_s11  ;;  %8083 = vmatpush3.xpose.msk.msra.mxu1 %vm2136_vm9, %v2850_v60 }
 0x5ac   : > { %8048 = vmatprep.mubr.msk.f32.mxu1 %vm8943_vm1, %v11201_v3  ;;  %8070 = vmatprep.mubr.msk.f32.mxu0 %vm8943_vm1, %v11201_v3 }
 0x5ad   : > { %8049 = vmatmul.mubr.msk.f32.gmra.mxu1 %vm2136_vm9, %v9509_v10  ;;  %8071 = vmatmul.mubr.msk.f32.gmra.mxu0 %vm2136_vm9, %v9465_v58  ;;  %v1781_v10 = vadd.s32 16, %v9253_v29 }
 0x5ae   : > { %8084 = vmatprep.subr.mxu1 %v11201_v3  ;;  %8073 = vmatprep.mubr.msk.f32.mxu0 %vm8943_vm1, %v11201_v3 }
 0x5af   : > { %4096 = vrot.lane.b32.xlu0 %v9489_v2, %s8953_s11  ;;  %8085 = vmatpush3.xpose.msk.msra.mxu1 %vm2136_vm9, %v2848_v31 }
 0x5b0   : > { %8086 = vmatprep.mubr.msk.f32.mxu1 %vm8943_vm1, %v11201_v3  ;;  %8126 = vmatprep.subr.mxu1 %v11201_v3 }
 0x5b1   : > { %8074 = vmatmul.mubr.msk.f32.gmra.mxu0 %vm2136_vm9, %v9515_v11  ;;  %8107 = vmatprep.subr.mxu0 %v11201_v3 }
 0x5b2   : > { %8087 = vmatmul.mubr.msk.f32.vlgmr.msra.gmra.mxu1 %vm2136_vm9, %v9575_v22  ;;  %8111 = vmatprep.mubr.msk.f32.mxu0 %vm8943_vm1, %v11201_v3 }
 0x5b3   : > { %4217 = vrot.lane.b32.xlu0 %v9487_v1, %s8953_s11  ;;  %8089 = vmatprep.mubr.msk.f32.mxu1 %vm8943_vm1, %v11201_v3 }
 0x5b6   : > { %8090 = vmatmul.mubr.msk.f32.gmra.mxu1 %vm2136_vm9, %v9557_v20  ;;  %v1809_v58 = vpop.permute.xlu1 %1808 }
 0x5b7   : > { %4094 = vrot.lane.b32.xlu0 %v9497_v5, %s8953_s11  ;;  %8092 = vmatprep.mubr.msk.f32.mxu1 %vm8943_vm1, %v11201_v3  ;;  %v1785_v5 = vand.u32 127, %v1395_v28 }
 0x5b9   : > { %vm1786_vm11 = vcmp.ge.s32.totalorder %v9253_v29, %v1785_v5  ;;  %vm1788_vm14 = vcmp.ge.s32.totalorder %v1781_v10, %v1785_v5  ;;  %vm1790_vm6 = vcmp.ge.s32.totalorder %v1783_v40, %v1785_v5 }
 0x5ba   : > { %8093 = vmatmul.mubr.msk.f32.gmra.mxu1 %vm2136_vm9, %v9527_v14  ;;  %v1819_v59 = vpop.permute.xlu1 %1818  ;;  %v1782_v14 = vadd.s32 24, %v9253_v29  ;;  %v7338_v37 = vsel %vm1788_vm14, 1.0, %v11201_v3  ;;  %v7340_v49 = vsel %vm1790_vm6, 1.0, %v11201_v3  ;;  %vm4729_vm14 = vcmask 97280  }
 0x5bb   : > { %4342 = vrot.lane.b32.xlu0 %v9517_v12, %s8953_s11  ;;  %8095 = vmatprep.mubr.msk.f32.mxu1 %vm8943_vm1, %v11201_v3  ;;  %v1833_v15 = vmul.f32 %v7338_v37, %v1819_v59  ;;  %vm4753_vm6 = vcmask 228352  }
 0x5bc   : > { %vm1789_vm15 = vcmp.ge.s32.totalorder %v1782_v14, %v1785_v5 }
 0x5bd   : > { %v7339_v19 = vsel %vm1789_vm15, 1.0, %v11201_v3  ;;  %vm1838_vm7 = vcmp.gt.f32.partialorder %v1833_v15, 0.0  ;;  %vm4735_vm15 = vcmask 130048  }
 0x5be   : > { %8096 = vmatmul.mubr.msk.f32.gmra.mxu1 %vm2136_vm9, %v9517_v12  ;;  %v9852_v62 = vpop.permute.xlu1 %1823  ;;  %v9927_v27 = vsel %vm1838_vm7, 0.0, %v8954_v34 }
 0x5bf   : > { %4463 = vrot.lane.b32.xlu0 %v9507_v9, %s8953_s11  ;;  %8098 = vmatprep.mubr.msk.f32.mxu1 %vm8943_vm1, %v11201_v3  ;;  %v1834_v35 = vmul.f32 %v7339_v19, %v9852_v62 }
 0x5c2   : > { %8099 = vmatmul.mubr.msk.f32.gmra.mxu1 %vm2136_vm9, %v9541_v17  ;;  %v3618_v0 = vpop.permute.xlu1 %3617 }
 0x5c3   : > { %4461 = vrot.lane.b32.xlu0 %v9537_v16, %s8953_s11  ;;  %8127 = vmatpush3.msk.msra.mxu1 %vm3638_vm10, %v3618_v0 }
 0x5c4   : > { %8128 = vmatprep.subr.mxu1 %v11201_v3  ;;  %8136 = vmatprep.mubr.msk.f32.mxu1 %vm8943_vm1, %v11201_v3 }
 0x5c6   : > { %v3736_v37 = vpop.permute.xlu1 %3735 }
 0x5c7   : > { %3739 = vrot.lane.b32.xlu0 %v9441_v48, %s8953_s11  ;;  %v1780_v48 = vadd.s32 8, %v9253_v29 }
 0x5c9   : > { %vm1787_vm12 = vcmp.ge.s32.totalorder %v1780_v48, %v1785_v5 }
 0x5cb   : > { %3860 = vrot.lane.b32.xlu0 %v9473_v61, %s8953_s11  ;;  %v7336_v61 = vsel %vm1786_vm11, 1.0, %v11201_v3  ;;  %vm1839_vm11 = vcmp.gt.f32.partialorder %v1834_v35, 0.0 }
 0x5cc   : > { %v1831_v28 = vmul.f32 %v7336_v61, %v1809_v58  ;;  %v9935_v54 = vsel %vm1839_vm11, 0.0, %v8954_v34 }
 0x5ce   : > { %vm1836_vm13 = vcmp.gt.f32.partialorder %v1831_v28, 0.0 }
 0x5cf   : > { %4223 = vrot.lane.b32.xlu0 %v9515_v11, %s8953_s11  ;;  %v7337_v11 = vsel %vm1787_vm12, 1.0, %v11201_v3 }
 0x5d3   : > { %4344 = vrot.lane.b32.xlu0 %v9541_v17, %s8953_s11 }
 0x5dc   : > { %v2970_v1 = vpop.permute.xlu0 %2969 }
 0x5dd   : > { %8108 = vmatpush3.xpose.msk.msra.mxu0 %vm2136_vm9, %v2970_v1 }
 0x5de   : > { %8109 = vmatprep.subr.mxu0 %v11201_v3 }
 0x5e4   : > { %v2968_v2 = vpop.permute.xlu0 %2967 }
 0x5e5   : > { %8110 = vmatpush3.xpose.msk.msra.mxu0 %vm2136_vm9, %v2968_v2 }
 0x5e6   : > { %8151 = vmatprep.subr.mxu0 %v11201_v3 }
 0x5e8   : > { %8112 = vmatmul.mubr.msk.f32.vlgmr.msra.gmra.mxu0 %vm2136_vm9, %v9636_v38 }
 0x5e9   : > { %8114 = vmatprep.mubr.msk.f32.mxu0 %vm8943_vm1, %v11201_v3 }
 0x5ec   : > { %8115 = vmatmul.mubr.msk.f32.gmra.mxu0 %vm2136_vm9, %v9624_v36 }
 0x5ed   : > { %8117 = vmatprep.mubr.msk.f32.mxu0 %vm8943_vm1, %v11201_v3 }
 0x5f0   : > { %8118 = vmatmul.mubr.msk.f32.gmra.mxu0 %vm2136_vm9, %v9537_v16  ;;  %v9901_v16 = vsel %vm1836_vm13, 0.0, %v8954_v34  ;;  %vm3180_vm13 = vcmask 262144  }
 0x5f1   : > { %v1814_v12 = vpop.permute.xlu0 %1813  ;;  %8120 = vmatprep.mubr.msk.f32.mxu0 %vm8943_vm1, %v11201_v3 }
 0x5f2   : > { %v1832_v17 = vmul.f32 %v7337_v11, %v1814_v12 }
 0x5f4   : > { %8121 = vmatmul.mubr.msk.f32.gmra.mxu0 %vm2136_vm9, %v9507_v9  ;;  %vm1837_vm0 = vcmp.gt.f32.partialorder %v1832_v17, 0.0 }
 0x5f5   : > { %v1829_v33 = vpop.permute.xlu0 %1828  ;;  %8123 = vmatprep.mubr.msk.f32.mxu0 %vm8943_vm1, %v11201_v3  ;;  %v9913_v21 = vsel %vm1837_vm0, 0.0, %v8954_v34  ;;  %vm4741_vm0 = vcmask 162816  }
 0x5f6   : > { %v1835_v47 = vmul.f32 %v7340_v49, %v1829_v33 }
 0x5f7   : > { %v2223_v39 = vpop.f32.mrf.mxu1 }
 0x5f8   : > { %v3087_v8 = vmul.f32 0.5, %v2223_v39  ;;  %8124 = vmatmul.mubr.msk.f32.gmra.mxu0 %vm2136_vm9, %v9549_v18  ;;  %vm1840_vm12 = vcmp.gt.f32.partialorder %v1835_v47, 0.0 }
 0x5f9   : > { %v7938_v13 = vpop.f32.mrf.mxu1  ;;  %v3616_v9 = vpop.permute.xlu0 %3615  ;;  %8161 = vmatprep.mubr.msk.f32.mxu0 %vm8943_vm1, %v11201_v3  ;;  %v9943_v62 = vsel %vm1840_vm12, 0.0, %v8954_v34 }
 0x5fa   : > { %v9910_v42 = vadd.f32 %v3087_v8, %v9901_v16  ;;  %8129 = vmatpush3.msra.mxu1 %v3616_v9  ;;  %v3732_v9 = vpop.permute.xlu1 %3731 }
 0x5fb   : > { %v2228_v29 = vpop.f32.mrf.mxu1  ;;  %8130 = vmatprep.subr.mxu1 %v11201_v3 }
 0x5fc   : > { %v3088_v18 = vmul.f32 0.5, %v2228_v29  ;;  %v3168_v23 = vsel %vm3167_vm4, %v9910_v42, -inf }
 0x5fd   : > { %v7941_v44 = vpop.f32.mrf.mxu1  ;;  %3169 = vmax.xlane.f32.xlu1 %v3168_v23  ;;  %v9918_v25 = vpop.permute.xlu0 %3737 }
 0x5fe   : > { %v9922_v26 = vadd.f32 %v3088_v18, %v9913_v21 }
 0x5ff   : > { %v2233_v30 = vpop.f32.mrf.mxu1 }
 0x600   : > { %v3089_v32 = vmul.f32 0.5, %v2233_v30  ;;  %v3171_v57 = vsel %vm3167_vm4, %v9922_v26, -inf }
 0x601   : > { %3172 = vmax.xlane.f32.xlu0 %v3171_v57  ;;  %v7944_v53 = vpop.f32.mrf.mxu1  ;;  %v3614_v41 = vpop.permute.xlu0 %3613 }
 0x602   : > { %v9930_v24 = vadd.f32 %v3089_v32, %v9927_v27  ;;  %8131 = vmatpush3.msra.mxu1 %v3614_v41  ;;  %v9984_v53 = vpop.permute.xlu1 %3858 }
 0x603   : > { %v2238_v51 = vpop.f32.mrf.mxu1  ;;  %8132 = vmatprep.subr.mxu1 %v11201_v3 }
 0x604   : > { %v3090_v45 = vmul.f32 0.5, %v2238_v51  ;;  %v3174_v50 = vsel %vm3167_vm4, %v9930_v24, -inf }
 0x605   : > { %v7947_v55 = vpop.f32.mrf.mxu1  ;;  %3175 = vmax.xlane.f32.xlu1 %v3174_v50  ;;  %v3612_v60 = vpop.permute.xlu0 %3611 }
 0x606   : > { %v9938_v4 = vadd.f32 %v3090_v45, %v9935_v54  ;;  %8133 = vmatpush3.msra.mxu1 %v3612_v60 }
 0x607   : > { %v2243_v31 = vpop.f32.mrf.mxu1  ;;  %8134 = vmatprep.subr.mxu1 %v11201_v3 }
 0x608   : > { %v3091_v58 = vmul.f32 0.5, %v2243_v31  ;;  %v3177_v59 = vsel %vm3167_vm4, %v9938_v4, -inf  ;;  %v9998_v31 = vpop.permute.xlu1 %3979 }
 0x609   : > { %v7950_v0 = vpop.f32.mrf.mxu1  ;;  %3178 = vmax.xlane.f32.xlu1 %v3177_v59  ;;  %v3734_v1 = vpop.permute.xlu0 %3733  ;;  %11276 = vst [vmem:[#allocation45_spill] sm:$0xff] %v9998_v31 }
 0x60a   : > { %v9946_v2 = vadd.f32 %v3091_v58, %v9943_v62 }
 0x60c   : > { %v3181_v5 = vsel %vm3180_vm13, %v9946_v2, -inf }
 0x60d   : > { %3182 = vmax.xlane.f32.xlu1 %v3181_v5  ;;  %v3610_v48 = vpop.permute.xlu0 %3609 }
 0x60e   : > { %8135 = vmatpush3.msra.mxu1 %v3610_v48 }
 0x60f   : > { %8176 = vmatprep.subr.mxu1 %v11201_v3 }
 0x611   : > { %v9951_v61 = vpop.permute.xlu0 %3977 }
 0x612   : > { %11265 = vst [vmem:[#allocation34_spill] sm:$0xff] %v9951_v61 }
 0x615   : > { %v9953_v28 = vpop.permute.xlu0 %3973 }
 0x616   : > { %11266 = vst [vmem:[#allocation35_spill] sm:$0xff] %v9953_v28 }
 0x619   : > { %v9955_v10 = vpop.permute.xlu0 %4100 }
 0x61a   : > { %11267 = vst [vmem:[#allocation36_spill] sm:$0xff] %v9955_v10 }
 0x61d   : > { %v9957_v11 = vpop.permute.xlu0 %4221 }
 0x61e   : > { %11268 = vst [vmem:[#allocation37_spill] sm:$0xff] %v9957_v11 }
 0x621   : > { %v9959_v12 = vpop.permute.xlu0 %4098 }
 0x622   : > { %11269 = vst [vmem:[#allocation38_spill] sm:$0xff] %v9959_v12 }
 0x625   : > { %v9961_v14 = vpop.permute.xlu0 %4096 }
 0x626   : > { %11270 = vst [vmem:[#allocation39_spill] sm:$0xff] %v9961_v14 }
 0x629   : > { %v9963_v17 = vpop.permute.xlu0 %4217 }
 0x62a   : > { %11271 = vst [vmem:[#allocation40_spill] sm:$0xff] %v9963_v17 }
 0x62d   : > { %v9965_v33 = vpop.permute.xlu0 %4094 }
 0x62e   : > { %11272 = vst [vmem:[#allocation41_spill] sm:$0xff] %v9965_v33 }
 0x631   : > { %v9967_v34 = vpop.permute.xlu0 %4342 }
 0x632   : > { %11273 = vst [vmem:[#allocation42_spill] sm:$0xff] %v9967_v34 }
 0x635   : > { %v9969_v39 = vpop.permute.xlu0 %4463  ;;  %v2343_v40 = vpop.f32.mrf.mxu0 }
 0x636   : > { %11274 = vst [vmem:[#allocation43_spill] sm:$0xff] %v9969_v39  ;;  %v3092_v8 = vmul.f32 0.5, %v2343_v40 }
 0x637   : > { %v7963_v13 = vpop.f32.mrf.mxu0 }
 0x638   : > { %v9972_v15 = vadd.f32 %v3092_v8, %v9901_v16 }
 0x639   : > { %v9974_v19 = vpop.permute.xlu0 %4461  ;;  %v2348_v29 = vpop.f32.mrf.mxu0 }
 0x63a   : > { %11275 = vst [vmem:[#allocation44_spill] sm:$0xff] %v9974_v19  ;;  %v3093_v18 = vmul.f32 0.5, %v2348_v29  ;;  %v3184_v23 = vsel %vm3167_vm4, %v9972_v15, -inf  ;;  %v10012_v29 = vpop.permute.xlu1 %3856 }
 0x63b   : > { %3185 = vmax.xlane.f32.xlu0 %v3184_v23  ;;  %v7966_v44 = vpop.f32.mrf.mxu0 }
 0x63c   : > { %v9979_v35 = vadd.f32 %v3093_v18, %v9913_v21 }
 0x63d   : > { %v3740_v49 = vpop.permute.xlu0 %3739  ;;  %v2353_v30 = vpop.f32.mrf.mxu0 }
 0x63e   : > { %v3094_v32 = vmul.f32 0.5, %v2353_v30  ;;  %8152 = vmatpush3.msk.msra.mxu0 %vm3638_vm10, %v3740_v49  ;;  %v3187_v57 = vsel %vm3167_vm4, %v9979_v35, -inf }
 0x63f   : > { %8153 = vmatprep.subr.mxu0 %v11201_v3  ;;  %3188 = vmax.xlane.f32.xlu0 %v3187_v57  ;;  %v7969_v41 = vpop.f32.mrf.mxu0 }
 0x640   : > { %v9988_v47 = vadd.f32 %v3094_v32, %v9927_v27  ;;  %8154 = vmatpush3.msra.mxu0 %v9918_v25 }
 0x641   : > { %8155 = vmatprep.subr.mxu0 %v11201_v3  ;;  %v2358_v51 = vpop.f32.mrf.mxu0 }
 0x642   : > { %v3095_v45 = vmul.f32 0.5, %v2358_v51  ;;  %8156 = vmatpush3.msra.mxu0 %v3736_v37  ;;  %v3190_v50 = vsel %vm3167_vm4, %v9988_v47, -inf }
 0x643   : > { %8157 = vmatprep.subr.mxu0 %v11201_v3  ;;  %3191 = vmax.xlane.f32.xlu0 %v3190_v50  ;;  %v7972_v55 = vpop.f32.mrf.mxu0 }
 0x644   : > { %v9996_v60 = vadd.f32 %v3095_v45, %v9935_v54  ;;  %8158 = vmatpush3.msra.mxu0 %v3734_v1 }
 0x645   : > { %v2363_v58 = vpop.f32.mrf.mxu0  ;;  %8159 = vmatprep.subr.mxu0 %v11201_v3 }
 0x646   : > { %v3096_v25 = vmul.f32 0.5, %v2363_v58  ;;  %v2463_v59 = vpop.f32.mrf.mxu1  ;;  %8160 = vmatpush3.msra.mxu0 %v3732_v9  ;;  %v3193_v0 = vsel %vm3167_vm4, %v9996_v60, -inf }
 0x647   : > { %v3097_v5 = vmul.f32 0.5, %v2463_v59  ;;  %3194 = vmax.xlane.f32.xlu0 %v3193_v0  ;;  %v7975_v48 = vpop.f32.mrf.mxu0  ;;  %8201 = vmatprep.subr.mxu0 %v11201_v3 }
 0x648   : > { %v10005_v37 = vadd.f32 %v3096_v25, %v9943_v62  ;;  %v7988_v1 = vpop.f32.mrf.mxu1  ;;  %v10032_v48 = vpop.permute.xlu1 %3854 }
 0x649   : > { %v10008_v40 = vadd.f32 %v3097_v5, %v9901_v16 }
 0x64a   : > { %v2468_v8 = vpop.f32.mrf.mxu1  ;;  %v2583_v13 = vpop.f32.mrf.mxu0  ;;  %v3196_v9 = vsel %vm3180_vm13, %v10005_v37, -inf }
 0x64b   : > { %v3098_v18 = vmul.f32 0.5, %v2468_v8  ;;  %v3102_v23 = vmul.f32 0.5, %v2583_v13  ;;  %v3199_v44 = vsel %vm3167_vm4, %v10008_v40, -inf  ;;  %3197 = vmax.xlane.f32.xlu0 %v3196_v9 }
 0x64c   : > { %v7991_v49 = vpop.f32.mrf.mxu1  ;;  %3200 = vmax.xlane.f32.xlu1 %v3199_v44  ;;  %v8013_v30 = vpop.f32.mrf.mxu0 }
 0x64d   : > { %v10017_v32 = vadd.f32 %v3098_v18, %v9913_v21  ;;  %v10020_v57 = vadd.f32 %v3102_v23, %v9901_v16 }
 0x64e   : > { %v2473_v41 = vpop.f32.mrf.mxu1  ;;  %v2588_v51 = vpop.f32.mrf.mxu0 }
 0x64f   : > { %v3099_v45 = vmul.f32 0.5, %v2473_v41  ;;  %v3103_v50 = vmul.f32 0.5, %v2588_v51  ;;  %v3202_v55 = vsel %vm3167_vm4, %v10017_v32, -inf  ;;  %v3214_v58 = vsel %vm3167_vm4, %v10020_v57, -inf }
 0x650   : > { %v7994_v25 = vpop.f32.mrf.mxu1  ;;  %3203 = vmax.xlane.f32.xlu1 %v3202_v55  ;;  %3215 = vmax.xlane.f32.xlu0 %v3214_v58  ;;  %v8016_v59 = vpop.f32.mrf.mxu0 }
 0x651   : > { %v10027_v0 = vadd.f32 %v3099_v45, %v9927_v27  ;;  %v10030_v5 = vadd.f32 %v3103_v50, %v9913_v21  ;;  %v10046_v55 = vpop.permute.xlu1 %3975 }
 0x652   : > { %v2593_v1 = vpop.f32.mrf.mxu0  ;;  %11277 = vst [vmem:[#allocation46_spill] sm:$0xff] %v10046_v55 }
 0x653   : > { %v2478_v8 = vpop.f32.mrf.mxu1  ;;  %v3104_v13 = vmul.f32 0.5, %v2593_v1  ;;  %v3205_v9 = vsel %vm3167_vm4, %v10027_v0, -inf  ;;  %v3217_v18 = vsel %vm3167_vm4, %v10030_v5, -inf }
 0x654   : > { %v3100_v23 = vmul.f32 0.5, %v2478_v8  ;;  %3206 = vmax.xlane.f32.xlu1 %v3205_v9  ;;  %3218 = vmax.xlane.f32.xlu0 %v3217_v18  ;;  %v8019_v44 = vpop.f32.mrf.mxu0 }
 0x655   : > { %v10039_v49 = vadd.f32 %v3104_v13, %v9927_v27  ;;  %v7997_v30 = vpop.f32.mrf.mxu1 }
 0x656   : > { %v10042_v41 = vadd.f32 %v3100_v23, %v9935_v54 }
 0x657   : > { %v2483_v51 = vpop.f32.mrf.mxu1  ;;  %v2598_v45 = vpop.f32.mrf.mxu0  ;;  %v3220_v50 = vsel %vm3167_vm4, %v10039_v49, -inf }
 0x658   : > { %v3101_v58 = vmul.f32 0.5, %v2483_v51  ;;  %v3105_v25 = vmul.f32 0.5, %v2598_v45  ;;  %v3208_v59 = vsel %vm3167_vm4, %v10042_v41, -inf  ;;  %3221 = vmax.xlane.f32.xlu0 %v3220_v50 }
 0x659   : > { %v8000_v1 = vpop.f32.mrf.mxu1  ;;  %3209 = vmax.xlane.f32.xlu1 %v3208_v59  ;;  %v8022_v8 = vpop.f32.mrf.mxu0 }
 0x65a   : > { %v10051_v13 = vadd.f32 %v3101_v58, %v9943_v62  ;;  %v10054_v9 = vadd.f32 %v3105_v25, %v9935_v54  ;;  %v10060_v59 = vpop.permute.xlu1 %3852 }
 0x65b   : > { %v2603_v18 = vpop.f32.mrf.mxu0 }
 0x65c   : > { %v3106_v23 = vmul.f32 0.5, %v2603_v18  ;;  %v2703_v44 = vpop.f32.mrf.mxu1  ;;  %v3211_v30 = vsel %vm3180_vm13, %v10051_v13, -inf  ;;  %v3223_v51 = vsel %vm3167_vm4, %v10054_v9, -inf }
 0x65d   : > { %v3107_v45 = vmul.f32 0.5, %v2703_v44  ;;  %3212 = vmax.xlane.f32.xlu1 %v3211_v30  ;;  %3224 = vmax.xlane.f32.xlu0 %v3223_v51  ;;  %v8025_v50 = vpop.f32.mrf.mxu0 }
 0x65e   : > { %v10063_v58 = vadd.f32 %v3106_v23, %v9943_v62  ;;  %v8038_v25 = vpop.f32.mrf.mxu1  ;;  %v10078_v50 = vpop.permute.xlu1 %4219 }
 0x65f   : > { %v10066_v1 = vadd.f32 %v3107_v45, %v9901_v16  ;;  %11278 = vst [vmem:[#allocation47_spill] sm:$0xff] %v10078_v50 }
 0x660   : > { %v2708_v8 = vpop.f32.mrf.mxu1  ;;  %v2823_v18 = vpop.f32.mrf.mxu0  ;;  %v3226_v3 = vsel %vm3180_vm13, %v10063_v58, -inf }
 0x661   : > { %v3108_v43 = vmul.f32 0.5, %v2708_v8  ;;  %v3112_v46 = vmul.f32 0.5, %v2823_v18  ;;  %v3229_v44 = vsel %vm3167_vm4, %v10066_v1, -inf  ;;  %3227 = vmax.xlane.f32.xlu0 %v3226_v3 }
 0x662   : > { %v8041_v30 = vpop.f32.mrf.mxu1  ;;  %3230 = vmax.xlane.f32.xlu1 %v3229_v44  ;;  %v8063_v51 = vpop.f32.mrf.mxu0 }
 0x663   : > { %v10073_v23 = vadd.f32 %v3108_v43, %v9913_v21  ;;  %v10076_v45 = vadd.f32 %v3112_v46, %v9901_v16  ;;  %v10092_v56 = vpop.permute.xlu1 %4215 }
 0x664   : > { %v2828_v25 = vpop.f32.mrf.mxu0  ;;  %11279 = vst [vmem:[#allocation48_spill] sm:$0xff] %v10092_v56 }
 0x665   : > { %v2713_v7 = vpop.f32.mrf.mxu1  ;;  %v3113_v6 = vmul.f32 0.5, %v2828_v25  ;;  %v3232_v8 = vsel %vm3167_vm4, %v10073_v23, -inf  ;;  %v3244_v3 = vsel %vm3167_vm4, %v10076_v45, -inf }
 0x666   : > { %v3109_v18 = vmul.f32 0.5, %v2713_v7  ;;  %3233 = vmax.xlane.f32.xlu1 %v3232_v8  ;;  %3245 = vmax.xlane.f32.xlu0 %v3244_v3  ;;  %v8066_v44 = vpop.f32.mrf.mxu0 }
 0x667   : > { %v10085_v43 = vadd.f32 %v3113_v6, %v9913_v21  ;;  %v8044_v46 = vpop.f32.mrf.mxu1 }
 0x668   : > { %v10088_v30 = vadd.f32 %v3109_v18, %v9927_v27 }
 0x669   : > { %v2718_v51 = vpop.f32.mrf.mxu1  ;;  %v2833_v63 = vpop.f32.mrf.mxu0  ;;  %v3247_v25 = vsel %vm3167_vm4, %v10085_v43, -inf }
 0x66a   : > { %v3110_v52 = vmul.f32 0.5, %v2718_v51  ;;  %v3114_v19 = vmul.f32 0.5, %v2833_v63  ;;  %v3235_v7 = vsel %vm3167_vm4, %v10088_v30, -inf  ;;  %3248 = vmax.xlane.f32.xlu0 %v3247_v25 }
 0x66b   : > { %v8047_v8 = vpop.f32.mrf.mxu1  ;;  %3236 = vmax.xlane.f32.xlu1 %v3235_v7  ;;  %v8069_v6 = vpop.f32.mrf.mxu0 }
 0x66c   : > { %v10097_v3 = vadd.f32 %v3110_v52, %v9935_v54  ;;  %v10100_v18 = vadd.f32 %v3114_v19, %v9927_v27  ;;  %v10106_v8 = vpop.permute.xlu1 %4340 }
 0x66d   : > { %v2723_v44 = vpop.f32.mrf.mxu1  ;;  %v2838_v46 = vpop.f32.mrf.mxu0  ;;  %11280 = vst [vmem:[#allocation49_spill] sm:$0xff] %v10106_v8 }
 0x66e   : > { %v3111_v39 = vmul.f32 0.5, %v2723_v44  ;;  %v3115_v34 = vmul.f32 0.5, %v2838_v46  ;;  %v3238_v63 = vsel %vm3167_vm4, %v10097_v3, -inf  ;;  %v3250_v51 = vsel %vm3167_vm4, %v10100_v18, -inf }
 0x66f   : > { %v8050_v25 = vpop.f32.mrf.mxu1  ;;  %3239 = vmax.xlane.f32.xlu1 %v3238_v63  ;;  %3251 = vmax.xlane.f32.xlu0 %v3250_v51  ;;  %v8072_v7 = vpop.f32.mrf.mxu0 }
 0x670   : > { %v10109_v52 = vadd.f32 %v3111_v39, %v9943_v62  ;;  %v10112_v19 = vadd.f32 %v3115_v34, %v9935_v54  ;;  %v10124_v8 = vpop.permute.xlu1 %3981 }
 0x671   : > { %v2843_v6 = vpop.f32.mrf.mxu0 }
 0x672   : > { %v3116_v44 = vmul.f32 0.5, %v2843_v6  ;;  %v2943_v46 = vpop.f32.mrf.mxu1  ;;  %v3241_v56 = vsel %vm3180_vm13, %v10109_v52, -inf  ;;  %v3253_v25 = vsel %vm3167_vm4, %v10112_v19, -inf }
 0x673   : > { %v3117_v63 = vmul.f32 0.5, %v2943_v46  ;;  %3242 = vmax.xlane.f32.xlu1 %v3241_v56  ;;  %3254 = vmax.xlane.f32.xlu0 %v3253_v25  ;;  %v8075_v51 = vpop.f32.mrf.mxu0  ;;  %v10130_v46 = vpop.permute.xlu0 %3860 }
 0x674   : > { %v10119_v7 = vadd.f32 %v3116_v44, %v9943_v62  ;;  %v8088_v39 = vpop.f32.mrf.mxu1  ;;  %v10132_v25 = vpop.permute.xlu1 %4102 }
 0x675   : > { %v10122_v34 = vadd.f32 %v3117_v63, %v9901_v16  ;;  %11281 = vst [vmem:[#allocation50_spill] sm:$0xff] %v10132_v25 }
 0x676   : > { %v2948_v6 = vpop.f32.mrf.mxu1  ;;  %v3256_v17 = vsel %vm3180_vm13, %v10119_v7, -inf }
 0x677   : > { %v3259_v50 = vsel %vm3167_vm4, %v10122_v34, -inf  ;;  %3257 = vmax.xlane.f32.xlu0 %v3256_v17  ;;  %v10134_v39 = vpop.permute.xlu0 %4223 }
 0x678   : > { %v8091_v56 = vpop.f32.mrf.mxu1  ;;  %3260 = vmax.xlane.f32.xlu1 %v3259_v50  ;;  %11282 = vst [vmem:[#allocation51_spill] sm:$0xff] %v10134_v39  ;;  %v10136_v33 = vpop.permute.xlu1 %4465 }
 0x679   : > { %11283 = vst [vmem:[#allocation52_spill] sm:$0xff] %v10136_v33  ;;  %v3118_v33 = vmul.f32 0.5, %v2948_v6 }
 0x67a   : > { %v2953_v44 = vpop.f32.mrf.mxu1 }
 0x67b   : > { %v10138_v10 = vpop.permute.xlu0 %4344 }
 0x67c   : > { %v8094_v51 = vpop.f32.mrf.mxu1  ;;  %11284 = vst [vmem:[#allocation53_spill] sm:$0xff] %v10138_v10 }
 0x67e   : > { %v2958_v63 = vpop.f32.mrf.mxu1 }
 0x680   : > { %v8097_v11 = vpop.f32.mrf.mxu1 }
 0x682   : > { %v2963_v14 = vpop.f32.mrf.mxu1 }
 0x684   : > { %v8100_v12 = vpop.f32.mrf.mxu1 }
 0x686   : > { %v3170_v28 = vpop.xlane.xlu1 %3169 }
 0x687   : > { %v3289_v17 = vsub.f32 %v9910_v42, %v3170_v28  ;;  %v10148_v42 = vadd.f32 %v3118_v33, %v9913_v21 }
 0x689   : > { %v3329_v50 = vmul.f32 1.442695, %v3289_v17 }
 0x68a   : > { %v3173_v56 = vpop.xlane.xlu0 %3172 }
 0x68b   : > { %8681 = vpow2.f32 %v3329_v50  ;;  %v3290_v55 = vsub.f32 %v9922_v26, %v3173_v56 }
 0x68d   : > { %v3331_v25 = vmul.f32 1.442695, %v3290_v55  ;;  %4459 = vrot.lane.b32.xlu0 %v9624_v36, %s8953_s11  ;;  %v3119_v36 = vmul.f32 0.5, %v2953_v44 }
 0x68e   : > { %v3176_v51 = vpop.xlane.xlu1 %3175 }
 0x68f   : > { %8683 = vpow2.f32 %v3331_v25  ;;  %v3291_v11 = vsub.f32 %v9930_v24, %v3176_v51  ;;  %v3262_v24 = vsel %vm3167_vm4, %v10148_v42, -inf  ;;  %v10158_v25 = vadd.f32 %v3119_v36, %v9927_v27 }
 0x691   : > { %v3333_v12 = vmul.f32 1.442695, %v3291_v11 }
 0x692   : > { %v3179_v39 = vpop.xlane.xlu1 %3178 }
 0x693   : > { %8685 = vpow2.f32 %v3333_v12  ;;  %v3292_v28 = vsub.f32 %v9938_v4, %v3179_v39  ;;  %v3120_v4 = vmul.f32 0.5, %v2958_v63  ;;  %v3265_v39 = vsel %vm3167_vm4, %v10158_v25, -inf }
 0x695   : > { %v3335_v55 = vmul.f32 1.442695, %v3292_v28  ;;  %v10167_v50 = vadd.f32 %v3120_v4, %v9935_v54  ;;  %v3121_v28 = vmul.f32 0.5, %v2963_v14 }
 0x697   : > { %8687 = vpow2.f32 %v3335_v55  ;;  %v3268_v36 = vsel %vm3167_vm4, %v10167_v50, -inf }
 0x698   : > { %v10145_v10 = vpop.eup %8681 }
 0x699   : > { %v3409_v26 = vsel %vm3167_vm4, %v10145_v10, 0.0 }
 0x69a   : > { %3410 = vadd.xlane.f32.xlu1 %v3409_v26 }
 0x69c   : > { %v10155_v6 = vpop.eup %8683 }
 0x69d   : > { %v3412_v33 = vsel %vm3167_vm4, %v10155_v6, 0.0 }
 0x69e   : > { %3263 = vmax.xlane.f32.xlu1 %v3262_v24 }
 0x6a0   : > { %v10164_v44 = vpop.eup %8685 }
 0x6a1   : > { %v3415_v51 = vsel %vm3167_vm4, %v10164_v44, 0.0 }
 0x6a2   : > { %3413 = vadd.xlane.f32.xlu1 %v3412_v33 }
 0x6a4   : > { %v10178_v24 = vpop.eup %8687 }
 0x6a6   : > { %3266 = vmax.xlane.f32.xlu1 %v3265_v39 }
 0x6a8   : > { %v3063_v17 = vpop.f32.mrf.mxu0 }
 0x6a9   : > { %v3122_v56 = vmul.f32 0.5, %v3063_v17  ;;  %v3418_v17 = vsel %vm3167_vm4, %v10178_v24, 0.0 }
 0x6aa   : > { %3416 = vadd.xlane.f32.xlu1 %v3415_v51  ;;  %v8113_v11 = vpop.f32.mrf.mxu0 }
 0x6ab   : > { %v10172_v12 = vadd.f32 %v3122_v56, %v9901_v16  ;;  %v10184_v16 = vadd.f32 %v3121_v28, %v9943_v62 }
 0x6ac   : > { %v3068_v63 = vpop.f32.mrf.mxu0 }
 0x6ad   : > { %v3123_v26 = vmul.f32 0.5, %v3068_v63  ;;  %v3274_v55 = vsel %vm3167_vm4, %v10172_v12, -inf }
 0x6ae   : > { %3269 = vmax.xlane.f32.xlu1 %v3268_v36  ;;  %3275 = vmax.xlane.f32.xlu0 %v3274_v55  ;;  %v8116_v33 = vpop.f32.mrf.mxu0 }
 0x6af   : > { %v10181_v4 = vadd.f32 %v3123_v26, %v9913_v21  ;;  %v3271_v26 = vsel %vm3180_vm13, %v10184_v16, -inf }
 0x6b0   : > { %v3073_v39 = vpop.f32.mrf.mxu0 }
 0x6b1   : > { %v3124_v14 = vmul.f32 0.5, %v3073_v39  ;;  %v3277_v56 = vsel %vm3167_vm4, %v10181_v4, -inf }
 0x6b2   : > { %3419 = vadd.xlane.f32.xlu1 %v3418_v17  ;;  %3278 = vmax.xlane.f32.xlu0 %v3277_v56  ;;  %v8119_v51 = vpop.f32.mrf.mxu0 }
 0x6b3   : > { %v10191_v11 = vadd.f32 %v3124_v14, %v9927_v27 }
 0x6b4   : > { %v3078_v63 = vpop.f32.mrf.mxu0 }
 0x6b5   : > { %v3125_v21 = vmul.f32 0.5, %v3078_v63  ;;  %v3280_v28 = vsel %vm3167_vm4, %v10191_v11, -inf }
 0x6b6   : > { %3272 = vmax.xlane.f32.xlu1 %v3271_v26  ;;  %3281 = vmax.xlane.f32.xlu0 %v3280_v28  ;;  %v8122_v36 = vpop.f32.mrf.mxu0  ;;  %v3183_v28 = vpop.xlane.xlu1 %3182 }
 0x6b7   : > { %v10198_v55 = vadd.f32 %v3125_v21, %v9935_v54 }
 0x6b8   : > { %v3083_v33 = vpop.f32.mrf.mxu0 }
 0x6b9   : > { %v3126_v39 = vmul.f32 0.5, %v3083_v33  ;;  %v3283_v27 = vsel %vm3167_vm4, %v10198_v55, -inf  ;;  %v3293_v33 = vsub.f32 %v9946_v2, %v3183_v28 }
 0x6ba   : > { %3284 = vmax.xlane.f32.xlu0 %v3283_v27  ;;  %v8125_v14 = vpop.f32.mrf.mxu0 }
 0x6bb   : > { %v10203_v17 = vadd.f32 %v3126_v39, %v9943_v62  ;;  %v3337_v27 = vmul.f32 1.442695, %v3293_v33 }
 0x6bd   : > { %v3286_v56 = vsel %vm3180_vm13, %v10203_v17, -inf }
 0x6be   : > { %3287 = vmax.xlane.f32.xlu0 %v3286_v56 }
 0x6c4   : > { %v3186_v51 = vpop.xlane.xlu0 %3185 }
 0x6c5   : > { %v3294_v63 = vsub.f32 %v9972_v15, %v3186_v51 }
 0x6c7   : > { %v3339_v26 = vmul.f32 1.442695, %v3294_v63  ;;  %4338 = vrot.lane.b32.xlu1 %v9557_v20, %s8953_s11 }
 0x6c8   : > { %v3189_v54 = vpop.xlane.xlu0 %3188 }
 0x6c9   : > { %8689 = vpow2.f32 %v3339_v26  ;;  %v3295_v62 = vsub.f32 %v9979_v35, %v3189_v54 }
 0x6ca   : > { %8691 = vpow2.f32 %v3337_v27 }
 0x6cb   : > { %v3341_v20 = vmul.f32 1.442695, %v3295_v62 }
 0x6cc   : > { %v3192_v21 = vpop.xlane.xlu0 %3191 }
 0x6cd   : > { %v3296_v54 = vsub.f32 %v9988_v47, %v3192_v21 }
 0x6cf   : > { %v3343_v31 = vmul.f32 1.442695, %v3296_v54 }
 0x6d0   : > { %v3195_v36 = vpop.xlane.xlu0 %3194 }
 0x6d4   : > { %v3198_v39 = vpop.xlane.xlu0 %3197 }
 0x6d5   : > { %v3201_v14 = vpop.xlane.xlu1 %3200 }
 0x6d6   : > { %v10212_v56 = vpop.eup %8689  ;;  %v3299_v15 = vsub.f32 %v10008_v40, %v3201_v14 }
 0x6d7   : > { %v3424_v51 = vsel %vm3167_vm4, %v10212_v56, 0.0 }
 0x6d8   : > { %v3349_v63 = vmul.f32 1.442695, %v3299_v15  ;;  %3425 = vadd.xlane.f32.xlu0 %v3424_v51  ;;  %v3297_v51 = vsub.f32 %v9996_v60, %v3195_v36 }
 0x6d9   : > { %v3204_v26 = vpop.xlane.xlu1 %3203  ;;  %v3216_v61 = vpop.xlane.xlu0 %3215 }
 0x6da   : > { %8693 = vpow2.f32 %v3349_v63  ;;  %v3300_v2 = vsub.f32 %v10017_v32, %v3204_v26  ;;  %v3304_v35 = vsub.f32 %v10020_v57, %v3216_v61  ;;  %v10222_v63 = vpop.eup %8691 }
 0x6db   : > { %8695 = vpow2.f32 %v3341_v20  ;;  %v3345_v20 = vmul.f32 1.442695, %v3297_v51  ;;  %v3421_v36 = vsel %vm3180_vm13, %v10222_v63, 0.0 }
 0x6dc   : > { %v3351_v28 = vmul.f32 1.442695, %v3300_v2  ;;  %v3359_v33 = vmul.f32 1.442695, %v3304_v35  ;;  %v3298_v2 = vsub.f32 %v10005_v37, %v3198_v39 }
 0x6dd   : > { %v3207_v40 = vpop.xlane.xlu1 %3206  ;;  %v3219_v14 = vpop.xlane.xlu0 %3218 }
 0x6de   : > { %8697 = vpow2.f32 %v3359_v33  ;;  %v3301_v62 = vsub.f32 %v10027_v0, %v3207_v40  ;;  %v3347_v37 = vmul.f32 1.442695, %v3298_v2 }
 0x6df   : > { %8699 = vpow2.f32 %v3351_v28 }
 0x6e0   : > { %8701 = vpow2.f32 %v3343_v31  ;;  %v3353_v32 = vmul.f32 1.442695, %v3301_v62  ;;  %v3305_v31 = vsub.f32 %v10030_v5, %v3219_v14 }
 0x6e1   : > { %v3222_v27 = vpop.xlane.xlu0 %3221 }
 0x6e2   : > { %v3210_v15 = vpop.xlane.xlu1 %3209  ;;  %8703 = vpow2.f32 %v3353_v32  ;;  %v3361_v5 = vmul.f32 1.442695, %v3305_v31 }
 0x6e3   : > { %v3302_v21 = vsub.f32 %v10042_v41, %v3210_v15  ;;  %8705 = vpow2.f32 %v3345_v20  ;;  %v3306_v20 = vsub.f32 %v10039_v49, %v3222_v27 }
 0x6e5   : > { %v3355_v35 = vmul.f32 1.442695, %v3302_v21 }
 0x6e6   : > { %v3213_v61 = vpop.xlane.xlu1 %3212  ;;  %v3225_v57 = vpop.xlane.xlu0 %3224 }
 0x6e7   : > { %v10224_v47 = vpop.eup %8693  ;;  %8707 = vpow2.f32 %v3355_v35  ;;  %v3303_v51 = vsub.f32 %v10051_v13, %v3213_v61  ;;  %v3307_v2 = vsub.f32 %v10054_v9, %v3225_v57  ;;  %v3363_v35 = vmul.f32 1.442695, %v3306_v20 }
 0x6e8   : > { %v3439_v26 = vsel %vm3167_vm4, %v10224_v47, 0.0  ;;  %v10229_v0 = vpop.eup %8695 }
 0x6e9   : > { %3440 = vadd.xlane.f32.xlu0 %v3439_v26  ;;  %v3427_v33 = vsel %vm3167_vm4, %v10229_v0, 0.0  ;;  %v3365_v49 = vmul.f32 1.442695, %v3307_v2 }
 0x6ea   : > { %v3228_v60 = vpop.xlane.xlu0 %3227 }
 0x6eb   : > { %v3231_v54 = vpop.xlane.xlu1 %3230  ;;  %3422 = vadd.xlane.f32.xlu1 %v3421_v36  ;;  %v10235_v41 = vpop.eup %8697  ;;  %v3357_v36 = vmul.f32 1.442695, %v3303_v51  ;;  %v3308_v27 = vsub.f32 %v10063_v58, %v3228_v60 }
 0x6ec   : > { %v3309_v28 = vsub.f32 %v10066_v1, %v3231_v54  ;;  %v10240_v40 = vpop.eup %8699  ;;  %v3454_v62 = vsel %vm3167_vm4, %v10235_v41, 0.0 }
 0x6ed   : > { %3428 = vadd.xlane.f32.xlu0 %v3427_v33  ;;  %v3442_v32 = vsel %vm3167_vm4, %v10240_v40, 0.0  ;;  %v10248_v21 = vpop.eup %8701 }
 0x6ee   : > { %v3369_v14 = vmul.f32 1.442695, %v3309_v28 }
 0x6ef   : > { %v3234_v39 = vpop.xlane.xlu1 %3233  ;;  %v3246_v15 = vpop.xlane.xlu0 %3245  ;;  %3455 = vadd.xlane.f32.xlu1 %v3454_v62 }
 0x6f0   : > { %8709 = vpow2.f32 %v3369_v14  ;;  %v3310_v1 = vsub.f32 %v10073_v23, %v3234_v39  ;;  %v3430_v23 = vsel %vm3167_vm4, %v10248_v21, 0.0  ;;  %v10256_v61 = vpop.eup %8703 }
 0x6f1   : > { %8711 = vpow2.f32 %v3361_v5  ;;  %3443 = vadd.xlane.f32.xlu0 %v3442_v32  ;;  %v3445_v9 = vsel %vm3167_vm4, %v10256_v61, 0.0  ;;  %v10264_v57 = vpop.eup %8705 }
 0x6f2   : > { %v3371_v26 = vmul.f32 1.442695, %v3310_v1  ;;  %8713 = vpow2.f32 %v3347_v37  ;;  %v3314_v37 = vsub.f32 %v10076_v45, %v3246_v15  ;;  %v3433_v60 = vsel %vm3167_vm4, %v10264_v57, 0.0 }
 0x6f3   : > { %v10251_v31 = vpop.xlane.xlu0 %3248 }
 0x6f4   : > { %v3237_v13 = vpop.xlane.xlu1 %3236  ;;  %8715 = vpow2.f32 %v3371_v26  ;;  %v10267_v62 = vpop.eup %8707  ;;  %v3379_v45 = vmul.f32 1.442695, %v3314_v37 }
 0x6f5   : > { %3431 = vadd.xlane.f32.xlu0 %v3430_v23  ;;  %v3311_v54 = vsub.f32 %v10088_v30, %v3237_v13  ;;  %8717 = vpow2.f32 %v3357_v36  ;;  %v3367_v30 = vmul.f32 1.442695, %v3308_v27  ;;  %v3448_v15 = vsel %vm3167_vm4, %v10267_v62, 0.0 }
 0x6f6   : > { %8719 = vpow2.f32 %v3363_v35 }
 0x6f7   : > { %v3373_v5 = vmul.f32 1.442695, %v3311_v54  ;;  %8721 = vpow2.f32 %v3365_v49  ;;  %v3315_v49 = vsub.f32 %v10085_v43, %v10251_v31 }
 0x6f8   : > { %v3240_v28 = vpop.xlane.xlu1 %3239  ;;  %v10260_v33 = vpop.xlane.xlu0 %3251 }
 0x6f9   : > { %3446 = vadd.xlane.f32.xlu0 %v3445_v9  ;;  %v3312_v14 = vsub.f32 %v10097_v3, %v3240_v28  ;;  %8723 = vpow2.f32 %v3373_v5 }
 0x6fa   : > { %8725 = vpow2.f32 %v3367_v30  ;;  %v3381_v30 = vmul.f32 1.442695, %v3315_v49 }
 0x6fb   : > { %v3375_v32 = vmul.f32 1.442695, %v3312_v14 }
 0x6fc   : > { %v3243_v58 = vpop.xlane.xlu1 %3242  ;;  %v3255_v51 = vpop.xlane.xlu0 %3254 }
 0x6fd   : > { %v10272_v39 = vpop.eup %8709  ;;  %3434 = vadd.xlane.f32.xlu0 %v3433_v60  ;;  %v3313_v3 = vsub.f32 %v10109_v52, %v3243_v58  ;;  %8727 = vpow2.f32 %v3375_v32  ;;  %v3317_v52 = vsub.f32 %v10112_v19, %v3255_v51 }
 0x6fe   : > { %v10274_v1 = vpop.eup %8711  ;;  %v3469_v20 = vsel %vm3167_vm4, %v10272_v39, 0.0  ;;  %8729 = vpow2.f32 %v3379_v45 }
 0x6ff   : > { %3470 = vadd.xlane.f32.xlu1 %v3469_v20  ;;  %v10281_v26 = vpop.eup %8713  ;;  %v3457_v2 = vsel %vm3167_vm4, %v10274_v1, 0.0  ;;  %v3377_v13 = vmul.f32 1.442695, %v3313_v3  ;;  %v3385_v5 = vmul.f32 1.442695, %v3317_v52 }
 0x700   : > { %v3258_v54 = vpop.xlane.xlu0 %3257  ;;  %v3436_v28 = vsel %vm3180_vm13, %v10281_v26, 0.0 }
 0x701   : > { %v3261_v36 = vpop.xlane.xlu1 %3260  ;;  %3449 = vadd.xlane.f32.xlu0 %v3448_v15  ;;  %v10287_v35 = vpop.eup %8715  ;;  %8731 = vpow2.f32 %v3377_v13  ;;  %v3318_v19 = vsub.f32 %v10119_v7, %v3258_v54 }
 0x702   : > { %v3319_v23 = vsub.f32 %v10122_v34, %v3261_v36  ;;  %v10293_v9 = vpop.eup %8717  ;;  %v3472_v34 = vsel %vm3167_vm4, %v10287_v35, 0.0 }
 0x703   : > { %3458 = vadd.xlane.f32.xlu1 %v3457_v2  ;;  %v10298_v14 = vpop.eup %8719  ;;  %v3451_v43 = vsel %vm3180_vm13, %v10293_v9, 0.0  ;;  %v3387_v37 = vmul.f32 1.442695, %v3318_v19 }
 0x704   : > { %v3389_v27 = vmul.f32 1.442695, %v3319_v23  ;;  %v10302_v31 = vpop.eup %8721  ;;  %v3460_v58 = vsel %vm3167_vm4, %v10298_v14, 0.0 }
 0x705   : > { %3437 = vadd.xlane.f32.xlu0 %v3436_v28  ;;  %v3463_v60 = vsel %vm3167_vm4, %v10302_v31, 0.0 }
 0x706   : > { %8733 = vpow2.f32 %v3389_v27  ;;  %v10306_v7 = vpop.eup %8723 }
 0x707   : > { %3473 = vadd.xlane.f32.xlu1 %v3472_v34  ;;  %8735 = vpow2.f32 %v3385_v5  ;;  %v10310_v51 = vpop.eup %8725  ;;  %v3475_v32 = vsel %vm3167_vm4, %v10306_v7, 0.0 }
 0x708   : > { %8737 = vpow2.f32 %v3381_v30  ;;  %v3466_v20 = vsel %vm3180_vm13, %v10310_v51, 0.0  ;;  %v3316_v30 = vsub.f32 %v10100_v18, %v10260_v33  ;;  %v11285_v18 = vmov 0.0  }
 0x709   : > { %3452 = vadd.xlane.f32.xlu0 %v3451_v43  ;;  %8739 = vpow2.f32 %v3387_v37 }
 0x70a   : > { %v10314_v3 = vpop.eup %8727 }
 0x70b   : > { %3461 = vadd.xlane.f32.xlu1 %v3460_v58  ;;  %v10318_v45 = vpop.eup %8729  ;;  %v3478_v15 = vsel %vm3167_vm4, %v10314_v3, 0.0  ;;  %v3383_v58 = vmul.f32 1.442695, %v3316_v30 }
 0x70c   : > { %v3484_v2 = vsel %vm3167_vm4, %v10318_v45, 0.0 }
 0x70d   : > { %3464 = vadd.xlane.f32.xlu0 %v3463_v60 }
 0x70e   : > { %v10322_v36 = vpop.eup %8731 }
 0x70f   : > { %3476 = vadd.xlane.f32.xlu1 %v3475_v32  ;;  %v3481_v52 = vsel %vm3180_vm13, %v10322_v36, 0.0 }
 0x711   : > { %3467 = vadd.xlane.f32.xlu0 %v3466_v20 }
 0x713   : > { %3479 = vadd.xlane.f32.xlu1 %v3478_v15  ;;  %v10326_v13 = vpop.eup %8733 }
 0x714   : > { %v10330_v23 = vpop.eup %8735  ;;  %v3499_v54 = vsel %vm3167_vm4, %v10326_v13, 0.0 }
 0x715   : > { %3485 = vadd.xlane.f32.xlu0 %v3484_v2  ;;  %v10334_v49 = vpop.eup %8737  ;;  %v3493_v27 = vsel %vm3167_vm4, %v10330_v23, 0.0 }
 0x716   : > { %v10338_v28 = vpop.eup %8739  ;;  %v3487_v5 = vsel %vm3167_vm4, %v10334_v49, 0.0 }
 0x717   : > { %3482 = vadd.xlane.f32.xlu1 %v3481_v52  ;;  %v3496_v19 = vsel %vm3180_vm13, %v10338_v28, 0.0 }
 0x719   : > { %3500 = vadd.xlane.f32.xlu0 %v3499_v54 }
 0x71b   : > { %3494 = vadd.xlane.f32.xlu1 %v3493_v27  ;;  %v10349_v27 = vpop.permute.xlu0 %4459 }
 0x71d   : > { %3488 = vadd.xlane.f32.xlu0 %v3487_v5 }
 0x71f   : > { %3497 = vadd.xlane.f32.xlu1 %v3496_v19 }
 0x723   : > { %v3411_v34 = vpop.xlane.xlu1 %3410 }
 0x724   : > { %8741 = vrcp.f32 %v3411_v34 }
 0x727   : > { %v3264_v43 = vpop.xlane.xlu1 %3263 }
 0x728   : > { %v3320_v37 = vsub.f32 %v10148_v42, %v3264_v43 }
 0x72a   : > { %v3391_v60 = vmul.f32 1.442695, %v3320_v37 }
 0x72b   : > { %v3414_v32 = vpop.xlane.xlu1 %3413 }
 0x72c   : > { %8743 = vpow2.f32 %v3391_v60 }
 0x72d   : > { %8745 = vrcp.f32 %v3414_v32 }
 0x72e   : > { %8747 = vpow2.f32 %v3383_v58 }
 0x72f   : > { %v3267_v20 = vpop.xlane.xlu1 %3266 }
 0x730   : > { %v3321_v15 = vsub.f32 %v10158_v25, %v3267_v20 }
 0x731   : > { %v8742_v2 = vpop.eup %8741 }
 0x732   : > { %v3569_v52 = vmul.f32 %v8742_v2, %v10145_v10  ;;  %v3393_v54 = vmul.f32 1.442695, %v3321_v15 }
 0x733   : > { %v3417_v5 = vpop.xlane.xlu1 %3416 }
 0x734   : > { %8749 = vpow2.f32 %v3393_v54  ;;  %8137 = vmatmul.mubr.msk.f32.vlgmr.msra.gmra.mxu1 %vm3167_vm4, %v3569_v52 }
 0x735   : > { %8751 = vrcp.f32 %v3417_v5  ;;  %8177 = vmatpush3.msk.msra.mxu1 %vm3638_vm10, %v10130_v46  ;;  %8139 = vmatprep.mubr.msk.f32.mxu1 %vm8943_vm1, %v11285_v18 }
 0x736   : > { %8178 = vmatprep.subr.mxu1 %v11285_v18 }
 0x737   : > { %8179 = vmatpush3.msra.mxu1 %v9984_v53  ;;  %v3270_v42 = vpop.xlane.xlu1 %3269  ;;  %v3276_v10 = vpop.xlane.xlu0 %3275 }
 0x738   : > { %8180 = vmatprep.subr.mxu1 %v11285_v18  ;;  %v3322_v25 = vsub.f32 %v10167_v50, %v3270_v42  ;;  %v3324_v33 = vsub.f32 %v10172_v12, %v3276_v10 }
 0x739   : > { %v10361_v19 = vpop.eup %8743  ;;  %8181 = vmatpush3.msra.mxu1 %v10012_v29 }
 0x73a   : > { %v8746_v46 = vpop.eup %8745  ;;  %v3395_v34 = vmul.f32 1.442695, %v3322_v25  ;;  %v3399_v30 = vmul.f32 1.442695, %v3324_v33  ;;  %8182 = vmatprep.subr.mxu1 %v11285_v18  ;;  %v3502_v53 = vsel %vm3167_vm4, %v10361_v19, 0.0 }
 0x73b   : > { %v10367_v43 = vpop.eup %8747  ;;  %8183 = vmatpush3.msra.mxu1 %v10032_v48  ;;  %v3420_v37 = vpop.xlane.xlu1 %3419  ;;  %3503 = vadd.xlane.f32.xlu0 %v3502_v53  ;;  %v3570_v50 = vmul.f32 %v8746_v46, %v10155_v6 }
 0x73c   : > { %v3279_v12 = vpop.xlane.xlu0 %3278  ;;  %8753 = vpow2.f32 %v3395_v34  ;;  %8184 = vmatprep.subr.mxu1 %v11285_v18  ;;  %v3490_v48 = vsel %vm3167_vm4, %v10367_v43, 0.0 }
 0x73d   : > { %v3325_v29 = vsub.f32 %v10181_v4, %v3279_v12  ;;  %8755 = vpow2.f32 %v3399_v30  ;;  %8140 = vmatmul.mubr.msk.f32.gmra.mxu1 %vm3167_vm4, %v3570_v50 }
 0x73e   : > { %8757 = vrcp.f32 %v3420_v37  ;;  %8185 = vmatpush3.msra.mxu1 %v10060_v59  ;;  %8142 = vmatprep.mubr.msk.f32.mxu1 %vm8943_vm1, %v11285_v18 }
 0x73f   : > { %v3401_v58 = vmul.f32 1.442695, %v3325_v29  ;;  %v3273_v6 = vpop.xlane.xlu1 %3272  ;;  %3491 = vadd.xlane.f32.xlu0 %v3490_v48  ;;  %8226 = vmatprep.subr.mxu1 %v11285_v18 }
 0x740   : > { %v3282_v60 = vpop.xlane.xlu0 %3281  ;;  %v3323_v4 = vsub.f32 %v10184_v16, %v3273_v6 }
 0x741   : > { %8759 = vpow2.f32 %v3401_v58  ;;  %v3326_v32 = vsub.f32 %v10191_v11, %v3282_v60  ;;  %v10382_v20 = vpop.eup %8749 }
 0x742   : > { %v8752_v59 = vpop.eup %8751  ;;  %v3397_v15 = vmul.f32 1.442695, %v3323_v4  ;;  %v3505_v52 = vsel %vm3167_vm4, %v10382_v20, 0.0 }
 0x743   : > { %v3403_v2 = vmul.f32 1.442695, %v3326_v32  ;;  %3506 = vadd.xlane.f32.xlu0 %v3505_v52  ;;  %v3571_v54 = vmul.f32 %v8752_v59, %v10164_v44  ;;  %v10426_v32 = vpop.permute.xlu1 %4338  ;;  %v11288_v52 = vld [vmem:[#allocation46_spill] sm:$0xff] }
 0x744   : > { %v3285_v5 = vpop.xlane.xlu0 %3284  ;;  %8761 = vpow2.f32 %v3397_v15 }
 0x745   : > { %v3327_v42 = vsub.f32 %v10198_v55, %v3285_v5  ;;  %8763 = vpow2.f32 %v3403_v2  ;;  %8143 = vmatmul.mubr.msk.f32.gmra.mxu1 %vm3167_vm4, %v3571_v54  ;;  %v11289_v54 = vld [vmem:[#allocation35_spill] sm:$0xff] }
 0x746   : > { %8145 = vmatprep.mubr.msk.f32.mxu1 %vm8943_vm1, %v11285_v18 }
 0x747   : > { %v3405_v16 = vmul.f32 1.442695, %v3327_v42 }
 0x748   : > { %v3288_v11 = vpop.xlane.xlu0 %3287 }
 0x749   : > { %8765 = vpow2.f32 %v3405_v16  ;;  %v3328_v10 = vsub.f32 %v10203_v17, %v3288_v11  ;;  %v10392_v25 = vpop.eup %8753 }
 0x74a   : > { %v10394_v33 = vpop.eup %8755  ;;  %v3508_v46 = vsel %vm3167_vm4, %v10392_v25, 0.0 }
 0x74b   : > { %v3407_v44 = vmul.f32 1.442695, %v3328_v10  ;;  %v8758_v55 = vpop.eup %8757  ;;  %3509 = vadd.xlane.f32.xlu0 %v3508_v46  ;;  %v3514_v34 = vsel %vm3167_vm4, %v10394_v33, 0.0 }
 0x74c   : > { %v3572_v30 = vmul.f32 %v8758_v55, %v10178_v24  ;;  %3515 = vadd.xlane.f32.xlu1 %v3514_v34 }
 0x74d   : > { %8767 = vpow2.f32 %v3407_v44 }
 0x74e   : > { %v10401_v53 = vpop.eup %8759  ;;  %8146 = vmatmul.mubr.msk.f32.gmra.mxu1 %vm3167_vm4, %v3572_v30 }
 0x74f   : > { %v3517_v17 = vsel %vm3167_vm4, %v10401_v53, 0.0  ;;  %8148 = vmatprep.mubr.msk.f32.mxu1 %vm8943_vm1, %v11285_v18 }
 0x750   : > { %3518 = vadd.xlane.f32.xlu1 %v3517_v17 }
 0x751   : > { %v10408_v37 = vpop.eup %8761 }
 0x752   : > { %v10410_v50 = vpop.eup %8763  ;;  %v3511_v12 = vsel %vm3180_vm13, %v10408_v37, 0.0 }
 0x753   : > { %3512 = vadd.xlane.f32.xlu0 %v3511_v12  ;;  %v3520_v24 = vsel %vm3167_vm4, %v10410_v50, 0.0 }
 0x754   : > { %3521 = vadd.xlane.f32.xlu1 %v3520_v24 }
 0x756   : > { %v10416_v29 = vpop.eup %8765 }
 0x757   : > { %v3523_v58 = vsel %vm3167_vm4, %v10416_v29, 0.0 }
 0x758   : > { %3524 = vadd.xlane.f32.xlu0 %v3523_v58 }
 0x75a   : > { %v10420_v48 = vpop.eup %8767 }
 0x75b   : > { %v3526_v6 = vsel %vm3180_vm13, %v10420_v48, 0.0 }
 0x75c   : > { %3527 = vadd.xlane.f32.xlu0 %v3526_v6  ;;  %v11291_v6 = vld [vmem:[#allocation36_spill] sm:$0xff] }
 0x761   : > { %v3426_v60 = vpop.xlane.xlu0 %3425 }
 0x762   : > { %8769 = vrcp.f32 %v3426_v60 }
 0x765   : > { %4336 = vrot.lane.b32.xlu1 %v9575_v22, %s8953_s11  ;;  %v11286_v22 = vld [vmem:[#allocation45_spill] sm:$0xff] }
 0x76f   : > { %v8770_v4 = vpop.eup %8769 }
 0x770   : > { %v3574_v59 = vmul.f32 %v8770_v4, %v10212_v56  ;;  %v11292_v4 = vld [vmem:[#allocation38_spill] sm:$0xff] }
 0x772   : > { %4457 = vrot.lane.b32.xlu0 %v9636_v38, %s8953_s11  ;;  %v3441_v15 = vpop.xlane.xlu0 %3440  ;;  %8162 = vmatmul.mubr.msk.f32.vlgmr.msra.gmra.mxu0 %vm3167_vm4, %v3574_v59  ;;  %v11287_v38 = vld [vmem:[#allocation34_spill] sm:$0xff]  ;;  %s11222_s11 = smov 12  }
 0x773   : > { %8202 = vmatpush3.msk.msra.mxu0 %vm3638_vm10, %v10124_v8  ;;  %8164 = vmatprep.mubr.msk.f32.mxu0 %vm8943_vm1, %v11285_v18 }
 0x774   : > { %v3423_v2 = vpop.xlane.xlu1 %3422  ;;  %8203 = vmatprep.subr.mxu0 %v11285_v18 }
 0x775   : > { %8771 = vrcp.f32 %v3423_v2  ;;  %8204 = vmatpush3.msra.mxu0 %v11286_v22  ;;  %v11293_v2 = vld [vmem:[#allocation39_spill] sm:$0xff]  ;;  %v11294_v22 = vld [vmem:[#allocation41_spill] sm:$0xff] }
 0x776   : > { %8773 = vrcp.f32 %v3441_v15  ;;  %8205 = vmatprep.subr.mxu0 %v11285_v18  ;;  %v3429_v56 = vpop.xlane.xlu0 %3428 }
 0x777   : > { %8775 = vrcp.f32 %v3429_v56  ;;  %8206 = vmatpush3.msra.mxu0 %v11287_v38 }
 0x778   : > { %8207 = vmatprep.subr.mxu0 %v11285_v18  ;;  %v3456_v46 = vpop.xlane.xlu1 %3455 }
 0x779   : > { %8208 = vmatpush3.msra.mxu0 %v11288_v52 }
 0x77a   : > { %8209 = vmatprep.subr.mxu0 %v11285_v18  ;;  %v3444_v8 = vpop.xlane.xlu0 %3443 }
 0x77b   : > { %8777 = vrcp.f32 %v3444_v8  ;;  %8210 = vmatpush3.msra.mxu0 %v11289_v54 }
 0x77c   : > { %8251 = vmatprep.subr.mxu0 %v11285_v18 }
 0x77e   : > { %v3432_v5 = vpop.xlane.xlu0 %3431 }
 0x77f   : > { %8779 = vrcp.f32 %v3432_v5 }
 0x782   : > { %v8772_v42 = vpop.eup %8771  ;;  %v3447_v16 = vpop.xlane.xlu0 %3446 }
 0x783   : > { %v8774_v11 = vpop.eup %8773  ;;  %8781 = vrcp.f32 %v3447_v16  ;;  %v3573_v10 = vmul.f32 %v8772_v42, %v10222_v63  ;;  %v11290_v63 = vld [vmem:[#allocation50_spill] sm:$0xff] }
 0x784   : > { %v8776_v44 = vpop.eup %8775  ;;  %v3579_v30 = vmul.f32 %v8774_v11, %v10224_v47 }
 0x785   : > { %8149 = vmatmul.mubr.msk.f32.gmra.mxu1 %vm3167_vm4, %v3573_v10  ;;  %v3575_v55 = vmul.f32 %v8776_v44, %v10229_v0 }
 0x786   : > { %v3435_v34 = vpop.xlane.xlu0 %3434  ;;  %8186 = vmatprep.mubr.msk.f32.mxu1 %vm8943_vm1, %v11285_v18 }
 0x787   : > { %8783 = vrcp.f32 %v3435_v34  ;;  %8165 = vmatmul.mubr.msk.f32.gmra.mxu0 %vm3167_vm4, %v3575_v55 }
 0x788   : > { %v8778_v17 = vpop.eup %8777  ;;  %v3471_v12 = vpop.xlane.xlu1 %3470  ;;  %8167 = vmatprep.mubr.msk.f32.mxu0 %vm8943_vm1, %v11285_v18 }
 0x789   : > { %8187 = vmatmul.mubr.msk.f32.vlgmr.msra.gmra.mxu1 %vm3167_vm4, %v3579_v30  ;;  %v3580_v47 = vmul.f32 %v8778_v17, %v10240_v40 }
 0x78a   : > { %8227 = vmatpush3.msk.msra.mxu1 %vm3638_vm10, %v11290_v63  ;;  %v3450_v0 = vpop.xlane.xlu0 %3449  ;;  %8189 = vmatprep.mubr.msk.f32.mxu1 %vm8943_vm1, %v11285_v18 }
 0x78b   : > { %8228 = vmatprep.subr.mxu1 %v11285_v18  ;;  %8785 = vrcp.f32 %v3450_v0  ;;  %v11296_v0 = vld [vmem:[#allocation37_spill] sm:$0xff] }
 0x78c   : > { %v8780_v24 = vpop.eup %8779  ;;  %v3459_v58 = vpop.xlane.xlu1 %3458  ;;  %8229 = vmatpush3.msra.mxu1 %v11291_v6 }
 0x78d   : > { %8230 = vmatprep.subr.mxu1 %v11285_v18  ;;  %8190 = vmatmul.mubr.msk.f32.gmra.mxu1 %vm3167_vm4, %v3580_v47  ;;  %v3576_v60 = vmul.f32 %v8780_v24, %v10248_v21 }
 0x78e   : > { %8231 = vmatpush3.msra.mxu1 %v11292_v4  ;;  %v3438_v59 = vpop.xlane.xlu0 %3437  ;;  %8192 = vmatprep.mubr.msk.f32.mxu1 %vm8943_vm1, %v11285_v18 }
 0x78f   : > { %8232 = vmatprep.subr.mxu1 %v11285_v18  ;;  %8787 = vrcp.f32 %v3438_v59  ;;  %8168 = vmatmul.mubr.msk.f32.gmra.mxu0 %vm3167_vm4, %v3576_v60  ;;  %v11298_v60 = vld [vmem:[#allocation53_spill] sm:$0xff] }
 0x790   : > { %v8782_v40 = vpop.eup %8781  ;;  %v3474_v15 = vpop.xlane.xlu1 %3473  ;;  %8233 = vmatpush3.msra.mxu1 %v11293_v2  ;;  %8170 = vmatprep.mubr.msk.f32.mxu0 %vm8943_vm1, %v11285_v18  ;;  %8789 = vrcp.f32 %v3456_v46  ;;  %v11301_v2 = vld [vmem:[#allocation48_spill] sm:$0xff] }
 0x791   : > { %8234 = vmatprep.subr.mxu1 %v11285_v18  ;;  %v3581_v21 = vmul.f32 %v8782_v40, %v10256_v61 }
 0x792   : > { %8235 = vmatpush3.msra.mxu1 %v11294_v22  ;;  %v3453_v56 = vpop.xlane.xlu0 %3452 }
 0x793   : > { %8791 = vrcp.f32 %v3453_v56  ;;  %8193 = vmatmul.mubr.msk.f32.gmra.mxu1 %vm3167_vm4, %v3581_v21  ;;  %8276 = vmatprep.subr.mxu1 %v11285_v18  ;;  %v11302_v21 = vld [vmem:[#allocation49_spill] sm:$0xff] }
 0x794   : > { %v8784_v38 = vpop.eup %8783  ;;  %v3462_v52 = vpop.xlane.xlu1 %3461  ;;  %8195 = vmatprep.mubr.msk.f32.mxu1 %vm8943_vm1, %v11285_v18  ;;  %8793 = vrcp.f32 %v3459_v58  ;;  %v11297_v58 = vld [vmem:[#allocation47_spill] sm:$0xff] }
 0x795   : > { %v3577_v8 = vmul.f32 %v8784_v38, %v10264_v57  ;;  %8795 = vrcp.f32 %v3471_v12 }
 0x796   : > { %v3465_v54 = vpop.xlane.xlu0 %3464  ;;  %8797 = vrcp.f32 %v3462_v52 }
 0x797   : > { %8171 = vmatmul.mubr.msk.f32.gmra.mxu0 %vm3167_vm4, %v3577_v8  ;;  %8799 = vrcp.f32 %v3474_v15 }
 0x798   : > { %v8786_v61 = vpop.eup %8785  ;;  %8173 = vmatprep.mubr.msk.f32.mxu0 %vm8943_vm1, %v11285_v18  ;;  %v3477_v5 = vpop.xlane.xlu1 %3476  ;;  %8801 = vrcp.f32 %v3465_v54  ;;  %v11304_v54 = vld [vmem:[#allocation43_spill] sm:$0xff] }
 0x799   : > { %v3582_v42 = vmul.f32 %v8786_v61, %v10267_v62  ;;  %8803 = vrcp.f32 %v3477_v5 }
 0x79a   : > { %v3468_v16 = vpop.xlane.xlu0 %3467 }
 0x79b   : > { %8196 = vmatmul.mubr.msk.f32.gmra.mxu1 %vm3167_vm4, %v3582_v42  ;;  %8805 = vrcp.f32 %v3468_v16 }
 0x79c   : > { %v8788_v11 = vpop.eup %8787  ;;  %8198 = vmatprep.mubr.msk.f32.mxu1 %vm8943_vm1, %v11285_v18  ;;  %v3480_v46 = vpop.xlane.xlu1 %3479 }
 0x79d   : > { %v3578_v57 = vmul.f32 %v8788_v11, %v10281_v26  ;;  %v8790_v10 = vpop.eup %8789  ;;  %8807 = vrcp.f32 %v3480_v46  ;;  %v11295_v26 = vld [vmem:[#allocation51_spill] sm:$0xff] }
 0x79e   : > { %v3486_v44 = vpop.xlane.xlu0 %3485  ;;  %v3584_v62 = vmul.f32 %v8790_v10, %v10235_v41 }
 0x79f   : > { %8174 = vmatmul.mubr.msk.f32.gmra.mxu0 %vm3167_vm4, %v3578_v57  ;;  %8809 = vrcp.f32 %v3486_v44 }
 0x7a0   : > { %v8792_v55 = vpop.eup %8791  ;;  %8211 = vmatprep.mubr.msk.f32.mxu0 %vm8943_vm1, %v11285_v18  ;;  %v3483_v63 = vpop.xlane.xlu1 %3482 }
 0x7a1   : > { %v3583_v34 = vmul.f32 %v8792_v55, %v10293_v9  ;;  %v8794_v30 = vpop.eup %8793  ;;  %8811 = vrcp.f32 %v3483_v63 }
 0x7a2   : > { %v10494_v17 = vpop.xlane.xlu0 %3500  ;;  %v8796_v12 = vpop.eup %8795  ;;  %v3585_v41 = vmul.f32 %v8794_v30, %v10274_v1  ;;  %v11300_v1 = vld [vmem:[#allocation42_spill] sm:$0xff] }
 0x7a3   : > { %8199 = vmatmul.mubr.msk.f32.gmra.mxu1 %vm3167_vm4, %v3583_v34  ;;  %8212 = vmatmul.mubr.msk.f32.vlgmr.msra.gmra.mxu0 %vm3167_vm4, %v3584_v62  ;;  %v3589_v9 = vmul.f32 %v8796_v12, %v10272_v39  ;;  %v8798_v47 = vpop.eup %8797  ;;  %v11299_v39 = vld [vmem:[#allocation40_spill] sm:$0xff] }
 0x7a4   : > { %8252 = vmatpush3.msk.msra.mxu0 %vm3638_vm10, %v11295_v26  ;;  %8214 = vmatprep.mubr.msk.f32.mxu0 %vm8943_vm1, %v11285_v18  ;;  %v8800_v6 = vpop.eup %8799  ;;  %v3586_v4 = vmul.f32 %v8798_v47, %v10298_v14  ;;  %v3495_v61 = vpop.xlane.xlu1 %3494 }
 0x7a5   : > { %8253 = vmatprep.subr.mxu0 %v11285_v18  ;;  %8236 = vmatprep.mubr.msk.f32.mxu1 %vm8943_vm1, %v11285_v18  ;;  %v8802_v59 = vpop.eup %8801  ;;  %v3590_v40 = vmul.f32 %v8800_v6, %v10287_v35 }
 0x7a6   : > { %8254 = vmatpush3.msra.mxu0 %v11296_v0  ;;  %v3489_v24 = vpop.xlane.xlu0 %3488  ;;  %v8804_v15 = vpop.eup %8803  ;;  %v3587_v14 = vmul.f32 %v8802_v59, %v10302_v31 }
 0x7a7   : > { %8255 = vmatprep.subr.mxu0 %v11285_v18  ;;  %8215 = vmatmul.mubr.msk.f32.gmra.mxu0 %vm3167_vm4, %v3585_v41  ;;  %8813 = vrcp.f32 %v3489_v24  ;;  %v3591_v35 = vmul.f32 %v8804_v15, %v10306_v7 }
 0x7a8   : > { %8237 = vmatmul.mubr.msk.f32.vlgmr.msra.gmra.mxu1 %vm3167_vm4, %v3589_v9  ;;  %8256 = vmatpush3.msra.mxu0 %v11297_v58  ;;  %v8806_v22 = vpop.eup %8805  ;;  %v3498_v42 = vpop.xlane.xlu1 %3497 }
 0x7a9   : > { %8277 = vmatpush3.msk.msra.mxu1 %vm3638_vm10, %v11298_v60  ;;  %8257 = vmatprep.subr.mxu0 %v11285_v18  ;;  %v3588_v31 = vmul.f32 %v8806_v22, %v10310_v51 }
 0x7aa   : > { %8278 = vmatprep.subr.mxu1 %v11285_v18  ;;  %8258 = vmatpush3.msra.mxu0 %v11299_v39  ;;  %v8808_v56 = vpop.eup %8807 }
 0x7ab   : > { %8279 = vmatpush3.msra.mxu1 %v11300_v1  ;;  %8217 = vmatprep.mubr.msk.f32.mxu0 %vm8943_vm1, %v11285_v18  ;;  %v3592_v7 = vmul.f32 %v8808_v56, %v10314_v3  ;;  %v11303_v3 = vld [vmem:[#allocation52_spill] sm:$0xff] }
 0x7ac   : > { %8239 = vmatprep.mubr.msk.f32.mxu1 %vm8943_vm1, %v11285_v18  ;;  %8259 = vmatprep.subr.mxu0 %v11285_v18  ;;  %v8810_v38 = vpop.eup %8809 }
 0x7ad   : > { %8280 = vmatprep.subr.mxu1 %v11285_v18  ;;  %8218 = vmatmul.mubr.msk.f32.gmra.mxu0 %vm3167_vm4, %v3586_v4  ;;  %v3594_v52 = vmul.f32 %v8810_v38, %v10318_v45 }
 0x7ae   : > { %8240 = vmatmul.mubr.msk.f32.gmra.mxu1 %vm3167_vm4, %v3590_v40  ;;  %8260 = vmatpush3.msra.mxu0 %v11301_v2 }
 0x7af   : > { %8281 = vmatpush3.msra.mxu1 %v11302_v21  ;;  %8220 = vmatprep.mubr.msk.f32.mxu0 %vm8943_vm1, %v11285_v18 }
 0x7b0   : > { %8282 = vmatprep.subr.mxu1 %v11285_v18  ;;  %8242 = vmatprep.mubr.msk.f32.mxu1 %vm8943_vm1, %v11285_v18 }
 0x7b1   : > { %8283 = vmatpush3.msra.mxu1 %v10426_v32  ;;  %8221 = vmatmul.mubr.msk.f32.gmra.mxu0 %vm3167_vm4, %v3587_v14  ;;  %v8812_v32 = vpop.eup %8811 }
 0x7b2   : > { %8243 = vmatmul.mubr.msk.f32.gmra.mxu1 %vm3167_vm4, %v3591_v35  ;;  %8223 = vmatprep.mubr.msk.f32.mxu0 %vm8943_vm1, %v11285_v18  ;;  %v3593_v8 = vmul.f32 %v8812_v32, %v10322_v36  ;;  %v11305_v36 = vld [vmem:[#allocation44_spill] sm:$0xff] }
 0x7b3   : > { %8245 = vmatprep.mubr.msk.f32.mxu1 %vm8943_vm1, %v11285_v18  ;;  %8301 = vmatprep.subr.mxu0 %v11285_v18 }
 0x7b4   : > { %8284 = vmatprep.subr.mxu1 %v11285_v18  ;;  %v8814_v51 = vpop.eup %8813 }
 0x7b5   : > { %8224 = vmatmul.mubr.msk.f32.gmra.mxu0 %vm3167_vm4, %v3588_v31  ;;  %v3595_v45 = vmul.f32 %v8814_v51, %v10334_v49 }
 0x7b6   : > { %8246 = vmatmul.mubr.msk.f32.gmra.mxu1 %vm3167_vm4, %v3592_v7  ;;  %8261 = vmatprep.mubr.msk.f32.mxu0 %vm8943_vm1, %v11285_v18 }
 0x7b7   : > { %8248 = vmatprep.mubr.msk.f32.mxu1 %vm8943_vm1, %v11285_v18 }
 0x7b9   : > { %8262 = vmatmul.mubr.msk.f32.vlgmr.msra.gmra.mxu0 %vm3167_vm4, %v3594_v52 }
 0x7ba   : > { %8249 = vmatmul.mubr.msk.f32.gmra.mxu1 %vm3167_vm4, %v3593_v8  ;;  %8302 = vmatpush3.msk.msra.mxu0 %vm3638_vm10, %v11303_v3  ;;  %vm4723_vm10 = vcmask 64512  }
 0x7bb   : > { %8303 = vmatprep.subr.mxu0 %v11285_v18  ;;  %8264 = vmatprep.mubr.msk.f32.mxu0 %vm8943_vm1, %v11285_v18 }
 0x7bc   : > { %8304 = vmatpush3.msra.mxu0 %v11304_v54  ;;  %8286 = vmatprep.mubr.msk.f32.mxu1 %vm8943_vm1, %v11285_v18 }
 0x7bd   : > { %8305 = vmatprep.subr.mxu0 %v11285_v18  ;;  %8265 = vmatmul.mubr.msk.f32.gmra.mxu0 %vm3167_vm4, %v3595_v45 }
 0x7be   : > { %8306 = vmatpush3.msra.mxu0 %v11305_v36  ;;  %8267 = vmatprep.mubr.msk.f32.mxu0 %vm8943_vm1, %v11285_v18 }
 0x7bf   : > { %8307 = vmatprep.subr.mxu0 %v11285_v18 }
 0x7c0   : > { %8308 = vmatpush3.msra.mxu0 %v10349_v27 }
 0x7c1   : > { %8309 = vmatprep.subr.mxu0 %v11285_v18 }
 0x7c4   : > { %v3504_v49 = vpop.xlane.xlu0 %3503 }
 0x7c8   : > { %v3492_v5 = vpop.xlane.xlu0 %3491 }
 0x7c9   : > { %8815 = vrcp.f32 %v3492_v5 }
 0x7ca   : > { %8817 = vrcp.f32 %v3495_v61 }
 0x7cb   : > { %8819 = vrcp.f32 %v3498_v42 }
 0x7cc   : > { %8821 = vrcp.f32 %v10494_v17  ;;  %v3507_v16 = vpop.xlane.xlu0 %3506 }
 0x7cd   : > { %8823 = vrcp.f32 %v3504_v49 }
 0x7d4   : > { %v3510_v46 = vpop.xlane.xlu0 %3509 }
 0x7d5   : > { %v3516_v11 = vpop.xlane.xlu1 %3515 }
 0x7d6   : > { %v8816_v57 = vpop.eup %8815  ;;  %8825 = vrcp.f32 %v3516_v11 }
 0x7d7   : > { %v3596_v10 = vmul.f32 %v8816_v57, %v10367_v43  ;;  %v8818_v44 = vpop.eup %8817  ;;  %8827 = vrcp.f32 %v3507_v16 }
 0x7d8   : > { %v3597_v55 = vmul.f32 %v8818_v44, %v10330_v23  ;;  %v8820_v62 = vpop.eup %8819 }
 0x7d9   : > { %v3519_v27 = vpop.xlane.xlu1 %3518  ;;  %8268 = vmatmul.mubr.msk.f32.gmra.mxu0 %vm3167_vm4, %v3596_v10  ;;  %v8822_v43 = vpop.eup %8821  ;;  %v3598_v17 = vmul.f32 %v8820_v62, %v10338_v28 }
 0x7da   : > { %8270 = vmatprep.mubr.msk.f32.mxu0 %vm8943_vm1, %v11285_v18  ;;  %8829 = vrcp.f32 %v3519_v27  ;;  %v3599_v26 = vmul.f32 %v8822_v43, %v10326_v13  ;;  %v8824_v23 = vpop.eup %8823 }
 0x7db   : > { %8831 = vrcp.f32 %v3510_v46  ;;  %v3600_v13 = vmul.f32 %v8824_v23, %v10361_v19 }
 0x7dc   : > { %v3513_v34 = vpop.xlane.xlu0 %3512 }
 0x7dd   : > { %v3522_v30 = vpop.xlane.xlu1 %3521  ;;  %8271 = vmatmul.mubr.msk.f32.gmra.mxu0 %vm3167_vm4, %v3597_v55 }
 0x7de   : > { %8273 = vmatprep.mubr.msk.f32.mxu0 %vm8943_vm1, %v11285_v18  ;;  %8833 = vrcp.f32 %v3522_v30 }
 0x7df   : > { %8835 = vrcp.f32 %v3513_v34 }
 0x7e1   : > { %v3525_v12 = vpop.xlane.xlu0 %3524  ;;  %v4337_v63 = vpop.permute.xlu1 %4336  ;;  %8274 = vmatmul.mubr.msk.f32.gmra.mxu0 %vm3167_vm4, %v3598_v17 }
 0x7e2   : > { %8285 = vmatpush3.msra.mxu1 %v4337_v63  ;;  %8311 = vmatprep.mubr.msk.f32.mxu0 %vm8943_vm1, %v11285_v18  ;;  %8837 = vrcp.f32 %v3525_v12 }
 0x7e3   : > { %8287 = vmatmul.mubr.msk.f32.vlgmr.msra.gmra.mxu1 %vm3167_vm4, %v3599_v26  ;;  %8326 = vmatprep.subr.mxu1 %v11285_v18  ;;  %v8826_v28 = vpop.eup %8825  ;;  %v4762_v26 = vld [vmem:[%s11306_s28 + $0x18] sm:$0xff] }
 0x7e4   : > { %8289 = vmatprep.mubr.msk.f32.mxu1 %vm8943_vm1, %v11285_v18  ;;  %v8828_v9 = vpop.eup %8827  ;;  %v3604_v0 = vmul.f32 %v8826_v28, %v10394_v33  ;;  %8327 = vmatpush3.msra.mxu1 %v4762_v26 }
 0x7e5   : > { %v3528_v41 = vpop.xlane.xlu0 %3527  ;;  %v3601_v58 = vmul.f32 %v8828_v9, %v10382_v20  ;;  %8328 = vmatprep.subr.mxu1 %v11285_v18 }
 0x7e6   : > { %8839 = vrcp.f32 %v3528_v41 }
 0x7e7   : > { %8290 = vmatmul.mubr.msk.f32.gmra.mxu1 %vm3167_vm4, %v3600_v13  ;;  %v8830_v24 = vpop.eup %8829 }
 0x7e8   : > { %8292 = vmatprep.mubr.msk.f32.mxu1 %vm8943_vm1, %v11285_v18  ;;  %v8832_v6 = vpop.eup %8831  ;;  %v3605_v19 = vmul.f32 %v8830_v24, %v10401_v53 }
 0x7e9   : > { %v4458_v47 = vpop.permute.xlu0 %4457  ;;  %v3602_v60 = vmul.f32 %v8832_v6, %v10392_v25 }
 0x7ea   : > { %8310 = vmatpush3.msra.mxu0 %v4458_v47 }
 0x7eb   : > { %8312 = vmatmul.mubr.msk.f32.vlgmr.msra.gmra.mxu0 %vm3167_vm4, %v3604_v0  ;;  %8349 = vmatprep.subr.mxu0 %v11285_v18  ;;  %v8834_v33 = vpop.eup %8833 }
 0x7ec   : > { %8293 = vmatmul.mubr.msk.f32.gmra.mxu1 %vm3167_vm4, %v3601_v58  ;;  %8314 = vmatprep.mubr.msk.f32.mxu0 %vm8943_vm1, %v11285_v18  ;;  %v8836_v39 = vpop.eup %8835  ;;  %v3606_v20 = vmul.f32 %v8834_v33, %v10410_v50 }
 0x7ed   : > { %8295 = vmatprep.mubr.msk.f32.mxu1 %vm8943_vm1, %v11285_v18  ;;  %v3603_v4 = vmul.f32 %v8836_v39, %v10408_v37 }
 0x7ef   : > { %8315 = vmatmul.mubr.msk.f32.gmra.mxu0 %vm3167_vm4, %v3605_v19  ;;  %v8838_v1 = vpop.eup %8837 }
 0x7f0   : > { %8296 = vmatmul.mubr.msk.f32.gmra.mxu1 %vm3167_vm4, %v3602_v60  ;;  %8317 = vmatprep.mubr.msk.f32.mxu0 %vm8943_vm1, %v11285_v18  ;;  %v3607_v53 = vmul.f32 %v8838_v1, %v10416_v29  ;;  %v4761_v60 = vld [vmem:[%s11306_s28 + $0x10] sm:$0xff]  ;;  %v4760_v1 = vld [vmem:[%s11306_s28 + $0x8] sm:$0xff] }
 0x7f1   : > { %8298 = vmatprep.mubr.msk.f32.mxu1 %vm8943_vm1, %v11285_v18  ;;  %8329 = vmatpush3.msra.mxu1 %v4761_v60 }
 0x7f2   : > { %8330 = vmatprep.subr.mxu1 %v11285_v18 }
 0x7f3   : > { %8318 = vmatmul.mubr.msk.f32.gmra.mxu0 %vm3167_vm4, %v3606_v20  ;;  %v8840_v59 = vpop.eup %8839  ;;  %8331 = vmatpush3.msra.mxu1 %v4760_v1 }
 0x7f4   : > { %8299 = vmatmul.mubr.msk.f32.gmra.mxu1 %vm3167_vm4, %v3603_v4  ;;  %8320 = vmatprep.mubr.msk.f32.mxu0 %vm8943_vm1, %v11285_v18  ;;  %v10620_v25 = vpop.f32.mrf.mxu1  ;;  %v3608_v37 = vmul.f32 %v8840_v59, %v10420_v48 }
 0x7f5   : > { %8334 = vmatprep.mubr.msk.f32.mxu1 %vm8943_vm1, %v11285_v18  ;;  %8332 = vmatprep.subr.mxu1 %v11285_v18 }
 0x7f6   : > { %v8138_v40 = vpop.f32.mrf.mxu1 }
 0x7f7   : > { %8321 = vmatmul.mubr.msk.f32.gmra.mxu0 %vm3167_vm4, %v3607_v53 }
 0x7f8   : > { %8323 = vmatprep.mubr.msk.f32.mxu0 %vm8943_vm1, %v11285_v18 }
 0x7fb   : > { %8324 = vmatmul.mubr.msk.f32.gmra.mxu0 %vm3167_vm4, %v3608_v37  ;;  %vm4747_vm4 = vcmask 195584  }
 0x7fc   : > { %8357 = vmatprep.mubr.msk.f32.mxu0 %vm8943_vm1, %v11285_v18 }
 0x7fd   : > { %v10632_v50 = vpop.f32.mrf.mxu1 }
 0x7ff   : > { %v8141_v29 = vpop.f32.mrf.mxu1 }
 0x800   : > { %v4759_v29 = vld [vmem:[%s11306_s28] sm:$0xff] }
 0x801   : > { %8333 = vmatpush3.msra.mxu1 %v4759_v29 }
 0x802   : > { %8372 = vmatprep.subr.mxu1 %v11285_v18 }
 0x805   : > { %v10634_v15 = vpop.f32.mrf.mxu1 }
 0x807   : > { %v8144_v2 = vpop.f32.mrf.mxu1 }
 0x80e   : > { %v10636_v21 = vpop.f32.mrf.mxu1 }
 0x810   : > { %v8147_v14 = vpop.f32.mrf.mxu1 }
 0x832   : > { %v3828_v22 = vpop.f32.mrf.mxu0 }
 0x833   : > { %4583 = vrot.lane.b32.xlu1 %v3828_v22, %s11215_s2 }
 0x834   : > { %v8163_v35 = vpop.f32.mrf.mxu0 }
 0x845   : > { %v10639_v48 = vpop.f32.mrf.mxu1 }
 0x847   : > { %v8150_v56 = vpop.f32.mrf.mxu1  ;;  %v3833_v31 = vpop.f32.mrf.mxu0 }
 0x848   : > { %4585 = vrot.lane.b32.xlu1 %v3833_v31, %s11215_s2 }
 0x849   : > { %v8166_v38 = vpop.f32.mrf.mxu0  ;;  %v3949_v7 = vpop.f32.mrf.mxu1 }
 0x84a   : > { %4603 = vrot.lane.b32.xlu0 %v3949_v7, %s11214_s15 }
 0x84b   : > { %v8188_v32 = vpop.f32.mrf.mxu1 }
 0x84d   : > { %v3954_v52 = vpop.f32.mrf.mxu1 }
 0x84e   : > { %4605 = vrot.lane.b32.xlu1 %v3954_v52, %s11214_s15 }
 0x84f   : > { %v3838_v51 = vpop.f32.mrf.mxu0  ;;  %v8191_v8 = vpop.f32.mrf.mxu1 }
 0x850   : > { %4587 = vrot.lane.b32.xlu0 %v3838_v51, %s11215_s2 }
 0x851   : > { %v8169_v3 = vpop.f32.mrf.mxu0 }
 0x853   : > { %v3959_v45 = vpop.f32.mrf.mxu1 }
 0x854   : > { %4607 = vrot.lane.b32.xlu0 %v3959_v45, %s11214_s15 }
 0x855   : > { %v8194_v54 = vpop.f32.mrf.mxu1 }
 0x857   : > { %v3843_v36 = vpop.f32.mrf.mxu0 }
 0x858   : > { %4589 = vrot.lane.b32.xlu1 %v3843_v36, %s11215_s2 }
 0x859   : > { %v8172_v49 = vpop.f32.mrf.mxu0 }
 0x85b   : > { %v3964_v61 = vpop.f32.mrf.mxu1 }
 0x85c   : > { %4609 = vrot.lane.b32.xlu1 %v3964_v61, %s11214_s15 }
 0x85d   : > { %v8197_v5 = vpop.f32.mrf.mxu1 }
 0x85f   : > { %v3848_v42 = vpop.f32.mrf.mxu0 }
 0x860   : > { %4591 = vrot.lane.b32.xlu0 %v3848_v42, %s11215_s2  ;;  %s11219_s2 = smov 24  }
 0x861   : > { %v8175_v16 = vpop.f32.mrf.mxu0 }
 0x863   : > { %v3969_v11 = vpop.f32.mrf.mxu1  ;;  %v4070_v57 = vpop.f32.mrf.mxu0 }
 0x864   : > { %4611 = vrot.lane.b32.xlu0 %v3969_v11, %s11214_s15  ;;  %4623 = vrot.lane.b32.xlu1 %v4070_v57, %s11222_s11  ;;  %s11220_s15 = smov 20  }
 0x865   : > { %v8200_v10 = vpop.f32.mrf.mxu1  ;;  %v8213_v44 = vpop.f32.mrf.mxu0 }
 0x867   : > { %v4075_v46 = vpop.f32.mrf.mxu0 }
 0x868   : > { %v4191_v27 = vpop.f32.mrf.mxu1  ;;  %4625 = vrot.lane.b32.xlu1 %v4075_v46, %s11222_s11 }
 0x869   : > { %4643 = vrot.lane.b32.xlu0 %v4191_v27, %s11221_s0  ;;  %v8216_v55 = vpop.f32.mrf.mxu0 }
 0x86a   : > { %v8238_v62 = vpop.f32.mrf.mxu1 }
 0x86d   : > { %v4080_v34 = vpop.f32.mrf.mxu0 }
 0x86e   : > { %v4196_v30 = vpop.f32.mrf.mxu1  ;;  %4627 = vrot.lane.b32.xlu0 %v4080_v34, %s11222_s11 }
 0x86f   : > { %4645 = vrot.lane.b32.xlu1 %v4196_v30, %s11221_s0  ;;  %v8219_v43 = vpop.f32.mrf.mxu0 }
 0x870   : > { %v8241_v17 = vpop.f32.mrf.mxu1 }
 0x871   : > { %v4085_v12 = vpop.f32.mrf.mxu0 }
 0x872   : > { %v4201_v63 = vpop.f32.mrf.mxu1 }
 0x873   : > { %4647 = vrot.lane.b32.xlu0 %v4201_v63, %s11221_s0  ;;  %4629 = vrot.lane.b32.xlu1 %v4085_v12, %s11222_s11  ;;  %v8222_v23 = vpop.f32.mrf.mxu0 }
 0x874   : > { %v8244_v41 = vpop.f32.mrf.mxu1 }
 0x875   : > { %v4090_v28 = vpop.f32.mrf.mxu0 }
 0x876   : > { %v4206_v13 = vpop.f32.mrf.mxu1 }
 0x877   : > { %4649 = vrot.lane.b32.xlu1 %v4206_v13, %s11221_s0  ;;  %v8225_v9 = vpop.f32.mrf.mxu0 }
 0x878   : > { %v8247_v0 = vpop.f32.mrf.mxu1 }
 0x879   : > { %v4312_v47 = vpop.f32.mrf.mxu0 }
 0x87a   : > { %v4211_v24 = vpop.f32.mrf.mxu1  ;;  %4663 = vrot.lane.b32.xlu0 %v4312_v47, %s11220_s15 }
 0x87b   : > { %v8263_v58 = vpop.f32.mrf.mxu0 }
 0x87c   : > { %v8250_v6 = vpop.f32.mrf.mxu1 }
 0x87d   : > { %v4317_v19 = vpop.f32.mrf.mxu0 }
 0x87e   : > { %4665 = vrot.lane.b32.xlu1 %v4317_v19, %s11220_s15 }
 0x87f   : > { %v8266_v33 = vpop.f32.mrf.mxu0 }
 0x899   : > { %v4322_v39 = vpop.f32.mrf.mxu0 }
 0x89b   : > { %v8269_v20 = vpop.f32.mrf.mxu0 }
 0x89d   : > { %v4327_v4 = vpop.f32.mrf.mxu0 }
 0x89f   : > { %v8272_v53 = vpop.f32.mrf.mxu0 }
 0x8a1   : > { %v4332_v59 = vpop.f32.mrf.mxu0 }
 0x8a3   : > { %v8275_v40 = vpop.f32.mrf.mxu0  ;;  %v4433_v37 = vpop.f32.mrf.mxu1 }
 0x8a4   : > { %4683 = vrot.lane.b32.xlu0 %v4433_v37, %s11219_s2 }
 0x8a5   : > { %v8288_v2 = vpop.f32.mrf.mxu1  ;;  %v4584_v42 = vpop.permute.xlu1 %4583 }
 0x8a6   : > { %v4718_v47 = vsel %vm2136_vm9, %v10620_v25, %v4584_v42 }
 0x8a7   : > { %v4438_v14 = vpop.f32.mrf.mxu1 }
 0x8a8   : > { %4685 = vrot.lane.b32.xlu1 %v4438_v14, %s11219_s2  ;;  %4667 = vrot.lane.b32.xlu0 %v4322_v39, %s11220_s15 }
 0x8a9   : > { %v8291_v22 = vpop.f32.mrf.mxu1 }
 0x8ab   : > { %v4554_v35 = vpop.f32.mrf.mxu0 }
 0x8ac   : > { %v4443_v56 = vpop.f32.mrf.mxu1  ;;  %4669 = vrot.lane.b32.xlu1 %v4327_v4, %s11220_s15 }
 0x8ad   : > { %4687 = vrot.lane.b32.xlu0 %v4443_v56, %s11219_s2  ;;  %v8313_v31 = vpop.f32.mrf.mxu0 }
 0x8ae   : > { %v8294_v38 = vpop.f32.mrf.mxu1 }
 0x8af   : > { %v4559_v7 = vpop.f32.mrf.mxu0 }
 0x8b0   : > { %v4448_v32 = vpop.f32.mrf.mxu1 }
 0x8b1   : > { %4689 = vrot.lane.b32.xlu1 %v4448_v32, %s11219_s2  ;;  %4703 = vrot.lane.b32.xlu0 %v4554_v35, %s11218_s26  ;;  %v8316_v52 = vpop.f32.mrf.mxu0 }
 0x8b2   : > { %v8297_v51 = vpop.f32.mrf.mxu1 }
 0x8b3   : > { %v4564_v8 = vpop.f32.mrf.mxu0 }
 0x8b4   : > { %v4453_v3 = vpop.f32.mrf.mxu1 }
 0x8b5   : > { %4631 = vrot.lane.b32.xlu0 %v4090_v28, %s11222_s11  ;;  %4705 = vrot.lane.b32.xlu1 %v4559_v7, %s11218_s26  ;;  %v8319_v45 = vpop.f32.mrf.mxu0  ;;  %s11320_s11 = sld [smem:[#allocation17_spill]] }
 0x8b6   : > { %v8300_v54 = vpop.f32.mrf.mxu1 }
 0x8b7   : > { %v4569_v36 = vpop.f32.mrf.mxu0 }
 0x8b9   : > { %4671 = vrot.lane.b32.xlu1 %v4332_v59, %s11220_s15  ;;  %4707 = vrot.lane.b32.xlu0 %v4564_v8, %s11218_s26  ;;  %v8322_v49 = vpop.f32.mrf.mxu0  ;;  %s11315_s15 = sld [smem:[#allocation13_spill]] }
 0x8ba   : > { %v4586_v16 = vpop.permute.xlu1 %4585 }
 0x8bb   : > { %v4574_v61 = vpop.f32.mrf.mxu0  ;;  %v4719_v60 = vsel %vm2136_vm9, %v10632_v50, %v4586_v16 }
 0x8bc   : > { %v4604_v11 = vpop.permute.xlu0 %4603 }
 0x8bd   : > { %4651 = vrot.lane.b32.xlu0 %v4211_v24, %s11221_s0  ;;  %4709 = vrot.lane.b32.xlu1 %v4569_v36, %s11218_s26  ;;  %v8325_v5 = vpop.f32.mrf.mxu0  ;;  %v4724_v24 = vsel %vm4723_vm10, %v4718_v47, %v4604_v11  ;;  %v11310_v47 = vld [vmem:[#allocation31_spill] sm:$0xff]  ;;  %s11319_s0 = sld [smem:[#allocation20_spill]] }
 0x8c0   : > { %v4606_v57 = vpop.permute.xlu1 %4605 }
 0x8c1   : > { %4691 = vrot.lane.b32.xlu0 %v4453_v3, %s11219_s2  ;;  %4711 = vrot.lane.b32.xlu1 %v4574_v61, %s11218_s26  ;;  %v4725_v20 = vsel %vm4723_vm10, %v4719_v60, %v4606_v57  ;;  %s11307_s26 = sld [smem:[#allocation11_spill]]  ;;  %v11311_v60 = vld [vmem:[#allocation32_spill] sm:$0xff] }
 0x8c2   : > { %v4588_v10 = vpop.permute.xlu0 %4587  ;;  %s11314_s2 = sld [smem:[#allocation12_spill]] }
 0x8c3   : > { %v4720_v37 = vsel %vm2136_vm9, %v10634_v15, %v4588_v10 }
 0x8c6   : > { %v4608_v46 = vpop.permute.xlu0 %4607 }
 0x8c7   : > { %v4726_v29 = vsel %vm4723_vm10, %v4720_v37, %v4608_v46 }
 0x8ca   : > { %v4590_v44 = vpop.permute.xlu1 %4589 }
 0x8cb   : > { %v4721_v15 = vsel %vm2136_vm9, %v10636_v21, %v4590_v44 }
 0x8ce   : > { %v4610_v27 = vpop.permute.xlu1 %4609 }
 0x8cf   : > { %v4727_v7 = vsel %vm4723_vm10, %v4721_v15, %v4610_v27  ;;  %v7477_v27 = vld [vmem:[%s11307_s26] ss:$0 sm:$0xff]  ;;  %s11313_s26 = sld [smem:[#allocation14_spill]] }
 0x8d2   : > { %v4592_v55 = vpop.permute.xlu0 %4591 }
 0x8d3   : > { %v4722_v45 = vsel %vm2136_vm9, %v10639_v48, %v4592_v55 }
 0x8d6   : > { %v4624_v62 = vpop.permute.xlu1 %4623  ;;  %v4612_v34 = vpop.permute.xlu0 %4611 }
 0x8d7   : > { %v4730_v19 = vsel %vm4729_vm14, %v4724_v24, %v4624_v62  ;;  %v4728_v54 = vsel %vm4723_vm10, %v4722_v45, %v4612_v34 }
 0x8da   : > { %v4626_v30 = vpop.permute.xlu1 %4625 }
 0x8db   : > { %v4644_v43 = vpop.permute.xlu0 %4643  ;;  %v4731_v53 = vsel %vm4729_vm14, %v4725_v20, %v4626_v30  ;;  %v11308_v30 = vld [vmem:[#allocation29_spill] sm:$0xff] }
 0x8dc   : > { %v4736_v33 = vsel %vm4735_vm15, %v4730_v19, %v4644_v43 }
 0x8e0   : > { %v4628_v12 = vpop.permute.xlu0 %4627 }
 0x8e1   : > { %v4646_v17 = vpop.permute.xlu1 %4645  ;;  %v4732_v35 = vsel %vm4729_vm14, %v4726_v29, %v4628_v12 }
 0x8e2   : > { %v4737_v40 = vsel %vm4735_vm15, %v4731_v53, %v4646_v17  ;;  %v11312_v53 = vld [vmem:[#allocation33_spill] sm:$0xff] }
 0x8e5   : > { %v4630_v26 = vpop.permute.xlu1 %4629  ;;  %v4648_v63 = vpop.permute.xlu0 %4647 }
 0x8e6   : > { %v4738_v31 = vsel %vm4735_vm15, %v4732_v35, %v4648_v63  ;;  %v4733_v8 = vsel %vm4729_vm14, %v4727_v7, %v4630_v26 }
 0x8e9   : > { %v4650_v23 = vpop.permute.xlu1 %4649 }
 0x8ea   : > { %v4739_v21 = vsel %vm4735_vm15, %v4733_v8, %v4650_v23  ;;  %v11309_v23 = vld [vmem:[#allocation30_spill] sm:$0xff] }
 0x8ec   : > { %v4664_v41 = vpop.permute.xlu0 %4663 }
 0x8ed   : > { %v4742_v39 = vsel %vm4741_vm0, %v4736_v33, %v4664_v41 }
 0x8f0   : > { %v4666_v28 = vpop.permute.xlu1 %4665 }
 0x8f1   : > { %v4743_v50 = vsel %vm4741_vm0, %v4737_v40, %v4666_v28 }
 0x916   : > { %v4684_v13 = vpop.permute.xlu0 %4683 }
 0x917   : > { %v4748_v25 = vsel %vm4747_vm4, %v4742_v39, %v4684_v13 }
 0x91a   : > { %v4686_v9 = vpop.permute.xlu1 %4685  ;;  %v4668_v0 = vpop.permute.xlu0 %4667 }
 0x91b   : > { %v4749_v2 = vsel %vm4747_vm4, %v4743_v50, %v4686_v9  ;;  %v4744_v38 = vsel %vm4741_vm0, %v4738_v31, %v4668_v0 }
 0x91e   : > { %v4670_v6 = vpop.permute.xlu1 %4669 }
 0x91f   : > { %v4688_v58 = vpop.permute.xlu0 %4687  ;;  %v4745_v36 = vsel %vm4741_vm0, %v4739_v21, %v4670_v6 }
 0x920   : > { %v4750_v32 = vsel %vm4747_vm4, %v4744_v38, %v4688_v58 }
 0x923   : > { %v4690_v1 = vpop.permute.xlu1 %4689  ;;  %v4704_v4 = vpop.permute.xlu0 %4703 }
 0x924   : > { %v4754_v59 = vsel %vm4753_vm6, %v4748_v25, %v4704_v4  ;;  %v4751_v49 = vsel %vm4747_vm4, %v4745_v36, %v4690_v1 }
 0x925   : > { %8335 = vmatmul.mubr.msk.f32.vlgmr.msra.gmra.mxu1 %vm1674_vm5, %v4754_v59 }
 0x926   : > { %8337 = vmatprep.mubr.msk.f32.mxu1 %vm8943_vm1, %v11285_v18 }
 0x927   : > { %v4632_v14 = vpop.permute.xlu0 %4631  ;;  %v4706_v22 = vpop.permute.xlu1 %4705 }
 0x928   : > { %v4755_v56 = vsel %vm4753_vm6, %v4749_v2, %v4706_v22  ;;  %v4734_v61 = vsel %vm4729_vm14, %v4728_v54, %v4632_v14 }
 0x929   : > { %8338 = vmatmul.mubr.msk.f32.gmra.mxu1 %vm1674_vm5, %v4755_v56 }
 0x92a   : > { %8340 = vmatprep.mubr.msk.f32.mxu1 %vm8943_vm1, %v11285_v18 }
 0x92b   : > { %v4672_v52 = vpop.permute.xlu1 %4671  ;;  %v4708_v51 = vpop.permute.xlu0 %4707 }
 0x92c   : > { %v4756_v3 = vsel %vm4753_vm6, %v4750_v32, %v4708_v51 }
 0x92d   : > { %8341 = vmatmul.mubr.msk.f32.gmra.mxu1 %vm1674_vm5, %v4756_v3 }
 0x92e   : > { %8343 = vmatprep.mubr.msk.f32.mxu1 %vm8943_vm1, %v11285_v18 }
 0x92f   : > { %v4652_v5 = vpop.permute.xlu0 %4651  ;;  %v4710_v42 = vpop.permute.xlu1 %4709 }
 0x930   : > { %v4740_v48 = vsel %vm4735_vm15, %v4734_v61, %v4652_v5  ;;  %v4757_v16 = vsel %vm4753_vm6, %v4751_v49, %v4710_v42 }
 0x931   : > { %8344 = vmatmul.mubr.msk.f32.gmra.mxu1 %vm1674_vm5, %v4757_v16  ;;  %v4746_v11 = vsel %vm4741_vm0, %v4740_v48, %v4672_v52  ;;  %v4972_v48 = vld [vmem:[%s11313_s26 + $0x18] sm:$0xff]  ;;  %v4971_v16 = vld [vmem:[%s11313_s26 + $0x10] sm:$0xff] }
 0x932   : > { %8346 = vmatprep.mubr.msk.f32.mxu1 %vm8943_vm1, %v11285_v18  ;;  %8350 = vmatpush3.msra.mxu0 %v4972_v48 }
 0x933   : > { %v4692_v57 = vpop.permute.xlu0 %4691  ;;  %v4712_v10 = vpop.permute.xlu1 %4711  ;;  %8351 = vmatprep.subr.mxu0 %v11285_v18 }
 0x934   : > { %v4752_v44 = vsel %vm4747_vm4, %v4746_v11, %v4692_v57  ;;  %v4970_v11 = vld [vmem:[%s11313_s26 + $0x8] sm:$0xff]  ;;  %8352 = vmatpush3.msra.mxu0 %v4971_v16  ;;  %v4969_v57 = vld [vmem:[%s11313_s26] sm:$0xff] }
 0x935   : > { %v4758_v46 = vsel %vm4753_vm6, %v4752_v44, %v4712_v10  ;;  %8353 = vmatprep.subr.mxu0 %v11285_v18 }
 0x936   : > { %8347 = vmatmul.mubr.msk.f32.gmra.mxu1 %vm1674_vm5, %v4758_v46  ;;  %8354 = vmatpush3.msra.mxu0 %v4970_v11 }
 0x937   : > { %8404 = vmatprep.mubr.msk.f32.mxu1 %vm8943_vm1, %v11285_v18  ;;  %8355 = vmatprep.subr.mxu0 %v11285_v18 }
 0x938   : > { %8356 = vmatpush3.msra.mxu0 %v4969_v57 }
 0x939   : > { %8419 = vmatprep.subr.mxu0 %v11285_v18 }
 0x9e5   : > { %v4851_v55 = vpop.f32.mrf.mxu1 }
 0x9e6   : > { %v4852_v62 = vadd.f32 %v7477_v27, %v4851_v55 }
 0x9e7   : > { %v8336_v34 = vpop.f32.mrf.mxu1 }
 0x9e8   : > { %v4875_v43 = vadd.f32 %v4852_v62, %v11308_v30 }
 0x9e9   : > { %v4856_v17 = vpop.f32.mrf.mxu1 }
 0x9ea   : > { %v4857_v12 = vadd.f32 %v7477_v27, %v4856_v17  ;;  %v4882_v26 = vsel %vm1674_vm5, %v4875_v43, 0.0 }
 0x9eb   : > { %v8339_v63 = vpop.f32.mrf.mxu1  ;;  %4883 = vadd.xlane.f32.xlu0 %v4882_v26 }
 0x9ec   : > { %v4876_v41 = vadd.f32 %v4857_v12, %v11309_v23 }
 0x9ed   : > { %v4861_v28 = vpop.f32.mrf.mxu1 }
 0x9ee   : > { %v4862_v13 = vadd.f32 %v7477_v27, %v4861_v28  ;;  %v4885_v9 = vsel %vm1674_vm5, %v4876_v41, 0.0 }
 0x9ef   : > { %v8342_v0 = vpop.f32.mrf.mxu1  ;;  %4886 = vadd.xlane.f32.xlu1 %v4885_v9 }
 0x9f0   : > { %v4877_v24 = vadd.f32 %v4862_v13, %v11310_v47  ;;  %v7484_v0 = vld [vmem:[%s11315_s15] ss:$0 sm:$0xff]  ;;  %s11317_s15 = sld [smem:[#allocation15_spill]] }
 0x9f1   : > { %v4866_v58 = vpop.f32.mrf.mxu1 }
 0x9f2   : > { %v4867_v6 = vadd.f32 %v7477_v27, %v4866_v58  ;;  %v4888_v19 = vsel %vm1674_vm5, %v4877_v24, 0.0 }
 0x9f3   : > { %4889 = vadd.xlane.f32.xlu0 %v4888_v19  ;;  %v8345_v33 = vpop.f32.mrf.mxu1 }
 0x9f4   : > { %v10746_v39 = vadd.f32 %v4867_v6, %v11311_v60 }
 0x9f6   : > { %v4871_v20 = vpop.f32.mrf.mxu1  ;;  %v4891_v25 = vsel %vm1674_vm5, %v10746_v39, 0.0 }
 0x9f7   : > { %v4872_v1 = vadd.f32 %v7477_v27, %v4871_v20  ;;  %4892 = vadd.xlane.f32.xlu0 %v4891_v25 }
 0x9f8   : > { %v8348_v4 = vpop.f32.mrf.mxu1 }
 0x9f9   : > { %v10751_v59 = vadd.f32 %v4872_v1, %v11312_v53 }
 0x9fb   : > { %v4894_v40 = vsel %vm1677_vm8, %v10751_v59, 0.0 }
 0x9fc   : > { %4895 = vadd.xlane.f32.xlu1 %v4894_v40 }
 0xa74   : > { %v4884_v37 = vpop.xlane.xlu0 %4883 }
 0xa75   : > { %v4897_v50 = vmul.f32 0.03125, %v4884_v37 }
 0xa77   : > { %v4902_v29 = vsub.f32 %v4875_v43, %v4897_v50 }
 0xa78   : > { %v4887_v2 = vpop.xlane.xlu1 %4886 }
 0xa79   : > { %v4898_v14 = vmul.f32 0.03125, %v4887_v2  ;;  %v4907_v22 = vmul.f32 %v4902_v29, %v4902_v29 }
 0xa7b   : > { %v10755_v35 = vsub.f32 %v4876_v41, %v4898_v14  ;;  %v4912_v56 = vsel %vm1674_vm5, %v4907_v22, 0.0  ;;  %v7483_v41 = vld [vmem:[%s11314_s2] ss:$0 sm:$0xff]  ;;  %s11316_s2 = sld [smem:[#allocation16_spill]] }
 0xa7c   : > { %v4890_v31 = vpop.xlane.xlu0 %4889  ;;  %4913 = vadd.xlane.f32.xlu0 %v4912_v56 }
 0xa7d   : > { %v4899_v15 = vmul.f32 0.03125, %v4890_v31  ;;  %v4908_v38 = vmul.f32 %v10755_v35, %v10755_v35 }
 0xa7f   : > { %v10760_v7 = vsub.f32 %v4877_v24, %v4899_v15  ;;  %v4915_v32 = vsel %vm1674_vm5, %v4908_v38, 0.0 }
 0xa80   : > { %v4893_v52 = vpop.xlane.xlu0 %4892  ;;  %4916 = vadd.xlane.f32.xlu1 %v4915_v32 }
 0xa81   : > { %v4900_v51 = vmul.f32 0.03125, %v4893_v52  ;;  %v4909_v8 = vmul.f32 %v10760_v7, %v10760_v7  ;;  %v5145_v22 = vld [vmem:[%s11316_s2 + $0x78] sm:$0xff]  ;;  %v5143_v56 = vld [vmem:[%s11316_s2 + $0x68] sm:$0xff]  ;;  %v5142_v31 = vld [vmem:[%s11316_s2 + $0x60] sm:$0xff] }
 0xa82   : > { %8373 = vmatpush3.msra.mxu1 %v5145_v22  ;;  %v5141_v15 = vld [vmem:[%s11316_s2 + $0x58] sm:$0xff]  ;;  %v5140_v38 = vld [vmem:[%s11316_s2 + $0x50] sm:$0xff]  ;;  %v5138_v32 = vld [vmem:[%s11316_s2 + $0x40] sm:$0xff] }
 0xa83   : > { %v10766_v3 = vsub.f32 %v10746_v39, %v4900_v51  ;;  %v4918_v45 = vsel %vm1674_vm5, %v4909_v8, 0.0  ;;  %8374 = vmatprep.subr.mxu1 %v11285_v18  ;;  %v5137_v52 = vld [vmem:[%s11316_s2 + $0x38] sm:$0xff]  ;;  %v5136_v51 = vld [vmem:[%s11316_s2 + $0x30] sm:$0xff]  ;;  %v5135_v8 = vld [vmem:[%s11316_s2 + $0x28] sm:$0xff] }
 0xa84   : > { %4919 = vadd.xlane.f32.xlu0 %v4918_v45  ;;  %v5133_v45 = vld [vmem:[%s11316_s2 + $0x18] sm:$0xff] }
 0xa85   : > { %v4896_v21 = vpop.xlane.xlu1 %4895  ;;  %v4910_v54 = vmul.f32 %v10766_v3, %v10766_v3 }
 0xa86   : > { %v4901_v36 = vmul.f32 0.03125, %v4896_v21  ;;  %v5132_v21 = vld [vmem:[%s11316_s2 + $0x10] sm:$0xff] }
 0xa87   : > { %v4921_v49 = vsel %vm1674_vm5, %v4910_v54, 0.0  ;;  %v5131_v54 = vld [vmem:[%s11316_s2 + $0x8] sm:$0xff] }
 0xa88   : > { %v4906_v61 = vsub.f32 %v10751_v59, %v4901_v36  ;;  %4922 = vadd.xlane.f32.xlu1 %v4921_v49  ;;  %v5130_v36 = vld [vmem:[%s11316_s2] sm:$0xff] }
 0xa89   : > { %v7485_v49 = vld [vmem:[%s11317_s15] ss:$0 sm:$0xff]  ;;  %s11318_s15 = sld [smem:[#allocation18_spill]] }
 0xa8a   : > { %v4911_v5 = vmul.f32 %v4906_v61, %v4906_v61 }
 0xa8c   : > { %v4924_v42 = vsel %vm1677_vm8, %v4911_v5, 0.0 }
 0xa8d   : > { %4925 = vadd.xlane.f32.xlu0 %v4924_v42 }
 0xb05   : > { %v4914_v10 = vpop.xlane.xlu0 %4913 }
 0xb06   : > { %v4927_v44 = vmul.f32 0.03125, %v4914_v10 }
 0xb08   : > { %v4932_v46 = vadd.f32 1e-05, %v4927_v44 }
 0xb09   : > { %v4917_v27 = vpop.xlane.xlu1 %4916 }
 0xb0a   : > { %8841 = vrsqrt.f32 %v4932_v46  ;;  %v4928_v55 = vmul.f32 0.03125, %v4917_v27 }
 0xb0c   : > { %v4933_v62 = vadd.f32 1e-05, %v4928_v55 }
 0xb0d   : > { %v4920_v34 = vpop.xlane.xlu0 %4919 }
 0xb0e   : > { %8843 = vrsqrt.f32 %v4933_v62  ;;  %v4929_v30 = vmul.f32 0.03125, %v4920_v34 }
 0xb10   : > { %v4934_v43 = vadd.f32 1e-05, %v4929_v30 }
 0xb11   : > { %v4923_v17 = vpop.xlane.xlu1 %4922 }
 0xb12   : > { %8845 = vrsqrt.f32 %v4934_v43  ;;  %v4930_v12 = vmul.f32 0.03125, %v4923_v17 }
 0xb14   : > { %v4935_v26 = vadd.f32 1e-05, %v4930_v12 }
 0xb16   : > { %8847 = vrsqrt.f32 %v4935_v26  ;;  %v4926_v63 = vpop.xlane.xlu0 %4925 }
 0xb17   : > { %v8842_v23 = vpop.eup %8841  ;;  %v4931_v28 = vmul.f32 0.03125, %v4926_v63 }
 0xb18   : > { %v4942_v13 = vmul.f32 %v8842_v23, %v4902_v29 }
 0xb19   : > { %v4936_v9 = vadd.f32 1e-05, %v4931_v28 }
 0xb1a   : > { %v4953_v47 = vmul.f32 %v7483_v41, %v4942_v13 }
 0xb1b   : > { %v8844_v24 = vpop.eup %8843  ;;  %8849 = vrsqrt.f32 %v4936_v9 }
 0xb1c   : > { %v4964_v58 = vadd.f32 %v7484_v0, %v4953_v47  ;;  %v4943_v6 = vmul.f32 %v8844_v24, %v10755_v35  ;;  %v5144_v35 = vld [vmem:[%s11316_s2 + $0x70] sm:$0xff] }
 0xb1d   : > { %8375 = vmatpush3.msra.mxu1 %v5144_v35 }
 0xb1e   : > { %8358 = vmatmul.mubr.msk.f32.vlgmr.msra.gmra.mxu0 %vm1674_vm5, %v4964_v58  ;;  %v4954_v19 = vmul.f32 %v7483_v41, %v4943_v6  ;;  %8376 = vmatprep.subr.mxu1 %v11285_v18 }
 0xb1f   : > { %v8846_v33 = vpop.eup %8845  ;;  %8360 = vmatprep.mubr.msk.f32.mxu0 %vm8943_vm1, %v11285_v18  ;;  %8377 = vmatpush3.msra.mxu1 %v5143_v56 }
 0xb20   : > { %v4965_v60 = vadd.f32 %v7484_v0, %v4954_v19  ;;  %v4944_v20 = vmul.f32 %v8846_v33, %v10760_v7  ;;  %8378 = vmatprep.subr.mxu1 %v11285_v18  ;;  %v5139_v7 = vld [vmem:[%s11316_s2 + $0x48] sm:$0xff] }
 0xb21   : > { %8379 = vmatpush3.msra.mxu1 %v5142_v31 }
 0xb22   : > { %8361 = vmatmul.mubr.msk.f32.gmra.mxu0 %vm1674_vm5, %v4965_v60  ;;  %v4955_v25 = vmul.f32 %v7483_v41, %v4944_v20  ;;  %8380 = vmatprep.subr.mxu1 %v11285_v18 }
 0xb23   : > { %v8848_v1 = vpop.eup %8847  ;;  %8363 = vmatprep.mubr.msk.f32.mxu0 %vm8943_vm1, %v11285_v18  ;;  %8381 = vmatpush3.msra.mxu1 %v5141_v15 }
 0xb24   : > { %v4966_v4 = vadd.f32 %v7484_v0, %v4955_v25  ;;  %v4945_v53 = vmul.f32 %v8848_v1, %v10766_v3  ;;  %8382 = vmatprep.subr.mxu1 %v11285_v18  ;;  %v5134_v3 = vld [vmem:[%s11316_s2 + $0x20] sm:$0xff] }
 0xb25   : > { %8383 = vmatpush3.msra.mxu1 %v5140_v38 }
 0xb26   : > { %8364 = vmatmul.mubr.msk.f32.gmra.mxu0 %vm1674_vm5, %v4966_v4  ;;  %v4956_v40 = vmul.f32 %v7483_v41, %v4945_v53  ;;  %8384 = vmatprep.subr.mxu1 %v11285_v18 }
 0xb27   : > { %8366 = vmatprep.mubr.msk.f32.mxu0 %vm8943_vm1, %v11285_v18  ;;  %8385 = vmatpush3.msra.mxu1 %v5139_v7 }
 0xb28   : > { %v8850_v37 = vpop.eup %8849  ;;  %v4967_v50 = vadd.f32 %v7484_v0, %v4956_v40  ;;  %8386 = vmatprep.subr.mxu1 %v11285_v18 }
 0xb29   : > { %v4946_v29 = vmul.f32 %v8850_v37, %v4906_v61  ;;  %8387 = vmatpush3.msra.mxu1 %v5138_v32 }
 0xb2a   : > { %8367 = vmatmul.mubr.msk.f32.gmra.mxu0 %vm1674_vm5, %v4967_v50  ;;  %8388 = vmatprep.subr.mxu1 %v11285_v18 }
 0xb2b   : > { %8369 = vmatprep.mubr.msk.f32.mxu0 %vm8943_vm1, %v11285_v18  ;;  %v4957_v2 = vmul.f32 %v7483_v41, %v4946_v29  ;;  %8389 = vmatpush3.msra.mxu1 %v5137_v52 }
 0xb2c   : > { %8390 = vmatprep.subr.mxu1 %v11285_v18 }
 0xb2d   : > { %v4968_v14 = vadd.f32 %v7484_v0, %v4957_v2  ;;  %8391 = vmatpush3.msra.mxu1 %v5136_v51 }
 0xb2e   : > { %8392 = vmatprep.subr.mxu1 %v11285_v18 }
 0xb2f   : > { %8370 = vmatmul.mubr.msk.f32.gmra.mxu0 %vm1674_vm5, %v4968_v14  ;;  %8393 = vmatpush3.msra.mxu1 %v5135_v8 }
 0xb30   : > { %8427 = vmatprep.mubr.msk.f32.mxu0 %vm8943_vm1, %v11285_v18  ;;  %8394 = vmatprep.subr.mxu1 %v11285_v18 }
 0xb31   : > { %8395 = vmatpush3.msra.mxu1 %v5134_v3 }
 0xb32   : > { %8396 = vmatprep.subr.mxu1 %v11285_v18 }
 0xb33   : > { %8397 = vmatpush3.msra.mxu1 %v5133_v45 }
 0xb34   : > { %8398 = vmatprep.subr.mxu1 %v11285_v18 }
 0xb35   : > { %8399 = vmatpush3.msra.mxu1 %v5132_v21 }
 0xb36   : > { %8400 = vmatprep.subr.mxu1 %v11285_v18 }
 0xb37   : > { %8401 = vmatpush3.msra.mxu1 %v5131_v54 }
 0xb38   : > { %8402 = vmatprep.subr.mxu1 %v11285_v18 }
 0xb39   : > { %8403 = vmatpush3.msra.mxu1 %v5130_v36 }
 0xb3a   : > { %8455 = vmatprep.subr.mxu1 %v11285_v18 }
 0xbde   : > { %v5061_v61 = vpop.f32.mrf.mxu0 }
 0xbdf   : > { %v5062_v5 = vadd.f32 %v7485_v49, %v5061_v61  ;;  %v5244_v61 = vld [vmem:[%s11318_s15 + $0x10] sm:$0xff] }
 0xbe0   : > { %v8359_v42 = vpop.f32.mrf.mxu0 }
 0xbe1   : > { %v5085_v48 = vmul.f32 %v5062_v5, %v5062_v5  ;;  %v5242_v42 = vld [vmem:[%s11318_s15] sm:$0xff] }
 0xbe2   : > { %v5066_v16 = vpop.f32.mrf.mxu0 }
 0xbe3   : > { %v5090_v11 = vmul.f32 %v5085_v48, %v5062_v5  ;;  %v5067_v57 = vadd.f32 %v7485_v49, %v5066_v16  ;;  %v5333_v48 = vld [vmem:[%s11319_s0 + $0x18] sm:$0xff] }
 0xbe4   : > { %v8362_v10 = vpop.f32.mrf.mxu0 }
 0xbe5   : > { %v5095_v44 = vmul.f32 0.044715, %v5090_v11  ;;  %v5086_v46 = vmul.f32 %v5067_v57, %v5067_v57 }
 0xbe6   : > { %v5071_v27 = vpop.f32.mrf.mxu0 }
 0xbe7   : > { %v5100_v55 = vadd.f32 %v5095_v44, %v5062_v5  ;;  %v5091_v62 = vmul.f32 %v5086_v46, %v5067_v57  ;;  %v5072_v34 = vadd.f32 %v7485_v49, %v5071_v27  ;;  %v7491_v27 = vld [vmem:[%s11320_s11] ss:$0 sm:$0xff]  ;;  %s11323_s11 = sld [smem:[#allocation21_spill]] }
 0xbe8   : > { %v8365_v30 = vpop.f32.mrf.mxu0 }
 0xbe9   : > { %v5105_v43 = vmul.f32 0.7978846, %v5100_v55  ;;  %v5096_v17 = vmul.f32 0.044715, %v5091_v62  ;;  %v5087_v12 = vmul.f32 %v5072_v34, %v5072_v34 }
 0xbea   : > { %v5076_v26 = vpop.f32.mrf.mxu0 }
 0xbeb   : > { %8851 = vtanh.f32 %v5105_v43  ;;  %v5101_v63 = vadd.f32 %v5096_v17, %v5067_v57  ;;  %v5092_v23 = vmul.f32 %v5087_v12, %v5072_v34  ;;  %v5077_v41 = vadd.f32 %v7485_v49, %v5076_v26 }
 0xbec   : > { %v8368_v28 = vpop.f32.mrf.mxu0 }
 0xbed   : > { %v5106_v13 = vmul.f32 0.7978846, %v5101_v63  ;;  %v5097_v9 = vmul.f32 0.044715, %v5092_v23  ;;  %v5088_v0 = vmul.f32 %v5077_v41, %v5077_v41  ;;  %v5332_v28 = vld [vmem:[%s11319_s0 + $0x10] sm:$0xff] }
 0xbef   : > { %8853 = vtanh.f32 %v5106_v13  ;;  %v5102_v47 = vadd.f32 %v5097_v9, %v5072_v34  ;;  %v5093_v24 = vmul.f32 %v5088_v0, %v5077_v41  ;;  %v5081_v58 = vpop.f32.mrf.mxu0  ;;  %v11322_v13 = vld [vmem:[#allocation28_spill] sm:$0xff]  ;;  %v5331_v9 = vld [vmem:[%s11319_s0 + $0x8] sm:$0xff]  ;;  %v7492_v0 = vld [vmem:[%s11321_s23] ss:$0 sm:$0xff]  ;;  %s11325_s23 = smov 112  }
 0xbf0   : > { %v5082_v6 = vadd.f32 %v7485_v49, %v5081_v58  ;;  %v5245_v49 = vld [vmem:[%s11318_s15 + $0x18] sm:$0xff] }
 0xbf1   : > { %v5107_v19 = vmul.f32 0.7978846, %v5102_v47  ;;  %v5098_v33 = vmul.f32 0.044715, %v5093_v24  ;;  %v8371_v60 = vpop.f32.mrf.mxu0  ;;  %8420 = vmatpush3.msra.mxu0 %v5245_v49 }
 0xbf2   : > { %v5089_v20 = vmul.f32 %v5082_v6, %v5082_v6  ;;  %8421 = vmatprep.subr.mxu0 %v11285_v18 }
 0xbf3   : > { %8855 = vtanh.f32 %v5107_v19  ;;  %v5103_v25 = vadd.f32 %v5098_v33, %v5077_v41  ;;  %8422 = vmatpush3.msra.mxu0 %v5244_v61 }
 0xbf4   : > { %v5094_v1 = vmul.f32 %v5089_v20, %v5082_v6  ;;  %8423 = vmatprep.subr.mxu0 %v11285_v18 }
 0xbf5   : > { %v5108_v4 = vmul.f32 0.7978846, %v5103_v25 }
 0xbf6   : > { %v5099_v53 = vmul.f32 0.044715, %v5094_v1 }
 0xbf7   : > { %8857 = vtanh.f32 %v5108_v4 }
 0xbf8   : > { %v8852_v40 = vpop.eup %8851  ;;  %v5104_v37 = vadd.f32 %v5099_v53, %v5082_v6 }
 0xbf9   : > { %v5115_v50 = vadd.f32 1.0, %v8852_v40 }
 0xbfa   : > { %v5109_v29 = vmul.f32 0.7978846, %v5104_v37 }
 0xbfb   : > { %v5120_v2 = vmul.f32 0.5, %v5115_v50 }
 0xbfc   : > { %v8854_v14 = vpop.eup %8853  ;;  %8859 = vtanh.f32 %v5109_v29 }
 0xbfd   : > { %v5125_v22 = vmul.f32 %v5120_v2, %v5062_v5  ;;  %v5116_v35 = vadd.f32 1.0, %v8854_v14  ;;  %v5243_v5 = vld [vmem:[%s11318_s15 + $0x8] sm:$0xff] }
 0xbfe   : > { %8424 = vmatpush3.msra.mxu0 %v5243_v5 }
 0xbff   : > { %8405 = vmatmul.mubr.f32.vlgmr.msra.gmra.mxu1 %v5125_v22  ;;  %v5121_v56 = vmul.f32 0.5, %v5116_v35  ;;  %8425 = vmatprep.subr.mxu0 %v11285_v18 }
 0xc00   : > { %v8856_v31 = vpop.eup %8855  ;;  %8407 = vmatprep.mubr.msk.f32.mxu1 %vm8943_vm1, %v11285_v18  ;;  %8426 = vmatpush3.msra.mxu0 %v5242_v42 }
 0xc01   : > { %v5126_v15 = vmul.f32 %v5121_v56, %v5067_v57  ;;  %v5117_v38 = vadd.f32 1.0, %v8856_v31  ;;  %8430 = vmatprep.subr.mxu0 %v5333_v48 }
 0xc03   : > { %8408 = vmatmul.mubr.f32.gmra.mxu1 %v5126_v15  ;;  %v5122_v7 = vmul.f32 0.5, %v5117_v38 }
 0xc04   : > { %v8858_v32 = vpop.eup %8857  ;;  %8410 = vmatprep.mubr.msk.f32.mxu1 %vm8943_vm1, %v11285_v18 }
 0xc05   : > { %v5127_v52 = vmul.f32 %v5122_v7, %v5072_v34  ;;  %v5118_v51 = vadd.f32 1.0, %v8858_v32 }
 0xc07   : > { %8411 = vmatmul.mubr.f32.gmra.mxu1 %v5127_v52  ;;  %v5123_v8 = vmul.f32 0.5, %v5118_v51 }
 0xc08   : > { %8413 = vmatprep.mubr.msk.f32.mxu1 %vm8943_vm1, %v11285_v18 }
 0xc09   : > { %v8860_v3 = vpop.eup %8859  ;;  %v5128_v45 = vmul.f32 %v5123_v8, %v5077_v41 }
 0xc0a   : > { %v5119_v21 = vadd.f32 1.0, %v8860_v3 }
 0xc0b   : > { %8414 = vmatmul.mubr.f32.gmra.mxu1 %v5128_v45 }
 0xc0c   : > { %8416 = vmatprep.mubr.msk.f32.mxu1 %vm8943_vm1, %v11285_v18  ;;  %v5124_v54 = vmul.f32 0.5, %v5119_v21 }
 0xc0e   : > { %v5129_v36 = vmul.f32 %v5124_v54, %v5082_v6  ;;  %v7494_v6 = vld [vmem:[%s11323_s11] ss:$0 sm:$0xff]  ;;  %s11326_s11 = smov 108  }
 0xc10   : > { %8417 = vmatmul.mubr.f32.gmra.mxu1 %v5129_v36 }
 0xc11   : > { %8459 = vmatprep.mubr.msk.f32.mxu1 %vm8943_vm1, %v11285_v18 }
 0xcbf   : > { %v5219_v16 = vpop.f32.mrf.mxu1 }
 0xcc1   : > { %v8406_v11 = vpop.f32.mrf.mxu1 }
 0xcc3   : > { %v5223_v57 = vpop.f32.mrf.mxu1 }
 0xcc5   : > { %v8409_v10 = vpop.f32.mrf.mxu1 }
 0xcc7   : > { %v5227_v44 = vpop.f32.mrf.mxu1 }
 0xcc9   : > { %v8412_v46 = vpop.f32.mrf.mxu1 }
 0xccb   : > { %v5231_v55 = vpop.f32.mrf.mxu1 }
 0xccc   : > { %v5232_v62 = vadd.f32 %v7491_v27, %v5231_v55 }
 0xccd   : > { %v8415_v34 = vpop.f32.mrf.mxu1 }
 0xcce   : > { %v5240_v43 = vadd.f32 %v5232_v62, %v10746_v39  ;;  %v5330_v39 = vld [vmem:[%s11319_s0] sm:$0xff]  ;;  %s11327_s0 = smov 104  }
 0xcd0   : > { %v5236_v30 = vpop.f32.mrf.mxu1  ;;  %v5255_v63 = vrot.slane %v5240_v43, 1 }
 0xcd1   : > { %v5237_v17 = vadd.f32 %v7491_v27, %v5236_v30 }
 0xcd2   : > { %v8418_v12 = vpop.f32.mrf.mxu1 }
 0xcd3   : > { %v5241_v26 = vadd.f32 %v5237_v17, %v10751_v59  ;;  %v11324_v59 = vld [vmem:[#allocation27_spill] sm:$0xff] }
 0xcd5   : > { %v5256_v23 = vrot.slane %v5241_v26, 1 }
 0xcd7   : > { %v10857_v41 = vsel %vm1597_vm2, %v5255_v63, %v5256_v23 }
 0xcd8   : > { %8428 = vmatmul.mubr.msk.f32.vlgmr.msra.gmra.mxu0 %vm1674_vm5, %v10857_v41 }
 0xcd9   : > { %8431 = vmatpush3.msra.mxu0 %v5333_v48  ;;  %8438 = vmatprep.mubr.msk.f32.mxu0 %vm1674_vm5, %v11322_v13 }
 0xcda   : > { %8432 = vmatprep.subr.mxu0 %v5332_v28 }
 0xcdb   : > { %8433 = vmatpush3.msra.mxu0 %v5332_v28 }
 0xcdc   : > { %8434 = vmatprep.subr.mxu0 %v5331_v9 }
 0xcdd   : > { %8435 = vmatpush3.msra.mxu0 %v5331_v9 }
 0xcde   : > { %8436 = vmatprep.subr.mxu0 %v5330_v39 }
 0xcdf   : > { %8437 = vmatpush3.msra.mxu0 %v5330_v39 }
 0xce0   : > { %8439 = vmatmul.mubr.msk.f32.vlgmr.msra.gmra.mxu0 %vm1674_vm5, %v11324_v59  ;;  %8441 = vmatprep.subr.mxu0 %v11285_v18 }
 0xce1   : > { %8445 = vmatprep.mubr.msk.f32.mxu0 %vm8943_vm1, %v11285_v18 }
 0xd98   : > { %v5326_v47 = vpop.f32.mrf.mxu0 }
 0xd99   : > { %v5327_v24 = vadd.f32 %v7492_v0, %v5326_v47 }
 0xd9a   : > { %v8429_v58 = vpop.f32.mrf.mxu0 }
 0xd9b   : > { %5423 = vrot.lane.b32.xlu1 %v5327_v24, %s8944_s16 }
 0xd9f   : > { %5425 = vrot.lane.b32.xlu1 %v5327_v24, %s8945_s18 }
 0xda0   : > { %v8440_v19 = vpop.f32.mrf.mxu0 }
 0xda1   : > { %v10875_v33 = vadd.f32 %v8440_v19, %v7494_v6 }
 0xda2   : > { %v5413_v60 = vpop.f32.mrf.mxu0 }
 0xda3   : > { %5449 = vrot.lane.b32.xlu0 %v10875_v33, %s8946_s22  ;;  %8442 = vmatpush3.xpose.msk.msra.mxu0 %vm2136_vm9, %v10875_v33  ;;  %v10884_v20 = vadd.f32 %v7494_v6, %v5413_v60 }
 0xda4   : > { %5441 = vrot.lane.b32.xlu1 %v10875_v33, %s8944_s16  ;;  %8443 = vmatprep.subr.mxu0 %v11285_v18 }
 0xda7   : > { %5453 = vrot.lane.b32.xlu0 %v10875_v33, %s11325_s23  ;;  %8444 = vmatpush3.xpose.msk.msra.mxu0 %vm2136_vm9, %v10884_v20 }
 0xda8   : > { %5427 = vrot.lane.b32.xlu1 %v5327_v24, %s8946_s22  ;;  %8448 = vmatprep.subr.mxu0 %v11285_v18 }
 0xdaa   : > { %8446 = vmatmul.mubr.msk.f32.vlgmr.msra.gmra.mxu0 %vm2136_vm9, %v5327_v24 }
 0xdab   : > { %5439 = vrot.lane.b32.xlu0 %v10884_v20, %s8944_s16  ;;  %8452 = vmatprep.mubr.msk.f32.mxu0 %vm8943_vm1, %v11285_v18  ;;  %s11328_s16 = smov 100  }
 0xdac   : > { %5445 = vrot.lane.b32.xlu1 %v10875_v33, %s8945_s18 }
 0xdaf   : > { %5457 = vrot.lane.b32.xlu0 %v10875_v33, %s11326_s11 }
 0xdb0   : > { %5443 = vrot.lane.b32.xlu1 %v10884_v20, %s8945_s18  ;;  %s11329_s18 = smov 96  }
 0xdb3   : > { %5447 = vrot.lane.b32.xlu0 %v10884_v20, %s8946_s22  ;;  %s11330_s22 = sld [smem:[#allocation22_spill]] }
 0xdb4   : > { %5429 = vrot.lane.b32.xlu1 %v5327_v24, %s11325_s23 }
 0xdb7   : > { %5461 = vrot.lane.b32.xlu0 %v10875_v33, %s11327_s0 }
 0xdb8   : > { %5451 = vrot.lane.b32.xlu1 %v10884_v20, %s11325_s23  ;;  %s11332_s23 = smov 8  }
 0xdbb   : > { %5455 = vrot.lane.b32.xlu0 %v10884_v20, %s11326_s11 }
 0xdbc   : > { %5431 = vrot.lane.b32.xlu1 %v5327_v24, %s11326_s11  ;;  %s11333_s11 = smov 12  }
 0xdbf   : > { %5465 = vrot.lane.b32.xlu0 %v10875_v33, %s11328_s16 }
 0xdc0   : > { %5459 = vrot.lane.b32.xlu1 %v10884_v20, %s11327_s0 }
 0xdc3   : > { %5463 = vrot.lane.b32.xlu0 %v10884_v20, %s11328_s16 }
 0xdc4   : > { %5433 = vrot.lane.b32.xlu1 %v5327_v24, %s11327_s0  ;;  %s11331_s0 = smov 4  }
 0xdc7   : > { %5435 = vrot.lane.b32.xlu0 %v5327_v24, %s11328_s16  ;;  %s11334_s16 = smov 16  }
 0xe0d   : > { %v5424_v25 = vpop.permute.xlu1 %5423 }
 0xe11   : > { %v5426_v1 = vpop.permute.xlu1 %5425 }
 0xe15   : > { %v10921_v4 = vpop.permute.xlu0 %5449 }
 0xe16   : > { %v10923_v53 = vpop.permute.xlu1 %5441 }
 0xe17   : > { %8449 = vmatpush3.xpose.msk.msra.mxu0 %vm2136_vm9, %v10923_v53 }
 0xe18   : > { %8450 = vmatprep.subr.mxu0 %v11285_v18 }
 0xe19   : > { %v10928_v40 = vpop.permute.xlu0 %5453 }
 0xe1a   : > { %v5428_v37 = vpop.permute.xlu1 %5427 }
 0xe1d   : > { %v10930_v50 = vpop.permute.xlu0 %5439 }
 0xe1e   : > { %v10932_v29 = vpop.permute.xlu1 %5445  ;;  %8451 = vmatpush3.xpose.msk.msra.mxu0 %vm2136_vm9, %v10930_v50 }
 0xe1f   : > { %8456 = vmatpush3.xpose.msk.msra.mxu1 %vm2136_vm9, %v10932_v29  ;;  %8462 = vmatprep.subr.mxu0 %v11285_v18 }
 0xe20   : > { %8457 = vmatprep.subr.mxu1 %v11285_v18 }
 0xe21   : > { %v10940_v2 = vpop.permute.xlu0 %5457  ;;  %8453 = vmatmul.mubr.msk.f32.vlgmr.msra.gmra.mxu0 %vm2136_vm9, %v5424_v25 }
 0xe22   : > { %v10943_v14 = vpop.permute.xlu1 %5443  ;;  %8463 = vmatpush3.xpose.msk.msra.mxu0 %vm2136_vm9, %v10921_v4  ;;  %8466 = vmatprep.mubr.msk.f32.mxu0 %vm8943_vm1, %v11285_v18 }
 0xe23   : > { %8458 = vmatpush3.xpose.msk.msra.mxu1 %vm2136_vm9, %v10943_v14  ;;  %8464 = vmatprep.subr.mxu0 %v11285_v18 }
 0xe24   : > { %8469 = vmatprep.subr.mxu1 %v11285_v18 }
 0xe25   : > { %v10953_v22 = vpop.permute.xlu0 %5447 }
 0xe26   : > { %8460 = vmatmul.mubr.msk.f32.vlgmr.msra.gmra.mxu1 %vm2136_vm9, %v5426_v1  ;;  %v5430_v35 = vpop.permute.xlu1 %5429  ;;  %8465 = vmatpush3.xpose.msk.msra.mxu0 %vm2136_vm9, %v10953_v22 }
 0xe27   : > { %8470 = vmatpush3.xpose.msk.msra.mxu1 %vm2136_vm9, %v10928_v40  ;;  %8476 = vmatprep.subr.mxu0 %v11285_v18 }
 0xe28   : > { %8471 = vmatprep.subr.mxu1 %v11285_v18  ;;  %8473 = vmatprep.mubr.msk.f32.mxu1 %vm8943_vm1, %v11285_v18 }
 0xe29   : > { %v10964_v56 = vpop.permute.xlu0 %5461  ;;  %8467 = vmatmul.mubr.msk.f32.vlgmr.msra.gmra.mxu0 %vm2136_vm9, %v5428_v37 }
 0xe2a   : > { %v10967_v31 = vpop.permute.xlu1 %5451  ;;  %8477 = vmatpush3.xpose.msk.msra.mxu0 %vm2136_vm9, %v10940_v2  ;;  %8480 = vmatprep.mubr.msk.f32.mxu0 %vm8943_vm1, %v11285_v18 }
 0xe2b   : > { %8472 = vmatpush3.xpose.msk.msra.mxu1 %vm2136_vm9, %v10967_v31  ;;  %8478 = vmatprep.subr.mxu0 %v11285_v18 }
 0xe2c   : > { %8483 = vmatprep.subr.mxu1 %v11285_v18 }
 0xe2d   : > { %v10977_v15 = vpop.permute.xlu0 %5455 }
 0xe2e   : > { %8474 = vmatmul.mubr.msk.f32.vlgmr.msra.gmra.mxu1 %vm2136_vm9, %v5430_v35  ;;  %v5432_v38 = vpop.permute.xlu1 %5431  ;;  %8479 = vmatpush3.xpose.msk.msra.mxu0 %vm2136_vm9, %v10977_v15 }
 0xe2f   : > { %8484 = vmatpush3.xpose.msk.msra.mxu1 %vm2136_vm9, %v10964_v56  ;;  %8490 = vmatprep.subr.mxu0 %v11285_v18 }
 0xe30   : > { %8485 = vmatprep.subr.mxu1 %v11285_v18  ;;  %8487 = vmatprep.mubr.msk.f32.mxu1 %vm8943_vm1, %v11285_v18 }
 0xe31   : > { %v5466_v7 = vpop.permute.xlu0 %5465  ;;  %8481 = vmatmul.mubr.msk.f32.vlgmr.msra.gmra.mxu0 %vm2136_vm9, %v5432_v38 }
 0xe32   : > { %v10989_v32 = vpop.permute.xlu1 %5459  ;;  %8491 = vmatpush3.xpose.msk.msra.mxu0 %vm2136_vm9, %v5466_v7  ;;  %8494 = vmatprep.mubr.msk.f32.mxu0 %vm8943_vm1, %v11285_v18 }
 0xe33   : > { %8486 = vmatpush3.xpose.msk.msra.mxu1 %vm2136_vm9, %v10989_v32  ;;  %8492 = vmatprep.subr.mxu0 %v11285_v18 }
 0xe34   : > { %8497 = vmatprep.subr.mxu1 %v11285_v18 }
 0xe35   : > { %v10998_v52 = vpop.permute.xlu0 %5463 }
 0xe36   : > { %v5434_v51 = vpop.permute.xlu1 %5433  ;;  %8493 = vmatpush3.xpose.msk.msra.mxu0 %vm2136_vm9, %v10998_v52 }
 0xe37   : > { %8488 = vmatmul.mubr.msk.f32.vlgmr.msra.gmra.mxu1 %vm2136_vm9, %v5434_v51  ;;  %8504 = vmatprep.subr.mxu0 %v11285_v18 }
 0xe38   : > { %8501 = vmatprep.mubr.msk.f32.mxu1 %vm8943_vm1, %v11285_v18 }
 0xe39   : > { %v5436_v8 = vpop.permute.xlu0 %5435 }
 0xe3a   : > { %8495 = vmatmul.mubr.msk.f32.vlgmr.msra.gmra.mxu0 %vm2136_vm9, %v5436_v8 }
 0xe3b   : > { %8508 = vmatprep.mubr.msk.f32.mxu0 %vm8943_vm1, %v11285_v18 }
 0xe6a   : > { %v5539_v3 = vpop.f32.mrf.mxu0 }
 0xe6b   : > { %v6075_v45 = vmul.f32 0.5, %v5539_v3 }
 0xe6c   : > { %v8447_v21 = vpop.f32.mrf.mxu0 }
 0xe6d   : > { %v6083_v54 = vsel %vm4735_vm15, %v6075_v45, -inf }
 0xe6e   : > { %6084 = vmax.xlane.f32.xlu1 %v6083_v54 }
 0xee1   : > { %v5615_v36 = vpop.f32.mrf.mxu0 }
 0xee2   : > { %v6076_v49 = vmul.f32 0.5, %v5615_v36 }
 0xee3   : > { %v8454_v61 = vpop.f32.mrf.mxu0 }
 0xee4   : > { %v6086_v5 = vsel %vm4735_vm15, %v6076_v49, -inf }
 0xee5   : > { %6087 = vmax.xlane.f32.xlu0 %v6086_v5 }
 0xee6   : > { %v5691_v42 = vpop.f32.mrf.mxu1 }
 0xee7   : > { %v6077_v48 = vmul.f32 0.5, %v5691_v42 }
 0xee8   : > { %v8461_v16 = vpop.f32.mrf.mxu1 }
 0xee9   : > { %v5767_v11 = vpop.f32.mrf.mxu0  ;;  %v6089_v57 = vsel %vm4735_vm15, %v6077_v48, -inf }
 0xeea   : > { %v6078_v10 = vmul.f32 0.5, %v5767_v11  ;;  %6090 = vmax.xlane.f32.xlu0 %v6089_v57 }
 0xeeb   : > { %v8468_v44 = vpop.f32.mrf.mxu0 }
 0xeec   : > { %v6092_v46 = vsel %vm4735_vm15, %v6078_v10, -inf }
 0xeed   : > { %6093 = vmax.xlane.f32.xlu1 %v6092_v46 }
 0xeee   : > { %v5843_v27 = vpop.f32.mrf.mxu1 }
 0xeef   : > { %v6079_v55 = vmul.f32 0.5, %v5843_v27 }
 0xef0   : > { %v8475_v62 = vpop.f32.mrf.mxu1 }
 0xef1   : > { %v5919_v34 = vpop.f32.mrf.mxu0  ;;  %v6095_v30 = vsel %vm4735_vm15, %v6079_v55, -inf }
 0xef2   : > { %v6080_v43 = vmul.f32 0.5, %v5919_v34  ;;  %6096 = vmax.xlane.f32.xlu0 %v6095_v30 }
 0xef3   : > { %v8482_v17 = vpop.f32.mrf.mxu0 }
 0xef4   : > { %v6098_v12 = vsel %vm4735_vm15, %v6080_v43, -inf }
 0xef5   : > { %6099 = vmax.xlane.f32.xlu1 %v6098_v12 }
 0xef7   : > { %v5995_v26 = vpop.f32.mrf.mxu1  ;;  %v6085_v59 = vpop.xlane.xlu1 %6084 }
 0xef8   : > { %v6081_v63 = vmul.f32 0.5, %v5995_v26  ;;  %v6107_v47 = vsub.f32 %v6075_v45, %v6085_v59 }
 0xef9   : > { %v8489_v23 = vpop.f32.mrf.mxu1 }
 0xefa   : > { %v6071_v28 = vpop.f32.mrf.mxu0  ;;  %v6101_v13 = vsel %vm4735_vm15, %v6081_v63, -inf  ;;  %v6115_v24 = vmul.f32 1.442695, %v6107_v47 }
 0xefb   : > { %6102 = vmax.xlane.f32.xlu0 %v6101_v13  ;;  %v11032_v39 = vmul.f32 0.5, %v6071_v28 }
 0xefc   : > { %v8496_v9 = vpop.f32.mrf.mxu0  ;;  %8861 = vpow2.f32 %v6115_v24 }
 0xefd   : > { %v6104_v0 = vsel %vm4735_vm15, %v11032_v39, -inf }
 0xf06   : > { %6252 = vrot.lane.b32.xlu1 %v10923_v53, %s11329_s18 }
 0xf09   : > { %v11041_v58 = vpop.eup %8861 }
 0xf0a   : > { %6171 = vrot.lane.b32.xlu1 %v10884_v20, %s11329_s18  ;;  %v6131_v6 = vsel %vm4735_vm15, %v11041_v58, 0.0 }
 0xf11   : > { %6173 = vrot.lane.b32.xlu0 %v10875_v33, %s11329_s18 }
 0xf15   : > { %6250 = vrot.lane.b32.xlu0 %v10930_v50, %s11329_s18 }
 0xf19   : > { %6410 = vrot.lane.b32.xlu0 %v10921_v4, %s11329_s18 }
 0xf1d   : > { %6408 = vrot.lane.b32.xlu0 %v10953_v22, %s11329_s18 }
 0xf21   : > { %6568 = vrot.lane.b32.xlu0 %v10940_v2, %s11329_s18 }
 0xf25   : > { %6566 = vrot.lane.b32.xlu0 %v10977_v15, %s11329_s18 }
 0xf29   : > { %6726 = vrot.lane.b32.xlu0 %v5466_v7, %s11329_s18 }
 0xf2e   : > { %6105 = vmax.xlane.f32.xlu1 %v6104_v0 }
 0xf3f   : > { %6331 = vrot.lane.b32.xlu1 %v10932_v29, %s11329_s18 }
 0xf43   : > { %6329 = vrot.lane.b32.xlu1 %v10943_v14, %s11329_s18 }
 0xf47   : > { %6489 = vrot.lane.b32.xlu1 %v10928_v40, %s11329_s18 }
 0xf48   : > { %6132 = vadd.xlane.f32.xlu0 %v6131_v6 }
 0xf4b   : > { %6487 = vrot.lane.b32.xlu1 %v10967_v31, %s11329_s18 }
 0xf4f   : > { %6647 = vrot.lane.b32.xlu1 %v10964_v56, %s11329_s18 }
 0xf6e   : > { %v6088_v19 = vpop.xlane.xlu0 %6087 }
 0xf6f   : > { %v6108_v33 = vsub.f32 %v6076_v49, %v6088_v19 }
 0xf71   : > { %v6117_v60 = vmul.f32 1.442695, %v6108_v33 }
 0xf73   : > { %8863 = vpow2.f32 %v6117_v60  ;;  %v6091_v20 = vpop.xlane.xlu0 %6090 }
 0xf74   : > { %v6109_v25 = vsub.f32 %v6077_v48, %v6091_v20 }
 0xf76   : > { %v6119_v1 = vmul.f32 1.442695, %v6109_v25  ;;  %v6094_v4 = vpop.xlane.xlu1 %6093 }
 0xf77   : > { %v6110_v53 = vsub.f32 %v6078_v10, %v6094_v4 }
 0xf78   : > { %8865 = vpow2.f32 %v6119_v1 }
 0xf79   : > { %v6121_v40 = vmul.f32 1.442695, %v6110_v53 }
 0xf7b   : > { %8867 = vpow2.f32 %v6121_v40  ;;  %v6097_v37 = vpop.xlane.xlu0 %6096 }
 0xf7c   : > { %v6111_v50 = vsub.f32 %v6079_v55, %v6097_v37 }
 0xf7e   : > { %v6123_v29 = vmul.f32 1.442695, %v6111_v50  ;;  %v6100_v2 = vpop.xlane.xlu1 %6099 }
 0xf7f   : > { %v6112_v14 = vsub.f32 %v6080_v43, %v6100_v2 }
 0xf80   : > { %v11051_v22 = vpop.eup %8863  ;;  %8869 = vpow2.f32 %v6123_v29 }
 0xf81   : > { %v6125_v35 = vmul.f32 1.442695, %v6112_v14  ;;  %v6134_v56 = vsel %vm4735_vm15, %v11051_v22, 0.0 }
 0xf82   : > { %v6253_v31 = vpop.permute.xlu1 %6252  ;;  %6135 = vadd.xlane.f32.xlu1 %v6134_v56 }
 0xf83   : > { %8871 = vpow2.f32 %v6125_v35  ;;  %8505 = vmatpush3.msra.mxu0 %v6253_v31 }
 0xf84   : > { %v6103_v15 = vpop.xlane.xlu0 %6102  ;;  %8506 = vmatprep.subr.mxu0 %v11285_v18 }
 0xf85   : > { %v11056_v38 = vpop.eup %8865  ;;  %v6113_v7 = vsub.f32 %v6081_v63, %v6103_v15 }
 0xf86   : > { %v6137_v51 = vsel %vm4735_vm15, %v11056_v38, 0.0  ;;  %v6172_v54 = vpop.permute.xlu1 %6171 }
 0xf87   : > { %v6127_v8 = vmul.f32 1.442695, %v6113_v7  ;;  %6138 = vadd.xlane.f32.xlu0 %v6137_v51 }
 0xf88   : > { %v11060_v3 = vpop.eup %8867  ;;  %v6174_v45 = vpop.permute.xlu0 %6173 }
 0xf89   : > { %8873 = vpow2.f32 %v6127_v8  ;;  %8498 = vmatpush3.msra.mxu1 %v6174_v45  ;;  %v6140_v21 = vsel %vm4735_vm15, %v11060_v3, 0.0 }
 0xf8a   : > { %8499 = vmatprep.subr.mxu1 %v11285_v18  ;;  %6141 = vadd.xlane.f32.xlu1 %v6140_v21  ;;  %v6841_v21 = vld [vmem:[%s11330_s22 + $0x18] sm:$0xff] }
 0xf8b   : > { %8500 = vmatpush3.msra.mxu1 %v6172_v54  ;;  %v6840_v54 = vld [vmem:[%s11330_s22 + $0x10] sm:$0xff] }
 0xf8c   : > { %v6251_v36 = vpop.permute.xlu0 %6250  ;;  %8511 = vmatprep.subr.mxu1 %v11285_v18 }
 0xf8d   : > { %v11066_v49 = vpop.eup %8869  ;;  %8507 = vmatpush3.msra.mxu0 %v6251_v36  ;;  %v6839_v36 = vld [vmem:[%s11330_s22 + $0x8] sm:$0xff] }
 0xf8e   : > { %v6143_v61 = vsel %vm4735_vm15, %v11066_v49, 0.0  ;;  %8518 = vmatprep.subr.mxu0 %v11285_v18 }
 0xf8f   : > { %6144 = vadd.xlane.f32.xlu0 %v6143_v61 }
 0xf90   : > { %v11071_v5 = vpop.eup %8871  ;;  %v6411_v11 = vpop.permute.xlu0 %6410 }
 0xf91   : > { %v6146_v42 = vsel %vm4735_vm15, %v11071_v5, 0.0 }
 0xf92   : > { %6147 = vadd.xlane.f32.xlu1 %v6146_v42 }
 0xf94   : > { %v6409_v46 = vpop.permute.xlu0 %6408 }
 0xf96   : > { %v11075_v48 = vpop.eup %8873 }
 0xf97   : > { %v6149_v16 = vsel %vm4735_vm15, %v11075_v48, 0.0 }
 0xf98   : > { %6150 = vadd.xlane.f32.xlu0 %v6149_v16  ;;  %v6569_v27 = vpop.permute.xlu0 %6568 }
 0xf9c   : > { %v6567_v55 = vpop.permute.xlu0 %6566 }
 0xfa0   : > { %v6727_v30 = vpop.permute.xlu0 %6726 }
 0xfae   : > { %6724 = vrot.lane.b32.xlu0 %v10998_v52, %s11329_s18 }
 0xfb7   : > { %v6106_v57 = vpop.xlane.xlu1 %6105 }
 0xfb8   : > { %v6114_v10 = vsub.f32 %v11032_v39, %v6106_v57 }
 0xfba   : > { %v6129_v44 = vmul.f32 1.442695, %v6114_v10 }
 0xfbb   : > { %v6332_v52 = vpop.permute.xlu1 %6331 }
 0xfbc   : > { %8875 = vpow2.f32 %v6129_v44 }
 0xfbf   : > { %v6330_v26 = vpop.permute.xlu1 %6329 }
 0xfc3   : > { %v6490_v63 = vpop.permute.xlu1 %6489 }
 0xfc7   : > { %v6488_v23 = vpop.permute.xlu1 %6487 }
 0xfc9   : > { %v11082_v62 = vpop.eup %8875 }
 0xfca   : > { %v6152_v34 = vsel %vm4735_vm15, %v11082_v62, 0.0 }
 0xfcb   : > { %6153 = vadd.xlane.f32.xlu1 %v6152_v34  ;;  %v6648_v28 = vpop.permute.xlu1 %6647 }
 0xfd1   : > { %v6133_v43 = vpop.xlane.xlu0 %6132 }
 0xfd2   : > { %8877 = vrcp.f32 %v6133_v43 }
 0xfdc   : > { %6645 = vrot.lane.b32.xlu1 %v10989_v32, %s11329_s18  ;;  %s11335_s18 = sld [smem:[#allocation24_spill]] }
 0xfdf   : > { %v8878_v17 = vpop.eup %8877 }
 0xfe0   : > { %v6163_v12 = vmul.f32 %v8878_v17, %v11041_v58 }
 0xfe2   : > { %8502 = vmatmul.mubr.msk.f32.vlgmr.msra.gmra.mxu1 %vm4735_vm15, %v6163_v12 }
 0xfe3   : > { %8512 = vmatpush3.msra.mxu1 %v6332_v52  ;;  %8515 = vmatprep.mubr.msk.f32.mxu1 %vm8943_vm1, %v11285_v18 }
 0xfe4   : > { %8513 = vmatprep.subr.mxu1 %v11285_v18 }
 0xfe5   : > { %8514 = vmatpush3.msra.mxu1 %v6330_v26  ;;  %v6926_v26 = vld [vmem:[%s11335_s18 + $0x10] sm:$0xff] }
 0xfe6   : > { %8525 = vmatprep.subr.mxu1 %v11285_v18 }
0x100b   : > { %v6136_v32 = vpop.xlane.xlu1 %6135 }
0x100c   : > { %8879 = vrcp.f32 %v6136_v32 }
0x1010   : > { %v6139_v13 = vpop.xlane.xlu0 %6138 }
0x1011   : > { %8881 = vrcp.f32 %v6139_v13 }
0x1013   : > { %v6142_v9 = vpop.xlane.xlu1 %6141 }
0x1014   : > { %8883 = vrcp.f32 %v6142_v9 }
0x1018   : > { %v6145_v39 = vpop.xlane.xlu0 %6144 }
0x1019   : > { %v8880_v59 = vpop.eup %8879  ;;  %8885 = vrcp.f32 %v6145_v39 }
0x101a   : > { %v6164_v0 = vmul.f32 %v8880_v59, %v11051_v22 }
0x101b   : > { %v6148_v47 = vpop.xlane.xlu1 %6147 }
0x101c   : > { %8887 = vrcp.f32 %v6148_v47  ;;  %8509 = vmatmul.mubr.msk.f32.vlgmr.msra.gmra.mxu0 %vm4735_vm15, %v6164_v0 }
0x101d   : > { %8519 = vmatpush3.msra.mxu0 %v6411_v11  ;;  %8522 = vmatprep.mubr.msk.f32.mxu0 %vm8943_vm1, %v11285_v18 }
0x101e   : > { %v8882_v24 = vpop.eup %8881  ;;  %8520 = vmatprep.subr.mxu0 %v11285_v18 }
0x101f   : > { %v6165_v58 = vmul.f32 %v8882_v24, %v11056_v38  ;;  %8521 = vmatpush3.msra.mxu0 %v6409_v46 }
0x1020   : > { %8532 = vmatprep.subr.mxu0 %v11285_v18 }
0x1021   : > { %v8884_v6 = vpop.eup %8883  ;;  %8516 = vmatmul.mubr.msk.f32.vlgmr.msra.gmra.mxu1 %vm4735_vm15, %v6165_v58  ;;  %v6151_v20 = vpop.xlane.xlu0 %6150 }
0x1022   : > { %8526 = vmatpush3.msra.mxu1 %v6490_v63  ;;  %v6166_v19 = vmul.f32 %v8884_v6, %v11060_v3  ;;  %8529 = vmatprep.mubr.msk.f32.mxu1 %vm8943_vm1, %v11285_v18  ;;  %8889 = vrcp.f32 %v6151_v20  ;;  %v6925_v63 = vld [vmem:[%s11335_s18 + $0x8] sm:$0xff] }
0x1023   : > { %8527 = vmatprep.subr.mxu1 %v11285_v18 }
0x1024   : > { %8528 = vmatpush3.msra.mxu1 %v6488_v23  ;;  %8523 = vmatmul.mubr.msk.f32.vlgmr.msra.gmra.mxu0 %vm4735_vm15, %v6166_v19  ;;  %v6924_v23 = vld [vmem:[%s11335_s18] sm:$0xff]  ;;  %v7093_v19 = vld [vmem:[%s9165_s20 + $0x8] sm:$0xff] }
0x1025   : > { %8533 = vmatpush3.msra.mxu0 %v6569_v27  ;;  %8539 = vmatprep.subr.mxu1 %v11285_v18  ;;  %v6725_v4 = vpop.permute.xlu0 %6724 }
0x1026   : > { %v8886_v33 = vpop.eup %8885  ;;  %8534 = vmatprep.subr.mxu0 %v11285_v18  ;;  %8536 = vmatprep.mubr.msk.f32.mxu0 %vm8943_vm1, %v11285_v18 }
0x1027   : > { %v6167_v60 = vmul.f32 %v8886_v33, %v11066_v49  ;;  %8535 = vmatpush3.msra.mxu0 %v6567_v55  ;;  %v6838_v49 = vld [vmem:[%s11330_s22] sm:$0xff] }
0x1028   : > { %8546 = vmatprep.subr.mxu0 %v11285_v18  ;;  %v7092_v33 = vld [vmem:[%s9165_s20] sm:$0xff] }
0x1029   : > { %v8888_v25 = vpop.eup %8887  ;;  %8530 = vmatmul.mubr.msk.f32.vlgmr.msra.gmra.mxu1 %vm4735_vm15, %v6167_v60  ;;  %v7533_v60 = vld [vmem:[%s9160_s21] ss:$0 sm:$0xff] }
0x102a   : > { %v6168_v1 = vmul.f32 %v8888_v25, %v11071_v5  ;;  %8540 = vmatpush3.msra.mxu1 %v6648_v28  ;;  %8543 = vmatprep.mubr.msk.f32.mxu1 %vm8943_vm1, %v11285_v18  ;;  %v6927_v5 = vld [vmem:[%s11335_s18 + $0x18] sm:$0xff] }
0x102b   : > { %8541 = vmatprep.subr.mxu1 %v11285_v18 }
0x102c   : > { %8537 = vmatmul.mubr.msk.f32.vlgmr.msra.gmra.mxu0 %vm4735_vm15, %v6168_v1 }
0x102d   : > { %8547 = vmatpush3.msra.mxu0 %v6727_v30  ;;  %8550 = vmatprep.mubr.msk.f32.mxu0 %vm8943_vm1, %v11285_v18 }
0x102e   : > { %8548 = vmatprep.subr.mxu0 %v11285_v18 }
0x102f   : > { %8549 = vmatpush3.msra.mxu0 %v6725_v4  ;;  %v8890_v40 = vpop.eup %8889 }
0x1030   : > { %8564 = vmatprep.subr.mxu0 %v11285_v18  ;;  %v6169_v37 = vmul.f32 %v8890_v40, %v11075_v48 }
0x1054   : > { %v6154_v53 = vpop.xlane.xlu1 %6153 }
0x1055   : > { %8891 = vrcp.f32 %v6154_v53  ;;  %v7535_v53 = vld [vmem:[%s9170_s27] ss:$0 sm:$0xff] }
0x1058   : > { %v6646_v50 = vpop.permute.xlu1 %6645 }
0x1059   : > { %8542 = vmatpush3.msra.mxu1 %v6646_v50 }
0x105a   : > { %8544 = vmatmul.mubr.msk.f32.vlgmr.msra.gmra.mxu1 %vm4735_vm15, %v6169_v37  ;;  %8553 = vmatprep.subr.mxu1 %v11285_v18 }
0x105b   : > { %8561 = vmatprep.mubr.msk.f32.mxu1 %vm8943_vm1, %v11285_v18  ;;  %8554 = vmatpush3.msra.mxu1 %v6841_v21 }
0x105c   : > { %8555 = vmatprep.subr.mxu1 %v11285_v18 }
0x105d   : > { %8556 = vmatpush3.msra.mxu1 %v6840_v54 }
0x105e   : > { %8557 = vmatprep.subr.mxu1 %v11285_v18 }
0x105f   : > { %8558 = vmatpush3.msra.mxu1 %v6839_v36 }
0x1060   : > { %8559 = vmatprep.subr.mxu1 %v11285_v18 }
0x1061   : > { %8560 = vmatpush3.msra.mxu1 %v6838_v49 }
0x1062   : > { %v8892_v29 = vpop.eup %8891  ;;  %8575 = vmatprep.subr.mxu1 %v11285_v18 }
0x1063   : > { %v6170_v2 = vmul.f32 %v8892_v29, %v11082_v62 }
0x1065   : > { %8551 = vmatmul.mubr.msk.f32.vlgmr.msra.gmra.mxu0 %vm4735_vm15, %v6170_v2 }
0x1066   : > { %8572 = vmatprep.mubr.msk.f32.mxu0 %vm8943_vm1, %v11285_v18  ;;  %8565 = vmatpush3.msra.mxu0 %v6927_v5 }
0x1067   : > { %8566 = vmatprep.subr.mxu0 %v11285_v18 }
0x1068   : > { %8567 = vmatpush3.msra.mxu0 %v6926_v26 }
0x1069   : > { %8568 = vmatprep.subr.mxu0 %v11285_v18 }
0x106a   : > { %8569 = vmatpush3.msra.mxu0 %v6925_v63 }
0x106b   : > { %8570 = vmatprep.subr.mxu0 %v11285_v18 }
0x106c   : > { %8571 = vmatpush3.msra.mxu0 %v6924_v23 }
0x106d   : > { %8582 = vmatprep.subr.mxu0 %v11285_v18 }
0x10a2   : > { %v6246_v14 = vpop.f32.mrf.mxu1 }
0x10a4   : > { %v8503_v22 = vpop.f32.mrf.mxu1 }
0x10dc   : > { %v6325_v35 = vpop.f32.mrf.mxu0 }
0x10dd   : > { %6804 = vrot.lane.b32.xlu1 %v6325_v35, %s11331_s0  ;;  %s11337_s0 = smov 24  }
0x10de   : > { %v8510_v56 = vpop.f32.mrf.mxu0 }
0x10e1   : > { %v6404_v31 = vpop.f32.mrf.mxu1 }
0x10e2   : > { %6808 = vrot.lane.b32.xlu0 %v6404_v31, %s11332_s23  ;;  %s11339_s23 = sld [smem:[#allocation23_spill]] }
0x10e3   : > { %v8517_v15 = vpop.f32.mrf.mxu1 }
0x10e4   : > { %v6483_v38 = vpop.f32.mrf.mxu0 }
0x10e5   : > { %6812 = vrot.lane.b32.xlu1 %v6483_v38, %s11333_s11  ;;  %s11340_s11 = sld [smem:[#allocation26_spill]] }
0x10e6   : > { %v8524_v7 = vpop.f32.mrf.mxu0 }
0x10e8   : > { %v7529_v28 = vld [vmem:[%s11339_s23] ss:$0 sm:$0xff] }
0x10e9   : > { %v6562_v51 = vpop.f32.mrf.mxu1 }
0x10ea   : > { %6816 = vrot.lane.b32.xlu0 %v6562_v51, %s11334_s16  ;;  %s11341_s16 = sld [smem:[#allocation25_spill]] }
0x10eb   : > { %v8531_v8 = vpop.f32.mrf.mxu1  ;;  %v7010_v59 = vld [vmem:[%s11340_s11 + $0x8] sm:$0xff]  ;;  %v7009_v0 = vld [vmem:[%s11340_s11] sm:$0xff] }
0x10ec   : > { %v6641_v3 = vpop.f32.mrf.mxu0 }
0x10ed   : > { %6820 = vrot.lane.b32.xlu1 %v6641_v3, %s11336_s1  ;;  %s11338_s1 = smov 28  }
0x10ee   : > { %v8538_v45 = vpop.f32.mrf.mxu0 }
0x10f0   : > { %v7531_v47 = vld [vmem:[%s11341_s16] ss:$0 sm:$0xff] }
0x111a   : > { %v6720_v61 = vpop.f32.mrf.mxu1 }
0x111b   : > { %6824 = vrot.lane.b32.xlu0 %v6720_v61, %s11337_s0  ;;  %s11342_s0 = sshll.u32 %s11344_s10, 3 }
0x111c   : > { %v8545_v42 = vpop.f32.mrf.mxu1 }
0x1125   : > { %v6799_v48 = vpop.f32.mrf.mxu0 }
0x1126   : > { %6828 = vrot.lane.b32.xlu1 %v6799_v48, %s11338_s1  ;;  %s1304_s1 = scalar_lea.vmem %s9175_s4, %s11342_s0 }
0x1127   : > { %v8552_v16 = vpop.f32.mrf.mxu0 }
0x114f   : > { %v6805_v11 = vpop.permute.xlu1 %6804 }
0x1150   : > { %v6831_v46 = vsel %vm2136_vm9, %v6246_v14, %v6805_v11 }
0x1154   : > { %v6809_v57 = vpop.permute.xlu0 %6808 }
0x1155   : > { %v6832_v27 = vsel %vm4723_vm10, %v6831_v46, %v6809_v57 }
0x1157   : > { %v6813_v10 = vpop.permute.xlu1 %6812 }
0x1158   : > { %v6833_v62 = vsel %vm4729_vm14, %v6832_v27, %v6813_v10 }
0x115c   : > { %v6817_v44 = vpop.permute.xlu0 %6816 }
0x115d   : > { %v6834_v30 = vsel %vm4735_vm15, %v6833_v62, %v6817_v44 }
0x115f   : > { %v6821_v55 = vpop.permute.xlu1 %6820 }
0x1160   : > { %v6835_v43 = vsel %vm4741_vm0, %v6834_v30, %v6821_v55 }
0x118d   : > { %v6825_v34 = vpop.permute.xlu0 %6824 }
0x118e   : > { %v6836_v52 = vsel %vm4747_vm4, %v6835_v43, %v6825_v34 }
0x1198   : > { %v6829_v17 = vpop.permute.xlu1 %6828 }
0x1199   : > { %v6837_v12 = vsel %vm4753_vm6, %v6836_v52, %v6829_v17 }
0x119a   : > { %8562 = vmatmul.mubr.msk.f32.vlgmr.msra.gmra.mxu1 %vm1674_vm5, %v6837_v12 }
0x119b   : > { %8579 = vmatprep.mubr.msk.f32.mxu1 %vm8943_vm1, %v11285_v18  ;;  %8576 = vmatpush3.msra.mxu1 %v7010_v59 }
0x119c   : > { %8577 = vmatprep.subr.mxu1 %v11285_v18 }
0x119d   : > { %8578 = vmatpush3.msra.mxu1 %v7009_v0 }
0x125a   : > { %v6918_v32 = vpop.f32.mrf.mxu1 }
0x125b   : > { %v6919_v13 = vadd.f32 %v7529_v28, %v6918_v32 }
0x125c   : > { %v8563_v9 = vpop.f32.mrf.mxu1 }
0x125d   : > { %v6923_v39 = vadd.f32 %v6919_v13, %v10857_v41 }
0x125f   : > { %8573 = vmatmul.mubr.msk.f32.vlgmr.msra.gmra.mxu0 %vm1674_vm5, %v6923_v39 }
0x1260   : > { %8586 = vmatprep.mubr.msk.f32.mxu0 %vm8943_vm1, %v11285_v18  ;;  %8583 = vmatpush3.msra.mxu0 %v7093_v19 }
0x1261   : > { %8584 = vmatprep.subr.mxu0 %v11285_v18 }
0x1262   : > { %8585 = vmatpush3.msra.mxu0 %v7092_v33 }
0x131f   : > { %v7004_v24 = vpop.f32.mrf.mxu0 }
0x1320   : > { %v7005_v58 = vadd.f32 %v7531_v47, %v7004_v24 }
0x1321   : > { %v8574_v6 = vpop.f32.mrf.mxu0 }
0x1322   : > { %v7008_v41 = vmax.f32 %v7005_v58, 0.0 }
0x1324   : > { %8580 = vmatmul.mubr.msk.f32.vlgmr.msra.gmra.mxu1 %vm4735_vm15, %v7008_v41 }
0x13e4   : > { %v7087_v20 = vpop.f32.mrf.mxu1 }
0x13e5   : > { %v7088_v25 = vadd.f32 %v7533_v60, %v7087_v20 }
0x13e6   : > { %v8581_v1 = vpop.f32.mrf.mxu1 }
0x13e7   : > { %v7091_v4 = vmax.f32 %v7088_v25, 0.0 }
0x13e9   : > { %8587 = vmatmul.mubr.msk.f32.vlgmr.msra.gmra.mxu0 %vm4735_vm15, %v7091_v4 }
0x14a9   : > { %v7170_v40 = vpop.f32.mrf.mxu0 }
0x14aa   : > { %v7171_v37 = vadd.f32 %v7535_v53, %v7170_v40 }
0x14ab   : > { %v8588_v50 = vpop.f32.mrf.mxu0 }
0x14ac   : > { %7174 = vst.msk [vmem:[%s1304_s1] sm:$0xff] %vm1593_vm3, %v7171_v37 }
0x14ad PF: > { %s93_s7 = sadd.s32 1, %s8899_s7  }
0x14ae   : > { %p90_p4 = scmp.ge.s32.totalorder %s93_s7, 4  }
0x14b0   :  { %92 = sbr.rel (!%p90_p4) target bundleno = 79 (0x4f), region = 267 }

</bundles_post_ra>
